<compile_context>
chip_gen: v7x
topology: tpu7x:2x2x1
jax: 0.10.0
libtpu: 0.0.40
codegen_flags: <defaults>
</compile_context>

<pallas_src>
import functools

import numpy as np
import jax
import jax.numpy as jnp
from jax import lax
from jax.experimental import pallas as pl
from jax.experimental.pallas import tpu as pltpu

_LANE = 128
_EPS = 1e-5


def _rup(x, m):
    return ((x + m - 1) // m) * m


def _vmem_limit_bytes():
    """Generation-specific scoped-VMEM limit (leave double-buffer headroom)."""
    try:
        kind = jax.devices()[0].device_kind.lower()
    except Exception:
        kind = ""
    if "v7" in kind or "7x" in kind:
        return 48 * 1024 * 1024          # v7x: 64 MiB physical VMEM per core
    return 96 * 1024 * 1024              # v4/v5/v6: 128 MiB physical VMEM


def _pick_block_h(hp, wp, cin_p, cout_p, limit_bytes):
    """Largest divisor of hp whose per-step VMEM footprint fits the budget.

    Prefers block_h with block_h*wp a multiple of 8 so the in-kernel reshapes
    are layout-preserving re-tilings.
    """
    budget = int(limit_bytes * 0.75)
    resident = 2 * hp * wp * cin_p * 2          # bf16 input image (dbuf)
    resident += 2 * 9 * cin_p * cout_p * 2      # bf16 weights (dbuf)
    fallback = None
    for bh in range(hp, 0, -1):
        if hp % bh:
            continue
        rows = bh * wp
        step = ((bh + 2) * (wp + 2) * cin_p * 2     # bf16 padded scratch
                + rows * cin_p * 2                  # bf16 shifted-tap temp
                + rows * cout_p * 4                 # f32 accumulator temp
                + 2 * rows * cout_p * 2             # bf16 output block (dbuf)
                + 2 * 2 * cout_p * 4)               # stats block (dbuf)
        if resident + step > budget:
            continue
        if rows % 8 == 0:
            return bh
        if fallback is None:
            fallback = bh
    return fallback if fallback is not None else 1


# ----------------------------- Pallas kernel --------------------------------
def _conv_stage_kernel(x_ref, w_ref, scale_ref, shift_ref,
                       y_ref, stats_ref, pad_ref,
                       *, block_h, apply_input_act):
    # x_ref:     (1, Hp, Wp, Cin_p)   bf16  full image of one batch element
    #                                       (raw output of the previous stage,
    #                                        or the pooled input)
    # w_ref:     (9, Cin_p, Cout_p)   bf16  per-tap conv weights
    # scale_ref/shift_ref: (1,1,Cin_p) f32  fused BN affine of previous stage
    # y_ref:     (1, bh, Wp, Cout_p)  bf16  raw conv output rows (pre-BN)
    # stats_ref: (1, 1, 2, Cout_p)    f32   per-(batch,row-block) [sum, sum_sq]
    # pad_ref:   (bh+2, Wp+2, Cin_p)  bf16  zero-padded activation scratch
    _, hp, wp, cin = x_ref.shape
    cout = y_ref.shape[3]
    bh = block_h
    rows = bh * wp
    i = pl.program_id(1)
    nb = pl.num_programs(1)
    r0 = i * bh

    def act(v):
        # Previous stage's BatchNorm affine + ReLU, fused on load (f32 math).
        if not apply_input_act:
            return v                      # already bf16
        v32 = v.astype(jnp.float32)
        v32 = jnp.maximum(v32 * scale_ref[...] + shift_ref[...], 0.0)
        return v32.astype(jnp.bfloat16)

    # Re-establish the zero border every step (scratch persists across grid
    # steps and cores).
    zrow = jnp.zeros((1, wp + 2, cin), jnp.bfloat16)
    zcol = jnp.zeros((bh + 2, 1, cin), jnp.bfloat16)
    pad_ref[0:1, :, :] = zrow
    pad_ref[bh + 1:bh + 2, :, :] = zrow
    pad_ref[:, 0:1, :] = zcol
    pad_ref[:, wp + 1:wp + 2, :] = zcol

    # Interior rows of this row block.
    pad_ref[1:bh + 1, 1:wp + 1, :] = act(x_ref[0, pl.ds(r0, bh), :, :])

    # 1-row halos from the neighbouring row blocks (zeros at image boundary,
    # already written above).
    @pl.when(i > 0)
    def _():
        pad_ref[0:1, 1:wp + 1, :] = act(x_ref[0, pl.ds(r0 - 1, 1), :, :])

    @pl.when(i < nb - 1)
    def _():
        pad_ref[bh + 1:bh + 2, 1:wp + 1, :] = act(
            x_ref[0, pl.ds(r0 + bh, 1), :, :])

    # 9 tap-accumulating MXU matmuls (K = Cin_p) reading shifted slices of the
    # padded scratch directly; f32 accumulation.  No im2col slab.
    acc = None
    for t in range(9):
        dy, dx = t // 3, t % 3
        patch = pad_ref[dy:dy + bh, dx:dx + wp, :].reshape(rows, cin)
        d = jnp.dot(patch, w_ref[t], preferred_element_type=jnp.float32)
        acc = d if acc is None else acc + d
    # NOTE: conv bias intentionally omitted -- it is cancelled exactly by the
    # training-mode BatchNorm mean subtraction (variance unaffected).

    # Per-(batch, row-block) partial BN statistics from the f32 accumulator.
    stats_ref[0, 0, 0:1, :] = jnp.sum(acc, axis=0, keepdims=True)
    stats_ref[0, 0, 1:2, :] = jnp.sum(acc * acc, axis=0, keepdims=True)

    # Un-normalized conv output (bf16); BN affine is applied by the next stage.
    y_ref[0] = acc.reshape(bh, wp, cout).astype(jnp.bfloat16)


# ------------------------------ stage wrapper --------------------------------
def _conv_stage(x_p, w_t, scale, shift, *, block_h, apply_input_act,
                vmem_limit):
    n, hp, wp, cin_p = x_p.shape
    _, _, cout_p = w_t.shape
    bh = block_h
    nb = hp // bh
    kernel = functools.partial(_conv_stage_kernel, block_h=bh,
                               apply_input_act=apply_input_act)
    return pl.pallas_call(
        kernel,
        grid=(n, nb),
        in_specs=[
            # Full image per batch element; block index is constant along the
            # row-block axis so it stays resident across row blocks.
            pl.BlockSpec((1, hp, wp, cin_p), lambda b, i: (b, 0, 0, 0)),
            pl.BlockSpec((9, cin_p, cout_p), lambda b, i: (0, 0, 0)),
            pl.BlockSpec((1, 1, cin_p), lambda b, i: (0, 0, 0)),
            pl.BlockSpec((1, 1, cin_p), lambda b, i: (0, 0, 0)),
        ],
        out_specs=[
            pl.BlockSpec((1, bh, wp, cout_p), lambda b, i: (b, i, 0, 0)),
            pl.BlockSpec((1, 1, 2, cout_p), lambda b, i: (b, i, 0, 0)),
        ],
        out_shape=[
            jax.ShapeDtypeStruct((n, hp, wp, cout_p), jnp.bfloat16),
            jax.ShapeDtypeStruct((n, nb, 2, cout_p), jnp.float32),
        ],
        scratch_shapes=[
            pltpu.VMEM((bh + 2, wp + 2, cin_p), jnp.bfloat16),
        ],
        compiler_params=pltpu.CompilerParams(
            dimension_semantics=("parallel", "parallel"),
            vmem_limit_bytes=vmem_limit),
    )(x_p, w_t, scale, shift)


def _weight_tensor(w_oihw, cin_p, cout_p):
    """OIHW conv weight -> (9, Cin_p, Cout_p) bf16 per-tap matrices."""
    cout, cin, _, _ = w_oihw.shape
    w = jnp.transpose(w_oihw, (2, 3, 1, 0))                  # (3,3,cin,cout)
    w = jnp.pad(w, ((0, 0), (0, 0), (0, cin_p - cin), (0, cout_p - cout)))
    return w.reshape(9, cin_p, cout_p).astype(jnp.bfloat16)


def _finalize_bn(partial_stats, gamma, beta, count, c_p):
    """Tiny per-channel finalization of [sum, sum_sq] -> fused affine."""
    tot = jnp.sum(partial_stats.reshape(-1, 2, c_p), axis=0)     # (2, c_p)
    mean = tot[0] / count
    var = jnp.maximum(tot[1] / count - mean * mean, 0.0)         # biased var
    g = jnp.pad(gamma.astype(jnp.float32), (0, c_p - gamma.shape[0]))
    b = jnp.pad(beta.astype(jnp.float32), (0, c_p - beta.shape[0]))
    scale = g * lax.rsqrt(var + _EPS)
    shift = b - mean * scale
    return scale.reshape(1, 1, c_p), shift.reshape(1, 1, c_p)


# -------------------------------- forward -----------------------------------
def down_forward(x_nchw, params):
    """Down.forward: input/output are NCHW float32 (PyTorch convention)."""
    w1, b1, g1, bt1, w2, b2, g2, bt2 = params
    del b1, b2  # bias before training-mode BN is cancelled by mean subtraction
    n, cin, h, w = x_nchw.shape
    hp, wp = h // 2, w // 2
    cout = w1.shape[0]
    cin_p, cout_p = _rup(cin, _LANE), _rup(cout, _LANE)
    count = n * hp * wp

    vlim = _vmem_limit_bytes()
    bh1 = _pick_block_h(hp, wp, cin_p, cout_p, vlim)
    bh2 = _pick_block_h(hp, wp, cout_p, cout_p, vlim)

    # Glue: NCHW -> NHWC, 2x2 max pool (single reduce), channel pad to a
    # lane-dense multiple of 128, bf16 (the MXU operands are bf16 anyway).
    x_nhwc = jnp.transpose(x_nchw, (0, 2, 3, 1))
    pooled = x_nhwc.reshape(n, hp, 2, wp, 2, cin).max(axis=(2, 4))
    pooled = jnp.pad(pooled, ((0, 0), (0, 0), (0, 0), (0, cin_p - cin)))
    pooled = pooled.astype(jnp.bfloat16)

    w1t = _weight_tensor(w1, cin_p, cout_p)
    w2t = _weight_tensor(w2, cout_p, cout_p)

    one = jnp.ones((1, 1, cin_p), jnp.float32)    # identity affine for stage 1
    zero = jnp.zeros((1, 1, cin_p), jnp.float32)

    # Stage 1: conv1 (+ partial BN1 stats).
    y1_raw, st1 = _conv_stage(pooled, w1t, one, zero, block_h=bh1,
                              apply_input_act=False, vmem_limit=vlim)
    sc1, sh1 = _finalize_bn(st1, g1, bt1, count, cout_p)

    # Stage 2: fused BN1+ReLU prologue -> conv2 (+ partial BN2 stats).
    y2_raw, st2 = _conv_stage(y1_raw, w2t, sc1, sh1, block_h=bh2,
                              apply_input_act=True, vmem_limit=vlim)
    sc2, sh2 = _finalize_bn(st2, g2, bt2, count, cout_p)

    # Plain-JAX fused epilogue: BN2 affine + ReLU, channel slice, NHWC->NCHW.
    y2 = y2_raw.astype(jnp.float32)
    out = jnp.maximum(y2 * sc2.reshape(1, 1, 1, cout_p)
                      + sh2.reshape(1, 1, 1, cout_p), 0.0)
    return jnp.transpose(out[..., :cout], (0, 3, 1, 2))


# ----------------------------- pure-JAX reference ---------------------------
def _ref_forward(x, params):
    w1, b1, g1, bt1, w2, b2, g2, bt2 = params
    N, C, H, W = x.shape
    xr = x.reshape(N, C, H // 2, 2, W // 2, 2).max(axis=(3, 5))  # MaxPool2d(2)

    def conv_bn_relu(xin, w, b, g, bt):
        y = lax.conv_general_dilated(
            xin, w, window_strides=(1, 1), padding=((1, 1), (1, 1)),
            dimension_numbers=('NCHW', 'OIHW', 'NCHW'))
        y = y + b[None, :, None, None]
        mean = y.mean(axis=(0, 2, 3), keepdims=True)
        var = y.var(axis=(0, 2, 3), keepdims=True)               # biased
        yn = (y - mean) / jnp.sqrt(var + 1e-5)
        yn = yn * g[None, :, None, None] + bt[None, :, None, None]
        return jnp.maximum(yn, 0.0)

    y = conv_bn_relu(xr, w1, b1, g1, bt1)
    y = conv_bn_relu(y, w2, b2, g2, bt2)
    return y


if __name__ == "__main__":
    key = jax.random.PRNGKey(0)
    k_x, k1, k2, k3, k4, k5, k6, k7, k8 = jax.random.split(key, 9)

    N, in_ch, out_ch, H, W = 2, 4, 8, 16, 16
    x = jax.random.normal(k_x, (N, in_ch, H, W), jnp.float32)

    # Deterministic synthetic parameters (shapes from Down(in_ch=4, out_ch=8)).
    w1 = 0.1 * jax.random.normal(k1, (out_ch, in_ch, 3, 3), jnp.float32)
    b1 = 0.05 * jax.random.normal(k2, (out_ch,), jnp.float32)
    g1 = 1.0 + 0.1 * jax.random.normal(k3, (out_ch,), jnp.float32)
    bt1 = 0.05 * jax.random.normal(k4, (out_ch,), jnp.float32)
    w2 = 0.1 * jax.random.normal(k5, (out_ch, out_ch, 3, 3), jnp.float32)
    b2 = 0.05 * jax.random.normal(k6, (out_ch,), jnp.float32)
    g2 = 1.0 + 0.1 * jax.random.normal(k7, (out_ch,), jnp.float32)
    bt2 = 0.05 * jax.random.normal(k8, (out_ch,), jnp.float32)
    params = (w1, b1, g1, bt1, w2, b2, g2, bt2)

    down_fn = jax.jit(down_forward)
    out = jax.block_until_ready(down_fn(x, params))
    ref = jax.block_until_ready(_ref_forward(x, params))

    assert out.shape == (N, out_ch, H // 2, W // 2), out.shape
    # bf16 MXU operands + bf16 inter-stage activations (f32 accumulation/BN).
    np.testing.assert_allclose(np.asarray(out), np.asarray(ref),
                               rtol=4e-2, atol=4e-2)
    print("KERNEL_OK")
</pallas_src>

<mosaic_0001>
module attributes {stable_mosaic.version = 11 : i64} {
  func.func @_conv_stage_kernel(%arg0: i32, %arg1: i32, %arg2: memref<1x8x8x128xbf16, #tpu.memory_space<vmem>>, %arg3: memref<9x128x128xbf16, #tpu.memory_space<vmem>>, %arg4: memref<1x1x128xf32, #tpu.memory_space<vmem>>, %arg5: memref<1x1x128xf32, #tpu.memory_space<vmem>>, %arg6: memref<1x8x8x128xbf16, #tpu.memory_space<vmem>>, %arg7: memref<1x1x2x128xf32, #tpu.memory_space<vmem>>, %arg8: memref<10x10x128xbf16, #tpu.memory_space<vmem>>) attributes {dimension_semantics = [#tpu.dimension_semantics<parallel>, #tpu.dimension_semantics<parallel>], iteration_bounds = array<i64: 2, 1>, scalar_prefetch = 0 : i64, scratch_operands = 1 : i64, tpu.core_type = #tpu.core_type<tc>, window_params = [{transform_indices = @transform_0, window_bounds = array<i64: 1, 8, 8, 128>}, {pipeline_mode = #tpu.pipeline_mode<synchronous>, transform_indices = @transform_1, window_bounds = array<i64: 9, 128, 128>}, {pipeline_mode = #tpu.pipeline_mode<synchronous>, transform_indices = @transform_2, window_bounds = array<i64: 1, 1, 128>}, {pipeline_mode = #tpu.pipeline_mode<synchronous>, transform_indices = @transform_3, window_bounds = array<i64: 1, 1, 128>}, {transform_indices = @transform_4, window_bounds = array<i64: 1, 8, 8, 128>}, {transform_indices = @transform_5, window_bounds = array<i64: 1, 1, 2, 128>}]} {
    %c8_i32 = arith.constant 8 : i32
    %0 = arith.muli %arg1, %c8_i32 : i32
    %cst = arith.constant 0.000000e+00 : bf16
    %1 = vector.broadcast %cst : bf16 to vector<1x10x128xbf16>
    %cst_0 = arith.constant 0.000000e+00 : bf16
    %2 = vector.broadcast %cst_0 : bf16 to vector<10x1x128xbf16>
    %c0 = arith.constant 0 : index
    %c0_1 = arith.constant 0 : index
    %c0_2 = arith.constant 0 : index
    %3 = vector.load %arg8[%c0, %c0_1, %c0_2] : memref<10x10x128xbf16, #tpu.memory_space<vmem>>, vector<1x10x128xbf16>
    tpu.vector_store %arg8[%c0, %c0_1, %c0_2], %1 {strides = array<i32>} : memref<10x10x128xbf16, #tpu.memory_space<vmem>>, vector<1x10x128xbf16>,
    %c9 = arith.constant 9 : index
    %c0_3 = arith.constant 0 : index
    %c0_4 = arith.constant 0 : index
    %4 = vector.load %arg8[%c9, %c0_3, %c0_4] : memref<10x10x128xbf16, #tpu.memory_space<vmem>>, vector<1x10x128xbf16>
    tpu.vector_store %arg8[%c9, %c0_3, %c0_4], %1 {strides = array<i32>} : memref<10x10x128xbf16, #tpu.memory_space<vmem>>, vector<1x10x128xbf16>,
    %c0_5 = arith.constant 0 : index
    %c0_6 = arith.constant 0 : index
    %c0_7 = arith.constant 0 : index
    %5 = vector.load %arg8[%c0_5, %c0_6, %c0_7] : memref<10x10x128xbf16, #tpu.memory_space<vmem>>, vector<10x1x128xbf16>
    tpu.vector_store %arg8[%c0_5, %c0_6, %c0_7], %2 {strides = array<i32>} : memref<10x10x128xbf16, #tpu.memory_space<vmem>>, vector<10x1x128xbf16>,
    %c0_8 = arith.constant 0 : index
    %c9_9 = arith.constant 9 : index
    %c0_10 = arith.constant 0 : index
    %6 = vector.load %arg8[%c0_8, %c9_9, %c0_10] : memref<10x10x128xbf16, #tpu.memory_space<vmem>>, vector<10x1x128xbf16>
    tpu.vector_store %arg8[%c0_8, %c9_9, %c0_10], %2 {strides = array<i32>} : memref<10x10x128xbf16, #tpu.memory_space<vmem>>, vector<10x1x128xbf16>,
    %c0_11 = arith.constant 0 : index
    %7 = arith.index_cast %0 : i32 to index
    %c0_12 = arith.constant 0 : index
    %c0_13 = arith.constant 0 : index
    %8 = vector.load %arg2[%c0_11, %7, %c0_12, %c0_13] : memref<1x8x8x128xbf16, #tpu.memory_space<vmem>>, vector<1x8x8x128xbf16>
    %9 = vector.shape_cast %8 : vector<1x8x8x128xbf16> to vector<8x8x128xbf16>
    %c1 = arith.constant 1 : index
    %c1_14 = arith.constant 1 : index
    %c0_15 = arith.constant 0 : index
    %10 = vector.load %arg8[%c1, %c1_14, %c0_15] : memref<10x10x128xbf16, #tpu.memory_space<vmem>>, vector<8x8x128xbf16>
    tpu.vector_store %arg8[%c1, %c1_14, %c0_15], %9 {strides = array<i32>} : memref<10x10x128xbf16, #tpu.memory_space<vmem>>, vector<8x8x128xbf16>,
    %c0_i32 = arith.constant 0 : i32
    %11 = arith.cmpi sgt, %arg1, %c0_i32 : i32
    %12 = arith.extui %11 : i1 to i32
    %c0_i32_16 = arith.constant 0 : i32
    %13 = arith.cmpi ne, %12, %c0_i32_16 : i32
    scf.if %13 {
      %c1_i32 = arith.constant 1 : i32
      %86 = arith.subi %0, %c1_i32 : i32
      %c0_89 = arith.constant 0 : index
      %87 = arith.index_cast %86 : i32 to index
      %c0_90 = arith.constant 0 : index
      %c0_91 = arith.constant 0 : index
      %88 = vector.load %arg2[%c0_89, %87, %c0_90, %c0_91] : memref<1x8x8x128xbf16, #tpu.memory_space<vmem>>, vector<1x1x8x128xbf16>
      %89 = vector.shape_cast %88 : vector<1x1x8x128xbf16> to vector<1x8x128xbf16>
      %c0_92 = arith.constant 0 : index
      %c1_93 = arith.constant 1 : index
      %c0_94 = arith.constant 0 : index
      %90 = vector.load %arg8[%c0_92, %c1_93, %c0_94] : memref<10x10x128xbf16, #tpu.memory_space<vmem>>, vector<1x8x128xbf16>
      tpu.vector_store %arg8[%c0_92, %c1_93, %c0_94], %89 {strides = array<i32>} : memref<10x10x128xbf16, #tpu.memory_space<vmem>>, vector<1x8x128xbf16>,
    } else {
    }
    %c0_i32_17 = arith.constant 0 : i32
    %14 = arith.cmpi slt, %arg1, %c0_i32_17 : i32
    %15 = arith.extui %14 : i1 to i32
    %c0_i32_18 = arith.constant 0 : i32
    %16 = arith.cmpi ne, %15, %c0_i32_18 : i32
    scf.if %16 {
      %c8_i32_89 = arith.constant 8 : i32
      %86 = arith.addi %0, %c8_i32_89 : i32
      %c0_90 = arith.constant 0 : index
      %87 = arith.index_cast %86 : i32 to index
      %c0_91 = arith.constant 0 : index
      %c0_92 = arith.constant 0 : index
      %88 = vector.load %arg2[%c0_90, %87, %c0_91, %c0_92] : memref<1x8x8x128xbf16, #tpu.memory_space<vmem>>, vector<1x1x8x128xbf16>
      %89 = vector.shape_cast %88 : vector<1x1x8x128xbf16> to vector<1x8x128xbf16>
      %c9_93 = arith.constant 9 : index
      %c1_94 = arith.constant 1 : index
      %c0_95 = arith.constant 0 : index
      %90 = vector.load %arg8[%c9_93, %c1_94, %c0_95] : memref<10x10x128xbf16, #tpu.memory_space<vmem>>, vector<1x8x128xbf16>
      tpu.vector_store %arg8[%c9_93, %c1_94, %c0_95], %89 {strides = array<i32>} : memref<10x10x128xbf16, #tpu.memory_space<vmem>>, vector<1x8x128xbf16>,
    } else {
    }
    %c0_19 = arith.constant 0 : index
    %c0_20 = arith.constant 0 : index
    %c0_21 = arith.constant 0 : index
    %17 = vector.load %arg8[%c0_19, %c0_20, %c0_21] : memref<10x10x128xbf16, #tpu.memory_space<vmem>>, vector<8x8x128xbf16>
    %18 = vector.shape_cast %17 : vector<8x8x128xbf16> to vector<64x128xbf16>
    %c0_22 = arith.constant 0 : index
    %c0_23 = arith.constant 0 : index
    %c0_24 = arith.constant 0 : index
    %19 = vector.load %arg3[%c0_22, %c0_23, %c0_24] : memref<9x128x128xbf16, #tpu.memory_space<vmem>>, vector<1x128x128xbf16>
    %20 = vector.shape_cast %19 : vector<1x128x128xbf16> to vector<128x128xbf16>
    %cst_25 = arith.constant dense<0.000000e+00> : vector<64x128xf32>
    %21 = tpu.matmul %18, %20, %cst_25 {dimension_numbers = #tpu.dot_dimension_numbers<[1], [0], [0], [1], [0, 0, 1, 1], [], []>} : vector<64x128xbf16>, vector<128x128xbf16>, vector<64x128xf32> -> vector<64x128xf32>
    %c0_26 = arith.constant 0 : index
    %c1_27 = arith.constant 1 : index
    %c0_28 = arith.constant 0 : index
    %22 = vector.load %arg8[%c0_26, %c1_27, %c0_28] : memref<10x10x128xbf16, #tpu.memory_space<vmem>>, vector<8x8x128xbf16>
    %23 = vector.shape_cast %22 : vector<8x8x128xbf16> to vector<64x128xbf16>
    %c1_29 = arith.constant 1 : index
    %c0_30 = arith.constant 0 : index
    %c0_31 = arith.constant 0 : index
    %24 = vector.load %arg3[%c1_29, %c0_30, %c0_31] : memref<9x128x128xbf16, #tpu.memory_space<vmem>>, vector<1x128x128xbf16>
    %25 = vector.shape_cast %24 : vector<1x128x128xbf16> to vector<128x128xbf16>
    %cst_32 = arith.constant dense<0.000000e+00> : vector<64x128xf32>
    %26 = tpu.matmul %23, %25, %cst_32 {dimension_numbers = #tpu.dot_dimension_numbers<[1], [0], [0], [1], [0, 0, 1, 1], [], []>} : vector<64x128xbf16>, vector<128x128xbf16>, vector<64x128xf32> -> vector<64x128xf32>
    %27 = arith.addf %21, %26 : vector<64x128xf32>
    %c0_33 = arith.constant 0 : index
    %c2 = arith.constant 2 : index
    %c0_34 = arith.constant 0 : index
    %28 = vector.load %arg8[%c0_33, %c2, %c0_34] : memref<10x10x128xbf16, #tpu.memory_space<vmem>>, vector<8x8x128xbf16>
    %29 = vector.shape_cast %28 : vector<8x8x128xbf16> to vector<64x128xbf16>
    %c2_35 = arith.constant 2 : index
    %c0_36 = arith.constant 0 : index
    %c0_37 = arith.constant 0 : index
    %30 = vector.load %arg3[%c2_35, %c0_36, %c0_37] : memref<9x128x128xbf16, #tpu.memory_space<vmem>>, vector<1x128x128xbf16>
    %31 = vector.shape_cast %30 : vector<1x128x128xbf16> to vector<128x128xbf16>
    %cst_38 = arith.constant dense<0.000000e+00> : vector<64x128xf32>
    %32 = tpu.matmul %29, %31, %cst_38 {dimension_numbers = #tpu.dot_dimension_numbers<[1], [0], [0], [1], [0, 0, 1, 1], [], []>} : vector<64x128xbf16>, vector<128x128xbf16>, vector<64x128xf32> -> vector<64x128xf32>
    %33 = arith.addf %27, %32 : vector<64x128xf32>
    %c1_39 = arith.constant 1 : index
    %c0_40 = arith.constant 0 : index
    %c0_41 = arith.constant 0 : index
    %34 = vector.load %arg8[%c1_39, %c0_40, %c0_41] : memref<10x10x128xbf16, #tpu.memory_space<vmem>>, vector<8x8x128xbf16>
    %35 = vector.shape_cast %34 : vector<8x8x128xbf16> to vector<64x128xbf16>
    %c3 = arith.constant 3 : index
    %c0_42 = arith.constant 0 : index
    %c0_43 = arith.constant 0 : index
    %36 = vector.load %arg3[%c3, %c0_42, %c0_43] : memref<9x128x128xbf16, #tpu.memory_space<vmem>>, vector<1x128x128xbf16>
    %37 = vector.shape_cast %36 : vector<1x128x128xbf16> to vector<128x128xbf16>
    %cst_44 = arith.constant dense<0.000000e+00> : vector<64x128xf32>
    %38 = tpu.matmul %35, %37, %cst_44 {dimension_numbers = #tpu.dot_dimension_numbers<[1], [0], [0], [1], [0, 0, 1, 1], [], []>} : vector<64x128xbf16>, vector<128x128xbf16>, vector<64x128xf32> -> vector<64x128xf32>
    %39 = arith.addf %33, %38 : vector<64x128xf32>
    %c1_45 = arith.constant 1 : index
    %c1_46 = arith.constant 1 : index
    %c0_47 = arith.constant 0 : index
    %40 = vector.load %arg8[%c1_45, %c1_46, %c0_47] : memref<10x10x128xbf16, #tpu.memory_space<vmem>>, vector<8x8x128xbf16>
    %41 = vector.shape_cast %40 : vector<8x8x128xbf16> to vector<64x128xbf16>
    %c4 = arith.constant 4 : index
    %c0_48 = arith.constant 0 : index
    %c0_49 = arith.constant 0 : index
    %42 = vector.load %arg3[%c4, %c0_48, %c0_49] : memref<9x128x128xbf16, #tpu.memory_space<vmem>>, vector<1x128x128xbf16>
    %43 = vector.shape_cast %42 : vector<1x128x128xbf16> to vector<128x128xbf16>
    %cst_50 = arith.constant dense<0.000000e+00> : vector<64x128xf32>
    %44 = tpu.matmul %41, %43, %cst_50 {dimension_numbers = #tpu.dot_dimension_numbers<[1], [0], [0], [1], [0, 0, 1, 1], [], []>} : vector<64x128xbf16>, vector<128x128xbf16>, vector<64x128xf32> -> vector<64x128xf32>
    %45 = arith.addf %39, %44 : vector<64x128xf32>
    %c1_51 = arith.constant 1 : index
    %c2_52 = arith.constant 2 : index
    %c0_53 = arith.constant 0 : index
    %46 = vector.load %arg8[%c1_51, %c2_52, %c0_53] : memref<10x10x128xbf16, #tpu.memory_space<vmem>>, vector<8x8x128xbf16>
    %47 = vector.shape_cast %46 : vector<8x8x128xbf16> to vector<64x128xbf16>
    %c5 = arith.constant 5 : index
    %c0_54 = arith.constant 0 : index
    %c0_55 = arith.constant 0 : index
    %48 = vector.load %arg3[%c5, %c0_54, %c0_55] : memref<9x128x128xbf16, #tpu.memory_space<vmem>>, vector<1x128x128xbf16>
    %49 = vector.shape_cast %48 : vector<1x128x128xbf16> to vector<128x128xbf16>
    %cst_56 = arith.constant dense<0.000000e+00> : vector<64x128xf32>
    %50 = tpu.matmul %47, %49, %cst_56 {dimension_numbers = #tpu.dot_dimension_numbers<[1], [0], [0], [1], [0, 0, 1, 1], [], []>} : vector<64x128xbf16>, vector<128x128xbf16>, vector<64x128xf32> -> vector<64x128xf32>
    %51 = arith.addf %45, %50 : vector<64x128xf32>
    %c2_57 = arith.constant 2 : index
    %c0_58 = arith.constant 0 : index
    %c0_59 = arith.constant 0 : index
    %52 = vector.load %arg8[%c2_57, %c0_58, %c0_59] : memref<10x10x128xbf16, #tpu.memory_space<vmem>>, vector<8x8x128xbf16>
    %53 = vector.shape_cast %52 : vector<8x8x128xbf16> to vector<64x128xbf16>
    %c6 = arith.constant 6 : index
    %c0_60 = arith.constant 0 : index
    %c0_61 = arith.constant 0 : index
    %54 = vector.load %arg3[%c6, %c0_60, %c0_61] : memref<9x128x128xbf16, #tpu.memory_space<vmem>>, vector<1x128x128xbf16>
    %55 = vector.shape_cast %54 : vector<1x128x128xbf16> to vector<128x128xbf16>
    %cst_62 = arith.constant dense<0.000000e+00> : vector<64x128xf32>
    %56 = tpu.matmul %53, %55, %cst_62 {dimension_numbers = #tpu.dot_dimension_numbers<[1], [0], [0], [1], [0, 0, 1, 1], [], []>} : vector<64x128xbf16>, vector<128x128xbf16>, vector<64x128xf32> -> vector<64x128xf32>
    %57 = arith.addf %51, %56 : vector<64x128xf32>
    %c2_63 = arith.constant 2 : index
    %c1_64 = arith.constant 1 : index
    %c0_65 = arith.constant 0 : index
    %58 = vector.load %arg8[%c2_63, %c1_64, %c0_65] : memref<10x10x128xbf16, #tpu.memory_space<vmem>>, vector<8x8x128xbf16>
    %59 = vector.shape_cast %58 : vector<8x8x128xbf16> to vector<64x128xbf16>
    %c7 = arith.constant 7 : index
    %c0_66 = arith.constant 0 : index
    %c0_67 = arith.constant 0 : index
    %60 = vector.load %arg3[%c7, %c0_66, %c0_67] : memref<9x128x128xbf16, #tpu.memory_space<vmem>>, vector<1x128x128xbf16>
    %61 = vector.shape_cast %60 : vector<1x128x128xbf16> to vector<128x128xbf16>
    %cst_68 = arith.constant dense<0.000000e+00> : vector<64x128xf32>
    %62 = tpu.matmul %59, %61, %cst_68 {dimension_numbers = #tpu.dot_dimension_numbers<[1], [0], [0], [1], [0, 0, 1, 1], [], []>} : vector<64x128xbf16>, vector<128x128xbf16>, vector<64x128xf32> -> vector<64x128xf32>
    %63 = arith.addf %57, %62 : vector<64x128xf32>
    %c2_69 = arith.constant 2 : index
    %c2_70 = arith.constant 2 : index
    %c0_71 = arith.constant 0 : index
    %64 = vector.load %arg8[%c2_69, %c2_70, %c0_71] : memref<10x10x128xbf16, #tpu.memory_space<vmem>>, vector<8x8x128xbf16>
    %65 = vector.shape_cast %64 : vector<8x8x128xbf16> to vector<64x128xbf16>
    %c8 = arith.constant 8 : index
    %c0_72 = arith.constant 0 : index
    %c0_73 = arith.constant 0 : index
    %66 = vector.load %arg3[%c8, %c0_72, %c0_73] : memref<9x128x128xbf16, #tpu.memory_space<vmem>>, vector<1x128x128xbf16>
    %67 = vector.shape_cast %66 : vector<1x128x128xbf16> to vector<128x128xbf16>
    %cst_74 = arith.constant dense<0.000000e+00> : vector<64x128xf32>
    %68 = tpu.matmul %65, %67, %cst_74 {dimension_numbers = #tpu.dot_dimension_numbers<[1], [0], [0], [1], [0, 0, 1, 1], [], []>} : vector<64x128xbf16>, vector<128x128xbf16>, vector<64x128xf32> -> vector<64x128xf32>
    %69 = arith.addf %63, %68 : vector<64x128xf32>
    %cst_75 = arith.constant dense<0.000000e+00> : vector<128xf32>
    %70 = vector.multi_reduction <add>, %69, %cst_75 [0] : vector<64x128xf32> to vector<128xf32>
    %71 = vector.shape_cast %70 : vector<128xf32> to vector<1x128xf32>
    %c0_76 = arith.constant 0 : index
    %c0_77 = arith.constant 0 : index
    %c0_78 = arith.constant 0 : index
    %c0_79 = arith.constant 0 : index
    %72 = vector.load %arg7[%c0_76, %c0_77, %c0_78, %c0_79] : memref<1x1x2x128xf32, #tpu.memory_space<vmem>>, vector<1x1x1x128xf32>
    %73 = vector.shape_cast %72 : vector<1x1x1x128xf32> to vector<1x128xf32>
    %74 = vector.shape_cast %71 : vector<1x128xf32> to vector<1x1x1x128xf32>
    tpu.vector_store %arg7[%c0_76, %c0_77, %c0_78, %c0_79], %74 {strides = array<i32>} : memref<1x1x2x128xf32, #tpu.memory_space<vmem>>, vector<1x1x1x128xf32>,
    %75 = arith.mulf %69, %69 : vector<64x128xf32>
    %cst_80 = arith.constant dense<0.000000e+00> : vector<128xf32>
    %76 = vector.multi_reduction <add>, %75, %cst_80 [0] : vector<64x128xf32> to vector<128xf32>
    %77 = vector.shape_cast %76 : vector<128xf32> to vector<1x128xf32>
    %c0_81 = arith.constant 0 : index
    %c0_82 = arith.constant 0 : index
    %c1_83 = arith.constant 1 : index
    %c0_84 = arith.constant 0 : index
    %78 = vector.load %arg7[%c0_81, %c0_82, %c1_83, %c0_84] : memref<1x1x2x128xf32, #tpu.memory_space<vmem>>, vector<1x1x1x128xf32>
    %79 = vector.shape_cast %78 : vector<1x1x1x128xf32> to vector<1x128xf32>
    %80 = vector.shape_cast %77 : vector<1x128xf32> to vector<1x1x1x128xf32>
    tpu.vector_store %arg7[%c0_81, %c0_82, %c1_83, %c0_84], %80 {strides = array<i32>} : memref<1x1x2x128xf32, #tpu.memory_space<vmem>>, vector<1x1x1x128xf32>,
    %81 = vector.shape_cast %69 : vector<64x128xf32> to vector<8x8x128xf32>
    %82 = arith.truncf %81 : vector<8x8x128xf32> to vector<8x8x128xbf16>
    %c0_85 = arith.constant 0 : index
    %c0_86 = arith.constant 0 : index
    %c0_87 = arith.constant 0 : index
    %c0_88 = arith.constant 0 : index
    %83 = vector.load %arg6[%c0_85, %c0_86, %c0_87, %c0_88] : memref<1x8x8x128xbf16, #tpu.memory_space<vmem>>, vector<1x8x8x128xbf16>
    %84 = vector.shape_cast %83 : vector<1x8x8x128xbf16> to vector<8x8x128xbf16>
    %85 = vector.shape_cast %82 : vector<8x8x128xbf16> to vector<1x8x8x128xbf16>
    tpu.vector_store %arg6[%c0_85, %c0_86, %c0_87, %c0_88], %85 {strides = array<i32>} : memref<1x8x8x128xbf16, #tpu.memory_space<vmem>>, vector<1x8x8x128xbf16>,
    return
  }
  func.func @transform_0(%arg0: i32, %arg1: i32) -> (i32, i32, i32, i32) {
    %c0_i32 = arith.constant 0 : i32
    %c0_i32_0 = arith.constant 0 : i32
    %c0_i32_1 = arith.constant 0 : i32
    %c0_i32_2 = arith.constant 0 : i32
    return %arg0, %c0_i32, %c0_i32_0, %c0_i32_1 : i32, i32, i32, i32
  }
  func.func @transform_1(%arg0: i32, %arg1: i32) -> (i32, i32, i32) {
    %c0_i32 = arith.constant 0 : i32
    %c0_i32_0 = arith.constant 0 : i32
    %c0_i32_1 = arith.constant 0 : i32
    %c0_i32_2 = arith.constant 0 : i32
    return %c0_i32, %c0_i32_0, %c0_i32_1 : i32, i32, i32
  }
  func.func @transform_2(%arg0: i32, %arg1: i32) -> (i32, i32, i32) {
    %c0_i32 = arith.constant 0 : i32
    %c0_i32_0 = arith.constant 0 : i32
    %c0_i32_1 = arith.constant 0 : i32
    %c0_i32_2 = arith.constant 0 : i32
    return %c0_i32, %c0_i32_0, %c0_i32_1 : i32, i32, i32
  }
  func.func @transform_3(%arg0: i32, %arg1: i32) -> (i32, i32, i32) {
    %c0_i32 = arith.constant 0 : i32
    %c0_i32_0 = arith.constant 0 : i32
    %c0_i32_1 = arith.constant 0 : i32
    %c0_i32_2 = arith.constant 0 : i32
    return %c0_i32, %c0_i32_0, %c0_i32_1 : i32, i32, i32
  }
  func.func @transform_4(%arg0: i32, %arg1: i32) -> (i32, i32, i32, i32) {
    %c0_i32 = arith.constant 0 : i32
    %c0_i32_0 = arith.constant 0 : i32
    %c0_i32_1 = arith.constant 0 : i32
    return %arg0, %arg1, %c0_i32, %c0_i32_0 : i32, i32, i32, i32
  }
  func.func @transform_5(%arg0: i32, %arg1: i32) -> (i32, i32, i32, i32) {
    %c0_i32 = arith.constant 0 : i32
    %c0_i32_0 = arith.constant 0 : i32
    %c0_i32_1 = arith.constant 0 : i32
    return %arg0, %arg1, %c0_i32, %c0_i32_0 : i32, i32, i32, i32
  }
}

module attributes {stable_mosaic.version = 11 : i64} {
  func.func @_conv_stage_kernel(%arg0: i32, %arg1: i32, %arg2: memref<1x8x8x128xbf16, #tpu.memory_space<vmem>>, %arg3: memref<9x128x128xbf16, #tpu.memory_space<vmem>>, %arg4: memref<1x1x128xf32, #tpu.memory_space<vmem>>, %arg5: memref<1x1x128xf32, #tpu.memory_space<vmem>>, %arg6: memref<1x8x8x128xbf16, #tpu.memory_space<vmem>>, %arg7: memref<1x1x2x128xf32, #tpu.memory_space<vmem>>, %arg8: memref<10x10x128xbf16, #tpu.memory_space<vmem>>) attributes {dimension_semantics = [#tpu.dimension_semantics<parallel>, #tpu.dimension_semantics<parallel>], iteration_bounds = array<i64: 2, 1>, scalar_prefetch = 0 : i64, scratch_operands = 1 : i64, tpu.core_type = #tpu.core_type<tc>, window_params = [{transform_indices = @transform_0, window_bounds = array<i64: 1, 8, 8, 128>}, {pipeline_mode = #tpu.pipeline_mode<synchronous>, transform_indices = @transform_1, window_bounds = array<i64: 9, 128, 128>}, {pipeline_mode = #tpu.pipeline_mode<synchronous>, transform_indices = @transform_2, window_bounds = array<i64: 1, 1, 128>}, {pipeline_mode = #tpu.pipeline_mode<synchronous>, transform_indices = @transform_3, window_bounds = array<i64: 1, 1, 128>}, {transform_indices = @transform_4, window_bounds = array<i64: 1, 8, 8, 128>}, {transform_indices = @transform_5, window_bounds = array<i64: 1, 1, 2, 128>}]} {
    %c8_i32 = arith.constant 8 : i32
    %0 = arith.muli %arg1, %c8_i32 : i32
    %cst = arith.constant 0.000000e+00 : bf16
    %1 = vector.broadcast %cst : bf16 to vector<1x10x128xbf16>
    %cst_0 = arith.constant 0.000000e+00 : bf16
    %2 = vector.broadcast %cst_0 : bf16 to vector<10x1x128xbf16>
    %c0 = arith.constant 0 : index
    %c0_1 = arith.constant 0 : index
    %c0_2 = arith.constant 0 : index
    %3 = vector.load %arg8[%c0, %c0_1, %c0_2] : memref<10x10x128xbf16, #tpu.memory_space<vmem>>, vector<1x10x128xbf16>
    tpu.vector_store %arg8[%c0, %c0_1, %c0_2], %1 {strides = array<i32>} : memref<10x10x128xbf16, #tpu.memory_space<vmem>>, vector<1x10x128xbf16>,
    %c9 = arith.constant 9 : index
    %c0_3 = arith.constant 0 : index
    %c0_4 = arith.constant 0 : index
    %4 = vector.load %arg8[%c9, %c0_3, %c0_4] : memref<10x10x128xbf16, #tpu.memory_space<vmem>>, vector<1x10x128xbf16>
    tpu.vector_store %arg8[%c9, %c0_3, %c0_4], %1 {strides = array<i32>} : memref<10x10x128xbf16, #tpu.memory_space<vmem>>, vector<1x10x128xbf16>,
    %c0_5 = arith.constant 0 : index
    %c0_6 = arith.constant 0 : index
    %c0_7 = arith.constant 0 : index
    %5 = vector.load %arg8[%c0_5, %c0_6, %c0_7] : memref<10x10x128xbf16, #tpu.memory_space<vmem>>, vector<10x1x128xbf16>
    tpu.vector_store %arg8[%c0_5, %c0_6, %c0_7], %2 {strides = array<i32>} : memref<10x10x128xbf16, #tpu.memory_space<vmem>>, vector<10x1x128xbf16>,
    %c0_8 = arith.constant 0 : index
    %c9_9 = arith.constant 9 : index
    %c0_10 = arith.constant 0 : index
    %6 = vector.load %arg8[%c0_8, %c9_9, %c0_10] : memref<10x10x128xbf16, #tpu.memory_space<vmem>>, vector<10x1x128xbf16>
    tpu.vector_store %arg8[%c0_8, %c9_9, %c0_10], %2 {strides = array<i32>} : memref<10x10x128xbf16, #tpu.memory_space<vmem>>, vector<10x1x128xbf16>,
    %c0_11 = arith.constant 0 : index
    %7 = arith.index_cast %0 : i32 to index
    %c0_12 = arith.constant 0 : index
    %c0_13 = arith.constant 0 : index
    %8 = vector.load %arg2[%c0_11, %7, %c0_12, %c0_13] : memref<1x8x8x128xbf16, #tpu.memory_space<vmem>>, vector<1x8x8x128xbf16>
    %9 = vector.shape_cast %8 : vector<1x8x8x128xbf16> to vector<8x8x128xbf16>
    %10 = arith.extf %9 : vector<8x8x128xbf16> to vector<8x8x128xf32>
    %c0_14 = arith.constant 0 : index
    %c0_15 = arith.constant 0 : index
    %c0_16 = arith.constant 0 : index
    %11 = vector.load %arg4[%c0_14, %c0_15, %c0_16] : memref<1x1x128xf32, #tpu.memory_space<vmem>>, vector<1x1x128xf32>
    %12 = vector.broadcast %11 : vector<1x1x128xf32> to vector<8x8x128xf32>
    %13 = arith.mulf %10, %12 : vector<8x8x128xf32>
    %c0_17 = arith.constant 0 : index
    %c0_18 = arith.constant 0 : index
    %c0_19 = arith.constant 0 : index
    %14 = vector.load %arg5[%c0_17, %c0_18, %c0_19] : memref<1x1x128xf32, #tpu.memory_space<vmem>>, vector<1x1x128xf32>
    %15 = vector.broadcast %14 : vector<1x1x128xf32> to vector<8x8x128xf32>
    %16 = arith.addf %13, %15 : vector<8x8x128xf32>
    %cst_20 = arith.constant 0.000000e+00 : f32
    %17 = vector.broadcast %cst_20 : f32 to vector<8x8x128xf32>
    %18 = arith.maximumf %16, %17 : vector<8x8x128xf32>
    %19 = arith.truncf %18 : vector<8x8x128xf32> to vector<8x8x128xbf16>
    %c1 = arith.constant 1 : index
    %c1_21 = arith.constant 1 : index
    %c0_22 = arith.constant 0 : index
    %20 = vector.load %arg8[%c1, %c1_21, %c0_22] : memref<10x10x128xbf16, #tpu.memory_space<vmem>>, vector<8x8x128xbf16>
    tpu.vector_store %arg8[%c1, %c1_21, %c0_22], %19 {strides = array<i32>} : memref<10x10x128xbf16, #tpu.memory_space<vmem>>, vector<8x8x128xbf16>,
    %c0_i32 = arith.constant 0 : i32
    %21 = arith.cmpi sgt, %arg1, %c0_i32 : i32
    %22 = arith.extui %21 : i1 to i32
    %c0_i32_23 = arith.constant 0 : i32
    %23 = arith.cmpi ne, %22, %c0_i32_23 : i32
    scf.if %23 {
      %c1_i32 = arith.constant 1 : i32
      %96 = arith.subi %0, %c1_i32 : i32
      %c0_96 = arith.constant 0 : index
      %97 = arith.index_cast %96 : i32 to index
      %c0_97 = arith.constant 0 : index
      %c0_98 = arith.constant 0 : index
      %98 = vector.load %arg2[%c0_96, %97, %c0_97, %c0_98] : memref<1x8x8x128xbf16, #tpu.memory_space<vmem>>, vector<1x1x8x128xbf16>
      %99 = vector.shape_cast %98 : vector<1x1x8x128xbf16> to vector<1x8x128xbf16>
      %100 = arith.extf %99 : vector<1x8x128xbf16> to vector<1x8x128xf32>
      %c0_99 = arith.constant 0 : index
      %c0_100 = arith.constant 0 : index
      %c0_101 = arith.constant 0 : index
      %101 = vector.load %arg4[%c0_99, %c0_100, %c0_101] : memref<1x1x128xf32, #tpu.memory_space<vmem>>, vector<1x1x128xf32>
      %102 = vector.broadcast %101 : vector<1x1x128xf32> to vector<1x8x128xf32>
      %103 = arith.mulf %100, %102 : vector<1x8x128xf32>
      %c0_102 = arith.constant 0 : index
      %c0_103 = arith.constant 0 : index
      %c0_104 = arith.constant 0 : index
      %104 = vector.load %arg5[%c0_102, %c0_103, %c0_104] : memref<1x1x128xf32, #tpu.memory_space<vmem>>, vector<1x1x128xf32>
      %105 = vector.broadcast %104 : vector<1x1x128xf32> to vector<1x8x128xf32>
      %106 = arith.addf %103, %105 : vector<1x8x128xf32>
      %cst_105 = arith.constant 0.000000e+00 : f32
      %107 = vector.broadcast %cst_105 : f32 to vector<1x8x128xf32>
      %108 = arith.maximumf %106, %107 : vector<1x8x128xf32>
      %109 = arith.truncf %108 : vector<1x8x128xf32> to vector<1x8x128xbf16>
      %c0_106 = arith.constant 0 : index
      %c1_107 = arith.constant 1 : index
      %c0_108 = arith.constant 0 : index
      %110 = vector.load %arg8[%c0_106, %c1_107, %c0_108] : memref<10x10x128xbf16, #tpu.memory_space<vmem>>, vector<1x8x128xbf16>
      tpu.vector_store %arg8[%c0_106, %c1_107, %c0_108], %109 {strides = array<i32>} : memref<10x10x128xbf16, #tpu.memory_space<vmem>>, vector<1x8x128xbf16>,
    } else {
    }
    %c0_i32_24 = arith.constant 0 : i32
    %24 = arith.cmpi slt, %arg1, %c0_i32_24 : i32
    %25 = arith.extui %24 : i1 to i32
    %c0_i32_25 = arith.constant 0 : i32
    %26 = arith.cmpi ne, %25, %c0_i32_25 : i32
    scf.if %26 {
      %c8_i32_96 = arith.constant 8 : i32
      %96 = arith.addi %0, %c8_i32_96 : i32
      %c0_97 = arith.constant 0 : index
      %97 = arith.index_cast %96 : i32 to index
      %c0_98 = arith.constant 0 : index
      %c0_99 = arith.constant 0 : index
      %98 = vector.load %arg2[%c0_97, %97, %c0_98, %c0_99] : memref<1x8x8x128xbf16, #tpu.memory_space<vmem>>, vector<1x1x8x128xbf16>
      %99 = vector.shape_cast %98 : vector<1x1x8x128xbf16> to vector<1x8x128xbf16>
      %100 = arith.extf %99 : vector<1x8x128xbf16> to vector<1x8x128xf32>
      %c0_100 = arith.constant 0 : index
      %c0_101 = arith.constant 0 : index
      %c0_102 = arith.constant 0 : index
      %101 = vector.load %arg4[%c0_100, %c0_101, %c0_102] : memref<1x1x128xf32, #tpu.memory_space<vmem>>, vector<1x1x128xf32>
      %102 = vector.broadcast %101 : vector<1x1x128xf32> to vector<1x8x128xf32>
      %103 = arith.mulf %100, %102 : vector<1x8x128xf32>
      %c0_103 = arith.constant 0 : index
      %c0_104 = arith.constant 0 : index
      %c0_105 = arith.constant 0 : index
      %104 = vector.load %arg5[%c0_103, %c0_104, %c0_105] : memref<1x1x128xf32, #tpu.memory_space<vmem>>, vector<1x1x128xf32>
      %105 = vector.broadcast %104 : vector<1x1x128xf32> to vector<1x8x128xf32>
      %106 = arith.addf %103, %105 : vector<1x8x128xf32>
      %cst_106 = arith.constant 0.000000e+00 : f32
      %107 = vector.broadcast %cst_106 : f32 to vector<1x8x128xf32>
      %108 = arith.maximumf %106, %107 : vector<1x8x128xf32>
      %109 = arith.truncf %108 : vector<1x8x128xf32> to vector<1x8x128xbf16>
      %c9_107 = arith.constant 9 : index
      %c1_108 = arith.constant 1 : index
      %c0_109 = arith.constant 0 : index
      %110 = vector.load %arg8[%c9_107, %c1_108, %c0_109] : memref<10x10x128xbf16, #tpu.memory_space<vmem>>, vector<1x8x128xbf16>
      tpu.vector_store %arg8[%c9_107, %c1_108, %c0_109], %109 {strides = array<i32>} : memref<10x10x128xbf16, #tpu.memory_space<vmem>>, vector<1x8x128xbf16>,
    } else {
    }
    %c0_26 = arith.constant 0 : index
    %c0_27 = arith.constant 0 : index
    %c0_28 = arith.constant 0 : index
    %27 = vector.load %arg8[%c0_26, %c0_27, %c0_28] : memref<10x10x128xbf16, #tpu.memory_space<vmem>>, vector<8x8x128xbf16>
    %28 = vector.shape_cast %27 : vector<8x8x128xbf16> to vector<64x128xbf16>
    %c0_29 = arith.constant 0 : index
    %c0_30 = arith.constant 0 : index
    %c0_31 = arith.constant 0 : index
    %29 = vector.load %arg3[%c0_29, %c0_30, %c0_31] : memref<9x128x128xbf16, #tpu.memory_space<vmem>>, vector<1x128x128xbf16>
    %30 = vector.shape_cast %29 : vector<1x128x128xbf16> to vector<128x128xbf16>
    %cst_32 = arith.constant dense<0.000000e+00> : vector<64x128xf32>
    %31 = tpu.matmul %28, %30, %cst_32 {dimension_numbers = #tpu.dot_dimension_numbers<[1], [0], [0], [1], [0, 0, 1, 1], [], []>} : vector<64x128xbf16>, vector<128x128xbf16>, vector<64x128xf32> -> vector<64x128xf32>
    %c0_33 = arith.constant 0 : index
    %c1_34 = arith.constant 1 : index
    %c0_35 = arith.constant 0 : index
    %32 = vector.load %arg8[%c0_33, %c1_34, %c0_35] : memref<10x10x128xbf16, #tpu.memory_space<vmem>>, vector<8x8x128xbf16>
    %33 = vector.shape_cast %32 : vector<8x8x128xbf16> to vector<64x128xbf16>
    %c1_36 = arith.constant 1 : index
    %c0_37 = arith.constant 0 : index
    %c0_38 = arith.constant 0 : index
    %34 = vector.load %arg3[%c1_36, %c0_37, %c0_38] : memref<9x128x128xbf16, #tpu.memory_space<vmem>>, vector<1x128x128xbf16>
    %35 = vector.shape_cast %34 : vector<1x128x128xbf16> to vector<128x128xbf16>
    %cst_39 = arith.constant dense<0.000000e+00> : vector<64x128xf32>
    %36 = tpu.matmul %33, %35, %cst_39 {dimension_numbers = #tpu.dot_dimension_numbers<[1], [0], [0], [1], [0, 0, 1, 1], [], []>} : vector<64x128xbf16>, vector<128x128xbf16>, vector<64x128xf32> -> vector<64x128xf32>
    %37 = arith.addf %31, %36 : vector<64x128xf32>
    %c0_40 = arith.constant 0 : index
    %c2 = arith.constant 2 : index
    %c0_41 = arith.constant 0 : index
    %38 = vector.load %arg8[%c0_40, %c2, %c0_41] : memref<10x10x128xbf16, #tpu.memory_space<vmem>>, vector<8x8x128xbf16>
    %39 = vector.shape_cast %38 : vector<8x8x128xbf16> to vector<64x128xbf16>
    %c2_42 = arith.constant 2 : index
    %c0_43 = arith.constant 0 : index
    %c0_44 = arith.constant 0 : index
    %40 = vector.load %arg3[%c2_42, %c0_43, %c0_44] : memref<9x128x128xbf16, #tpu.memory_space<vmem>>, vector<1x128x128xbf16>
    %41 = vector.shape_cast %40 : vector<1x128x128xbf16> to vector<128x128xbf16>
    %cst_45 = arith.constant dense<0.000000e+00> : vector<64x128xf32>
    %42 = tpu.matmul %39, %41, %cst_45 {dimension_numbers = #tpu.dot_dimension_numbers<[1], [0], [0], [1], [0, 0, 1, 1], [], []>} : vector<64x128xbf16>, vector<128x128xbf16>, vector<64x128xf32> -> vector<64x128xf32>
    %43 = arith.addf %37, %42 : vector<64x128xf32>
    %c1_46 = arith.constant 1 : index
    %c0_47 = arith.constant 0 : index
    %c0_48 = arith.constant 0 : index
    %44 = vector.load %arg8[%c1_46, %c0_47, %c0_48] : memref<10x10x128xbf16, #tpu.memory_space<vmem>>, vector<8x8x128xbf16>
    %45 = vector.shape_cast %44 : vector<8x8x128xbf16> to vector<64x128xbf16>
    %c3 = arith.constant 3 : index
    %c0_49 = arith.constant 0 : index
    %c0_50 = arith.constant 0 : index
    %46 = vector.load %arg3[%c3, %c0_49, %c0_50] : memref<9x128x128xbf16, #tpu.memory_space<vmem>>, vector<1x128x128xbf16>
    %47 = vector.shape_cast %46 : vector<1x128x128xbf16> to vector<128x128xbf16>
    %cst_51 = arith.constant dense<0.000000e+00> : vector<64x128xf32>
    %48 = tpu.matmul %45, %47, %cst_51 {dimension_numbers = #tpu.dot_dimension_numbers<[1], [0], [0], [1], [0, 0, 1, 1], [], []>} : vector<64x128xbf16>, vector<128x128xbf16>, vector<64x128xf32> -> vector<64x128xf32>
    %49 = arith.addf %43, %48 : vector<64x128xf32>
    %c1_52 = arith.constant 1 : index
    %c1_53 = arith.constant 1 : index
    %c0_54 = arith.constant 0 : index
    %50 = vector.load %arg8[%c1_52, %c1_53, %c0_54] : memref<10x10x128xbf16, #tpu.memory_space<vmem>>, vector<8x8x128xbf16>
    %51 = vector.shape_cast %50 : vector<8x8x128xbf16> to vector<64x128xbf16>
    %c4 = arith.constant 4 : index
    %c0_55 = arith.constant 0 : index
    %c0_56 = arith.constant 0 : index
    %52 = vector.load %arg3[%c4, %c0_55, %c0_56] : memref<9x128x128xbf16, #tpu.memory_space<vmem>>, vector<1x128x128xbf16>
    %53 = vector.shape_cast %52 : vector<1x128x128xbf16> to vector<128x128xbf16>
    %cst_57 = arith.constant dense<0.000000e+00> : vector<64x128xf32>
    %54 = tpu.matmul %51, %53, %cst_57 {dimension_numbers = #tpu.dot_dimension_numbers<[1], [0], [0], [1], [0, 0, 1, 1], [], []>} : vector<64x128xbf16>, vector<128x128xbf16>, vector<64x128xf32> -> vector<64x128xf32>
    %55 = arith.addf %49, %54 : vector<64x128xf32>
    %c1_58 = arith.constant 1 : index
    %c2_59 = arith.constant 2 : index
    %c0_60 = arith.constant 0 : index
    %56 = vector.load %arg8[%c1_58, %c2_59, %c0_60] : memref<10x10x128xbf16, #tpu.memory_space<vmem>>, vector<8x8x128xbf16>
    %57 = vector.shape_cast %56 : vector<8x8x128xbf16> to vector<64x128xbf16>
    %c5 = arith.constant 5 : index
    %c0_61 = arith.constant 0 : index
    %c0_62 = arith.constant 0 : index
    %58 = vector.load %arg3[%c5, %c0_61, %c0_62] : memref<9x128x128xbf16, #tpu.memory_space<vmem>>, vector<1x128x128xbf16>
    %59 = vector.shape_cast %58 : vector<1x128x128xbf16> to vector<128x128xbf16>
    %cst_63 = arith.constant dense<0.000000e+00> : vector<64x128xf32>
    %60 = tpu.matmul %57, %59, %cst_63 {dimension_numbers = #tpu.dot_dimension_numbers<[1], [0], [0], [1], [0, 0, 1, 1], [], []>} : vector<64x128xbf16>, vector<128x128xbf16>, vector<64x128xf32> -> vector<64x128xf32>
    %61 = arith.addf %55, %60 : vector<64x128xf32>
    %c2_64 = arith.constant 2 : index
    %c0_65 = arith.constant 0 : index
    %c0_66 = arith.constant 0 : index
    %62 = vector.load %arg8[%c2_64, %c0_65, %c0_66] : memref<10x10x128xbf16, #tpu.memory_space<vmem>>, vector<8x8x128xbf16>
    %63 = vector.shape_cast %62 : vector<8x8x128xbf16> to vector<64x128xbf16>
    %c6 = arith.constant 6 : index
    %c0_67 = arith.constant 0 : index
    %c0_68 = arith.constant 0 : index
    %64 = vector.load %arg3[%c6, %c0_67, %c0_68] : memref<9x128x128xbf16, #tpu.memory_space<vmem>>, vector<1x128x128xbf16>
    %65 = vector.shape_cast %64 : vector<1x128x128xbf16> to vector<128x128xbf16>
    %cst_69 = arith.constant dense<0.000000e+00> : vector<64x128xf32>
    %66 = tpu.matmul %63, %65, %cst_69 {dimension_numbers = #tpu.dot_dimension_numbers<[1], [0], [0], [1], [0, 0, 1, 1], [], []>} : vector<64x128xbf16>, vector<128x128xbf16>, vector<64x128xf32> -> vector<64x128xf32>
    %67 = arith.addf %61, %66 : vector<64x128xf32>
    %c2_70 = arith.constant 2 : index
    %c1_71 = arith.constant 1 : index
    %c0_72 = arith.constant 0 : index
    %68 = vector.load %arg8[%c2_70, %c1_71, %c0_72] : memref<10x10x128xbf16, #tpu.memory_space<vmem>>, vector<8x8x128xbf16>
    %69 = vector.shape_cast %68 : vector<8x8x128xbf16> to vector<64x128xbf16>
    %c7 = arith.constant 7 : index
    %c0_73 = arith.constant 0 : index
    %c0_74 = arith.constant 0 : index
    %70 = vector.load %arg3[%c7, %c0_73, %c0_74] : memref<9x128x128xbf16, #tpu.memory_space<vmem>>, vector<1x128x128xbf16>
    %71 = vector.shape_cast %70 : vector<1x128x128xbf16> to vector<128x128xbf16>
    %cst_75 = arith.constant dense<0.000000e+00> : vector<64x128xf32>
    %72 = tpu.matmul %69, %71, %cst_75 {dimension_numbers = #tpu.dot_dimension_numbers<[1], [0], [0], [1], [0, 0, 1, 1], [], []>} : vector<64x128xbf16>, vector<128x128xbf16>, vector<64x128xf32> -> vector<64x128xf32>
    %73 = arith.addf %67, %72 : vector<64x128xf32>
    %c2_76 = arith.constant 2 : index
    %c2_77 = arith.constant 2 : index
    %c0_78 = arith.constant 0 : index
    %74 = vector.load %arg8[%c2_76, %c2_77, %c0_78] : memref<10x10x128xbf16, #tpu.memory_space<vmem>>, vector<8x8x128xbf16>
    %75 = vector.shape_cast %74 : vector<8x8x128xbf16> to vector<64x128xbf16>
    %c8 = arith.constant 8 : index
    %c0_79 = arith.constant 0 : index
    %c0_80 = arith.constant 0 : index
    %76 = vector.load %arg3[%c8, %c0_79, %c0_80] : memref<9x128x128xbf16, #tpu.memory_space<vmem>>, vector<1x128x128xbf16>
    %77 = vector.shape_cast %76 : vector<1x128x128xbf16> to vector<128x128xbf16>
    %cst_81 = arith.constant dense<0.000000e+00> : vector<64x128xf32>
    %78 = tpu.matmul %75, %77, %cst_81 {dimension_numbers = #tpu.dot_dimension_numbers<[1], [0], [0], [1], [0, 0, 1, 1], [], []>} : vector<64x128xbf16>, vector<128x128xbf16>, vector<64x128xf32> -> vector<64x128xf32>
    %79 = arith.addf %73, %78 : vector<64x128xf32>
    %cst_82 = arith.constant dense<0.000000e+00> : vector<128xf32>
    %80 = vector.multi_reduction <add>, %79, %cst_82 [0] : vector<64x128xf32> to vector<128xf32>
    %81 = vector.shape_cast %80 : vector<128xf32> to vector<1x128xf32>
    %c0_83 = arith.constant 0 : index
    %c0_84 = arith.constant 0 : index
    %c0_85 = arith.constant 0 : index
    %c0_86 = arith.constant 0 : index
    %82 = vector.load %arg7[%c0_83, %c0_84, %c0_85, %c0_86] : memref<1x1x2x128xf32, #tpu.memory_space<vmem>>, vector<1x1x1x128xf32>
    %83 = vector.shape_cast %82 : vector<1x1x1x128xf32> to vector<1x128xf32>
    %84 = vector.shape_cast %81 : vector<1x128xf32> to vector<1x1x1x128xf32>
    tpu.vector_store %arg7[%c0_83, %c0_84, %c0_85, %c0_86], %84 {strides = array<i32>} : memref<1x1x2x128xf32, #tpu.memory_space<vmem>>, vector<1x1x1x128xf32>,
    %85 = arith.mulf %79, %79 : vector<64x128xf32>
    %cst_87 = arith.constant dense<0.000000e+00> : vector<128xf32>
    %86 = vector.multi_reduction <add>, %85, %cst_87 [0] : vector<64x128xf32> to vector<128xf32>
    %87 = vector.shape_cast %86 : vector<128xf32> to vector<1x128xf32>
    %c0_88 = arith.constant 0 : index
    %c0_89 = arith.constant 0 : index
    %c1_90 = arith.constant 1 : index
    %c0_91 = arith.constant 0 : index
    %88 = vector.load %arg7[%c0_88, %c0_89, %c1_90, %c0_91] : memref<1x1x2x128xf32, #tpu.memory_space<vmem>>, vector<1x1x1x128xf32>
    %89 = vector.shape_cast %88 : vector<1x1x1x128xf32> to vector<1x128xf32>
    %90 = vector.shape_cast %87 : vector<1x128xf32> to vector<1x1x1x128xf32>
    tpu.vector_store %arg7[%c0_88, %c0_89, %c1_90, %c0_91], %90 {strides = array<i32>} : memref<1x1x2x128xf32, #tpu.memory_space<vmem>>, vector<1x1x1x128xf32>,
    %91 = vector.shape_cast %79 : vector<64x128xf32> to vector<8x8x128xf32>
    %92 = arith.truncf %91 : vector<8x8x128xf32> to vector<8x8x128xbf16>
    %c0_92 = arith.constant 0 : index
    %c0_93 = arith.constant 0 : index
    %c0_94 = arith.constant 0 : index
    %c0_95 = arith.constant 0 : index
    %93 = vector.load %arg6[%c0_92, %c0_93, %c0_94, %c0_95] : memref<1x8x8x128xbf16, #tpu.memory_space<vmem>>, vector<1x8x8x128xbf16>
    %94 = vector.shape_cast %93 : vector<1x8x8x128xbf16> to vector<8x8x128xbf16>
    %95 = vector.shape_cast %92 : vector<8x8x128xbf16> to vector<1x8x8x128xbf16>
    tpu.vector_store %arg6[%c0_92, %c0_93, %c0_94, %c0_95], %95 {strides = array<i32>} : memref<1x8x8x128xbf16, #tpu.memory_space<vmem>>, vector<1x8x8x128xbf16>,
    return
  }
  func.func @transform_0(%arg0: i32, %arg1: i32) -> (i32, i32, i32, i32) {
    %c0_i32 = arith.constant 0 : i32
    %c0_i32_0 = arith.constant 0 : i32
    %c0_i32_1 = arith.constant 0 : i32
    %c0_i32_2 = arith.constant 0 : i32
    return %arg0, %c0_i32, %c0_i32_0, %c0_i32_1 : i32, i32, i32, i32
  }
  func.func @transform_1(%arg0: i32, %arg1: i32) -> (i32, i32, i32) {
    %c0_i32 = arith.constant 0 : i32
    %c0_i32_0 = arith.constant 0 : i32
    %c0_i32_1 = arith.constant 0 : i32
    %c0_i32_2 = arith.constant 0 : i32
    return %c0_i32, %c0_i32_0, %c0_i32_1 : i32, i32, i32
  }
  func.func @transform_2(%arg0: i32, %arg1: i32) -> (i32, i32, i32) {
    %c0_i32 = arith.constant 0 : i32
    %c0_i32_0 = arith.constant 0 : i32
    %c0_i32_1 = arith.constant 0 : i32
    %c0_i32_2 = arith.constant 0 : i32
    return %c0_i32, %c0_i32_0, %c0_i32_1 : i32, i32, i32
  }
  func.func @transform_3(%arg0: i32, %arg1: i32) -> (i32, i32, i32) {
    %c0_i32 = arith.constant 0 : i32
    %c0_i32_0 = arith.constant 0 : i32
    %c0_i32_1 = arith.constant 0 : i32
    %c0_i32_2 = arith.constant 0 : i32
    return %c0_i32, %c0_i32_0, %c0_i32_1 : i32, i32, i32
  }
  func.func @transform_4(%arg0: i32, %arg1: i32) -> (i32, i32, i32, i32) {
    %c0_i32 = arith.constant 0 : i32
    %c0_i32_0 = arith.constant 0 : i32
    %c0_i32_1 = arith.constant 0 : i32
    return %arg0, %arg1, %c0_i32, %c0_i32_0 : i32, i32, i32, i32
  }
  func.func @transform_5(%arg0: i32, %arg1: i32) -> (i32, i32, i32, i32) {
    %c0_i32 = arith.constant 0 : i32
    %c0_i32_0 = arith.constant 0 : i32
    %c0_i32_1 = arith.constant 0 : i32
    return %arg0, %arg1, %c0_i32, %c0_i32_0 : i32, i32, i32, i32
  }
}

</mosaic_0001>

<bundles_post_ra>
// kernel: down_forward.3
= control target key start
LH: loop header
LB: loop body
LE: loop exit
PB: predicated region body
PF: predicated region fallthrough
CT: control target
= control target key end

     0   :  { %11 = vsyncpa [#allocation4], 0  ;;  %s4776_s0 = inlined_call_operand.hbm [shape: bf16[2,8,8,128], index: 0, kind: input, shape index: {}]   ;;  %s4777_s1 = inlined_call_operand.hbm [shape: bf16[9,128,128], index: 1, kind: input, shape index: {}]   ;;  %s4778_s2 = inlined_call_operand.hbm [shape: f32[1,1,128], index: 2, kind: input, shape index: {}]   ;;  %s4779_s3 = inlined_call_operand.hbm [shape: f32[1,1,128], index: 3, kind: input, shape index: {}]   ;;  %s4780_s4 = inlined_call_operand.hbm [shape: bf16[2,8,8,128], index: 4, kind: output, shape index: {0}]   ;;  %s4781_s5 = inlined_call_operand.hbm [shape: f32[2,1,2,128], index: 5, kind: output, shape index: {1}]  }
   0x1   :  { %13 = vsyncpa [#allocation4 + $0x1], 0 }
   0x2   :  { %14 = vsyncpa [#allocation7], 0 }
   0x3   :  { %15 = vsyncpa [#allocation10], 0 }
   0x4   :  { %16 = vsyncpa [#allocation5], 0 }
   0x5   :  { %18 = vsyncpa [#allocation5 + $0x1], 0 }
   0x6   :  { %19 = vsyncpa [#allocation13], 0 }
   0x7   :  { %21 = vsyncpa [#allocation13 + $0x1], 0  ;;  %s4001_s18 = smov 0   ;;  %s4003_s19 = smov 0  }
   0x8   :  { %s4005_s20 = smov 0   ;;  %s4007_s21 = smov 0  }
   0x9   :  { %s4009_s22 = smov 0   ;;  %s4011_s23 = smov 0  }
   0xa LB: > { %4788 = sst [smem:[#allocation19_spill]] %s3938_s18  ;;  %s2903_s24 = sadd.s32 4294967295, %s3958_s23   ;;  %s3958_s23 = sphi %s4011_s23, %s27_s23   ;;  %s3954_s22 = sphi %s4009_s22, %s4821_s22   ;;  %s3950_s21 = sphi %s4007_s21, %s4820_s21   ;;  %s3946_s20 = sphi %s4005_s20, %s4819_s20   ;;  %s3942_s19 = sphi %s4003_s19, %s4818_s19   ;;  %s3938_s18 = sphi %s4001_s18, %s4817_s18  }
   0xb   : > { %s2904_s25 = sadd.s32 4294967294, %s3958_s23   ;;  %p59_p0 = scmp.ne.s32.totalorder %s3942_s19, %s3938_s18 }
   0xc   : > { %p4035_p1 = scmp.eq.s32.totalorder %s2903_s24, 0  ;;  %p4039_p2 = scmp.eq.s32.totalorder %s2903_s24, 1 }
   0xd   : > { %p154_p3 = scmp.eq.s32.totalorder %s2904_s25, 1  ;;  %p2905_p5 = scmp.ge.s32.totalorder %s3958_s23, 1 }
   0xe   : > { %s4789_s26 = scalar_select %p4035_p1, 1, 0 }
   0xf   : > { %s4790_s27 = scalar_select %p4039_p2, 1, 0 }
  0x10   : > { %p4045_p4 = por %p4035_p1, %p59_p0  ;;  %p4050_p6 = por %p154_p3, %p59_p0 }
  0x11   : > { %p189_p7 = scmp.lt.s32.totalorder %s3958_s23, 3  ;;  %s3960_s6 = smov [#allocation6]  }
  0x12   : > { %s4791_s28 = scalar_select %p4045_p4, 1, 0 }
  0x13   : > { %s4792_s29 = scalar_select %p4050_p6, 1, 0 }
  0x14   : > { %p4055_p8 = pnand %p2905_p5, %p189_p7  ;;  %s201_s7 = sshll.u32 %s3960_s6, 4  ;;  %s4059_s7 = int_to_ptr.vmem [resolvable:$true] %s201_s7 }
  0x15   : > { %4793 = sst [smem:[#allocation20_spill]] %s4792_s29  ;;  %s3961_s9 = smov [#allocation8]  }
  0x16   : > { %s4794_s30 = scalar_select %p4055_p8, 1, 0 }
  0x17   : > { %p3553_p9 = pneg %p4055_p8  ;;  %s215_s10 = sshll.u32 %s3961_s9, 4  ;;  %s4070_s10 = int_to_ptr.vmem [resolvable:$true] %s215_s10 }
  0x18   : > { %s3962_s11 = smov [#allocation9]   ;;  %s3722_s15 = scalar_lea.hbm %s4777_s1, 9216 }
  0x19   : > { %p4066_p11 = pnand %p3553_p9, %p4035_p1  ;;  %s4072_s12 = sshll.u32 %s3962_s11, 4  ;;  %s227_s12 = int_to_ptr.vmem [resolvable:$true] %s4072_s12 }
  0x1a   : > { %p3723_p12 = scmp.ne.s32.totalorder %s4777_s1, %s3722_s15  ;;  %p3729_p5 = scmp.lt.u32.totalorder %s3722_s15, %s4777_s1 }
  0x1b   : > { %p4082_p13 = pneg %p4066_p11 }
  0x1d   : > { %p3725_p0 = pnand %p4082_p13, %p3723_p12 }
  0x1f   : > { %p3726_p3 = pneg %p3725_p0 }
  0x21   : > { %p3731_p7 = pnand %p3729_p5, %p3726_p3 }
  0x23   : > { %3734 = shalt.err (!%p3731_p7)
}
  0x24   : > { %s3735_s9 = scalar_lea.vmem %s4059_s7, 9216  ;;  %p3743_p1 = scmp.lt.s32.totalorder %s4059_s7, %s4059_s7 }
  0x25   : > { %p3736_p9 = scmp.ne.s32.totalorder %s4059_s7, %s3735_s9  ;;  %p3744_p4 = scmp.lt.s32.totalorder %s3735_s9, %s3735_s9 }
  0x27   : > { %p3738_p10 = pnand %p3736_p9, %p4082_p13  ;;  %p3745_p12 = por %p3744_p4, %p3743_p1 }
  0x29   : > { %p3739_p6 = pneg %p3738_p10 }
  0x2b   : > { %p3746_p0 = pnand %p3745_p12, %p3739_p6 }
  0x2d   : > { %3749 = shalt.err (!%p3746_p0)
}
  0x2e   : > { %s3963_s11 = smov 64   ;;  %s3964_s13 = smov 4  }
  0x2f   : > { %3556 = dma.hbm_to_vmem [thread:$0]  (!%p4066_p11), %s4777_s1, 9216, %s4059_s7, [#allocation7], %s3963_s11, %s3963_s11, %s3964_s13  }
  0x30   : > { %s3750_s25 = scalar_lea.hbm %s4778_s2, 16 }
  0x31   : > { %p3751_p1 = scmp.ne.s32.totalorder %s4778_s2, %s3750_s25  ;;  %p3757_p10 = scmp.lt.u32.totalorder %s3750_s25, %s4778_s2 }
  0x33   : > { %p3753_p4 = pnand %p3751_p1, %p4082_p13 }
  0x35   : > { %p3754_p6 = pneg %p3753_p4 }
  0x37   : > { %p3759_p3 = pnand %p3757_p10, %p3754_p6 }
  0x39   : > { %3762 = shalt.err (!%p3759_p3)
}
  0x3a   : > { %s3763_s7 = scalar_lea.vmem %s4070_s10, 16  ;;  %s3770_s14 = scalar_lea.vmem %s4070_s10, 32 }
  0x3b   : > { %p3764_p5 = scmp.ne.s32.totalorder %s4070_s10, %s3763_s7  ;;  %p3771_p12 = scmp.lt.s32.totalorder %s4070_s10, %s4070_s10 }
  0x3c   : > { %p3772_p0 = scmp.lt.s32.totalorder %s3770_s14, %s3763_s7 }
  0x3d   : > { %p3766_p7 = pnand %p3764_p5, %p4082_p13 }
  0x3e   : > { %p3773_p1 = por %p3772_p0, %p3771_p12 }
  0x3f   : > { %p3767_p9 = pneg %p3766_p7 }
  0x41   : > { %p3774_p4 = pnand %p3773_p1, %p3767_p9 }
  0x43   : > { %3777 = shalt.err (!%p3774_p4)
}
  0x44   : > { %3559 = dma.hbm_to_vmem [thread:$0]  (!%p4066_p11), %s4778_s2, 16, %s4070_s10, [#allocation7]  }
  0x45   : > { %s3778_s17 = scalar_lea.hbm %s4779_s3, 16 }
  0x46   : > { %p3779_p6 = scmp.ne.s32.totalorder %s4779_s3, %s3778_s17  ;;  %p3785_p5 = scmp.lt.u32.totalorder %s3778_s17, %s4779_s3 }
  0x48   : > { %p3781_p10 = pnand %p3779_p6, %p4082_p13 }
  0x4a   : > { %p3782_p3 = pneg %p3781_p10 }
  0x4c   : > { %p3787_p7 = pnand %p3785_p5, %p3782_p3 }
  0x4e   : > { %3790 = shalt.err (!%p3787_p7)
}
  0x4f   : > { %s3791_s14 = scalar_lea.vmem %s227_s12, 16  ;;  %s3798_s10 = scalar_lea.vmem %s227_s12, 32 }
  0x50   : > { %p3792_p9 = scmp.ne.s32.totalorder %s227_s12, %s3791_s14  ;;  %p3799_p1 = scmp.lt.s32.totalorder %s227_s12, %s227_s12 }
  0x51   : > { %p3800_p4 = scmp.lt.s32.totalorder %s3798_s10, %s3791_s14 }
  0x52   : > { %p3794_p12 = pnand %p3792_p9, %p4082_p13 }
  0x53   : > { %p3801_p8 = por %p3800_p4, %p3799_p1 }
  0x54   : > { %p3795_p0 = pneg %p3794_p12 }
  0x56   : > { %p3802_p2 = pnand %p3801_p8, %p3795_p0 }
  0x58   : > { %3805 = shalt.err (!%p3802_p2)
}
  0x59   : > { %3562 = dma.hbm_to_vmem [thread:$0]  (!%p4066_p11), %s4779_s3, 16, %s227_s12, [#allocation10]  }
  0x5a   : > { %s46_s24 = sadd.s32 1, %s3946_s20  ;;  %s39_s15 = sadd.s32 1, %s3954_s22 }
  0x5b   : > { %p53_p2 = scmp.ne.s32.totalorder %s3946_s20, %s3942_s19  ;;  %p41_p8 = scmp.ge.s32.totalorder %s39_s15, 2 }
  0x5c   : > { %p54_p13 = scmp.eq.s32.totalorder %s3958_s23, 0  ;;  %p4797_p6 = scmp.ne.s32.totalorder %s4790_s27, 0 }
  0x5d   : > { %p3577_p3 = scmp.lt.s32.totalorder %s3958_s23, 2  ;;  %s4823_s15 = smov (%p41_p8, %s39_s15), 0 }
  0x5e   : > { %p4156_p10 = por %p4797_p6, %p53_p2  ;;  %p55_p5 = por %p54_p13, %p53_p2 }
  0x5f   : > { %s237_s16 = sand.u32 1, %s3946_s20   ;;  %s43_s17 = ssub.s32 %s3954_s22, %s4823_s15 }
  0x60   : > { %p44_p7 = scmp.eq.s32.totalorder %s43_s17, 0  ;;  %s2910_s12 = sshll.u32 %s237_s16, 5 }
  0x61   : > { %s3077_s25 = sshll.u32 %s3954_s22, 9  ;;  %s241_s14 = scalar_lea.vmem [#allocation3], %s2910_s12 }
  0x62   : > { %s4168_s6 = scalar_select %p44_p7, %s3946_s20, %s46_s24  }
  0x63   : > { %s4173_s27 = scalar_lea.hbm %s4776_s0, %s3077_s25  ;;  %s248_s10 = sshll.u32 %s241_s14, 4  ;;  %s4175_s10 = int_to_ptr.vmem [resolvable:$true] %s248_s10 }
  0x64   : > { %p4179_p11 = pnand %p3577_p3, %p55_p5  ;;  %s4183_s29 = scalar_lea.sflag [#allocation4], %s237_s16 }
  0x65   : > { %s3806_s24 = scalar_lea.hbm %s4173_s27, 512  ;;  %s3811_s25 = scalar_lea.hbm %s4776_s0, 1024 }
  0x66   : > { %p3807_p9 = scmp.ne.s32.totalorder %s4173_s27, %s3806_s24  ;;  %p3808_p12 = pneg %p4179_p11 }
  0x67   : > { %p3812_p4 = scmp.lt.u32.totalorder %s4173_s27, %s4776_s0  ;;  %p3813_p2 = scmp.lt.u32.totalorder %s3811_s25, %s3806_s24 }
  0x68   : > { %p3809_p0 = pnand %p3808_p12, %p3807_p9  ;;  %p3815_p13 = scmp.lt.u32.totalorder %s3806_s24, %s4173_s27 }
  0x69   : > { %p3814_p8 = por %p3813_p2, %p3812_p4 }
  0x6a   : > { %p3810_p1 = pneg %p3809_p0 }
  0x6b   : > { %p3816_p6 = por %p3815_p13, %p3814_p8 }
  0x6d   : > { %p3817_p3 = pnand %p3816_p6, %p3810_p1 }
  0x6f   : > { %3820 = shalt.err (!%p3817_p3)
}
  0x70   : > { %s3821_s16 = scalar_lea.vmem %s4175_s10, 512  ;;  %s3965_s14 = smov [#allocation3]  }
  0x71   : > { %p3822_p5 = scmp.ne.s32.totalorder %s4175_s10, %s3821_s16  ;;  %s3826_s17 = sshll.u32 %s3965_s14, 4  ;;  %s3827_s17 = int_to_ptr.vmem [resolvable:$false] %s3826_s17 }
  0x72   : > { %s3828_s12 = scalar_lea.vmem %s3827_s17, 1024  ;;  %p3829_p0 = scmp.lt.s32.totalorder %s4175_s10, %s3827_s17 }
  0x73   : > { %p3824_p7 = pnand %p3822_p5, %p3808_p12  ;;  %p3830_p4 = scmp.lt.s32.totalorder %s3828_s12, %s3821_s16 }
  0x75   : > { %p3825_p9 = pneg %p3824_p7  ;;  %p3831_p2 = por %p3830_p4, %p3829_p0 }
  0x77   : > { %p3832_p8 = pnand %p3831_p2, %p3825_p9 }
  0x79   : > { %3835 = shalt.err (!%p3832_p8)
}
  0x7a   : > { %3566 = dma.hbm_to_vmem [thread:$0]  (!%p4179_p11), %s4173_s27, 512, %s4175_s10, %s4183_s29, %s3963_s11, %s3963_s11, %s3964_s13  }
  0x7b   : > { %p4800_p12 = scmp.ne.s32.totalorder %s4794_s30, 0 }
  0x7c   : > { %s4217_s24 = sand.u32 (!%p4800_p12), 1, %s3942_s19   ;;  %p4801_p1 = scmp.ne.s32.totalorder (!%p4800_p12), %s4791_s28, 0 }
  0x7d   : > { %260 = sbr.rel (%p4800_p12) target bundleno = 612 (0x264), region = 36  ;;  %s2914_s25 = sshll.u32 (!%p4800_p12), %s4217_s24, 5 }
  0x7e   : > { %s263_s9 = scalar_lea.sflag (!%p4800_p12), [#allocation4], %s4217_s24  ;;  %s4223_s18 = scalar_lea.vmem (!%p4800_p12), [#allocation3], %s2914_s25 }
  0x84   : > { %3917 = dma.done.wait (%p4801_p1), %s263_s9, 512  }
  0x85   : > { %3919 = vsyncadd (%p4801_p1), %s263_s9, 4294966784  ;;  %p4802_p11 = scmp.ne.s32.totalorder %s4789_s26, 0 }
  0x87   : > { %3921 = dma.done.wait (%p4802_p11), [#allocation7], 9232  }
  0x88   : > { %3923 = vsyncadd (%p4802_p11), [#allocation7], 4294958064 }
  0x89   : > { %3925 = dma.done.wait (%p4802_p11), [#allocation10], 16  }
  0x8a   : > { %3927 = vsyncadd (%p4802_p11), [#allocation10], 4294967280  ;;  %v3966_v0 = vmov 0   ;;  %v3638_v1 = vld [vmem:[#allocation6 + $0x40] sm:$0xff]   ;;  %v3640_v3 = vld [vmem:[#allocation6 + $0x48] sm:$0xff]   ;;  %vm318_vm0 = vcmask 1040384  }
  0x8b   : > { %313 = vst [vmem:[#allocation2] sm:$0xf] %v3966_v0  ;;  %314 = vst [vmem:[#allocation2 + $0x4] sm:$0x1] %v3966_v0  ;;  %v3639_v2 = vld [vmem:[#allocation6 + $0x100] sm:$0xff]   ;;  %3239 = vmatprep.subr.bf16.mxu1 %v3638_v1  ;;  %v3641_v4 = vld [vmem:[#allocation6 + $0x108] sm:$0xff]  }
  0x8c   : > { %316 = vst [vmem:[#allocation2 + $0x48] sm:$0xf] %v3966_v0  ;;  %317 = vst [vmem:[#allocation2 + $0x4c] sm:$0x1] %v3966_v0  ;;  %3335 = vmatprep.subr.bf16.mxu0 %v3639_v2  ;;  %3240 = vmatpush3.bf16.msra.mxu1 %v3638_v1  ;;  %v3642_v5 = vld [vmem:[#allocation6 + $0x50] sm:$0xff]   ;;  %v3644_v7 = vld [vmem:[#allocation6 + $0x58] sm:$0xff]  }
  0x8d   : > { %3336 = vmatpush3.bf16.msra.mxu0 %v3639_v2  ;;  %3241 = vmatprep.subr.bf16.mxu1 %v3640_v3  ;;  %v3643_v6 = vld [vmem:[#allocation6 + $0x110] sm:$0xff]   ;;  %vm319_vm1 = vsmask.f32 256  ;;  %vm351_vm2 = vsmask.f32 7938  ;;  %v3645_v8 = vld [vmem:[#allocation6 + $0x118] sm:$0xff]  }
  0x8e   : > { %3337 = vmatprep.subr.bf16.mxu0 %v3641_v4  ;;  %vm4237_vm3 = vmand %vm318_vm0, %vm319_vm1  ;;  %v3646_v11 = vld [vmem:[#allocation6 + $0x60] sm:$0xff]   ;;  %v3648_v13 = vld [vmem:[#allocation6 + $0x68] sm:$0xff]   ;;  %vm552_vm5 = vcmask 1043456   ;;  %vm726_vm6 = vsmask.f32 3328  ;;  %vm1148_vm10 = vcmask 1042432  }
  0x8f   : > { %vm4242_vm4 = vmand %vm318_vm0, %vm351_vm2  ;;  %v3647_v12 = vld [vmem:[#allocation6 + $0x120] sm:$0xff]   ;;  %v3649_v14 = vld [vmem:[#allocation6 + $0x128] sm:$0xff]   ;;  %vm727_vm7 = vsmask.f32 7440  ;;  %vm1149_vm11 = vcmask 1046532   ;;  %s302_s26 = scalar_lea.vmem [#allocation11], %s2914_s25 }
  0x90   : > { %3242 = vmatpush3.bf16.msra.mxu1 %v3640_v3  ;;  %v324_v16 = vld [vmem:[#allocation2 + $0x8] sm:$0x1]  ;;  %v356_v21 = vld [vmem:[#allocation2 + $0xc] sm:$0x1]  ;;  %v3090_v22 = vld [vmem:[%s4223_s18] sm:$0xff]   ;;  %s2735_s28 = sshll.u32 %s302_s26, 4  ;;  %s4679_s28 = int_to_ptr.vmem [resolvable:$true] %s2735_s28 }
  0x91   : > { %3338 = vmatpush3.bf16.msra.mxu0 %v3641_v4  ;;  %3243 = vmatprep.subr.bf16.mxu1 %v3642_v5  ;;  %v325_v19 = vsel %vm4237_vm3, 0, %v324_v16  ;;  %v3650_v23 = vld [vmem:[#allocation6 + $0x70] sm:$0xff]   ;;  %v357_v24 = vsel %vm4242_vm4, 0, %v356_v21  ;;  %v3091_v25 = vunpack.c.l.bf16 %v3090_v22  ;;  %v4255_v26 = vld [vmem:[#allocation8] ss:$0 sm:$0xff]  ;;  %v3092_v28 = vunpack.c.h.bf16 %v3090_v22  ;;  %v3125_v37 = vld [vmem:[%s4223_s18 + $0x8] sm:$0xff]  }
  0x92   : > { %3339 = vmatprep.subr.bf16.mxu0 %v3643_v6  ;;  %v321_v15 = vld [vmem:[#allocation2] sm:$0x1]  ;;  %v353_v17 = vld [vmem:[#allocation2 + $0x4] sm:$0x1]  ;;  %326 = vst [vmem:[#allocation2 + $0x8] sm:$0x1] %v325_v19  ;;  %v3095_v42 = vunpack.c.l.bf16 %v3125_v37  ;;  %v3096_v47 = vunpack.c.h.bf16 %v3125_v37  ;;  %vm4289_vm8 = vmand %vm552_vm5, %vm351_vm2 }
  0x93   : > { %v322_v18 = vsel %vm4237_vm3, 0, %v321_v15  ;;  %v354_v20 = vsel %vm4242_vm4, 0, %v353_v17  ;;  %v4257_v27 = vld [vmem:[#allocation9] ss:$0 sm:$0xff]  ;;  %358 = vst [vmem:[#allocation2 + $0xc] sm:$0x1] %v357_v24  ;;  %v408_v31 = vmul.f32 %v3091_v25, %v4255_v26  ;;  %v409_v34 = vmul.f32 %v3092_v28, %v4255_v26  ;;  %vm4316_vm9 = vmor %vm726_vm6, %vm727_vm7 }
  0x94   : > { %3244 = vmatpush3.bf16.msra.mxu1 %v3642_v5  ;;  %323 = vst [vmem:[#allocation2] sm:$0x1] %v322_v18  ;;  %355 = vst [vmem:[#allocation2 + $0x4] sm:$0x1] %v354_v20  ;;  %v327_v29 = vld [vmem:[#allocation2 + $0x10] sm:$0x1]  ;;  %v410_v51 = vmul.f32 %v3095_v42, %v4255_v26  ;;  %v411_v55 = vmul.f32 %v3096_v47, %v4255_v26 }
  0x95   : > { %3340 = vmatpush3.bf16.msra.mxu0 %v3643_v6  ;;  %3245 = vmatprep.subr.bf16.mxu1 %v3644_v7  ;;  %v3651_v30 = vld [vmem:[#allocation6 + $0x130] sm:$0xff]   ;;  %v328_v32 = vsel %vm4237_vm3, 0, %v327_v29  ;;  %v359_v33 = vld [vmem:[#allocation2 + $0x14] sm:$0x1]  ;;  %v330_v36 = vld [vmem:[#allocation2 + $0x18] sm:$0x1]  ;;  %v423_v38 = vadd.f32 %v4257_v27, %v408_v31  ;;  %v424_v39 = vadd.f32 %v4257_v27, %v409_v34 }
  0x96   : > { %3341 = vmatprep.subr.bf16.mxu0 %v3645_v8  ;;  %329 = vst [vmem:[#allocation2 + $0x10] sm:$0x1] %v328_v32  ;;  %v360_v35 = vsel %vm4242_vm4, 0, %v359_v33  ;;  %v331_v40 = vsel %vm4237_vm3, 0, %v330_v36  ;;  %v362_v41 = vld [vmem:[#allocation2 + $0x1c] sm:$0x1]  ;;  %v425_v59 = vadd.f32 %v4257_v27, %v410_v51  ;;  %v426_v60 = vadd.f32 %v4257_v27, %v411_v55  ;;  %vm4501_vm12 = vmor %vm1148_vm10, %vm1149_vm11 }
  0x97   : > { %361 = vst [vmem:[#allocation2 + $0x14] sm:$0x1] %v360_v35  ;;  %v333_v43 = vld [vmem:[#allocation2 + $0x20] sm:$0x1]  ;;  %332 = vst [vmem:[#allocation2 + $0x18] sm:$0x1] %v331_v40 }
  0x98   : > { %3246 = vmatpush3.bf16.msra.mxu1 %v3644_v7  ;;  %v363_v44 = vsel %vm4242_vm4, 0, %v362_v41  ;;  %v334_v45 = vsel %vm4237_vm3, 0, %v333_v43  ;;  %v365_v46 = vld [vmem:[#allocation2 + $0x24] sm:$0x1]  ;;  %v3652_v48 = vld [vmem:[#allocation6 + $0x78] sm:$0xff]   ;;  %v431_v49 = vmax.f32 %v423_v38, 0.0 }
  0x99   : > { %3342 = vmatpush3.bf16.msra.mxu0 %v3645_v8  ;;  %3247 = vmatprep.subr.bf16.mxu1 %v3646_v11  ;;  %v432_v50 = vmax.f32 %v424_v39, 0.0  ;;  %364 = vst [vmem:[#allocation2 + $0x1c] sm:$0x1] %v363_v44  ;;  %335 = vst [vmem:[#allocation2 + $0x20] sm:$0x1] %v334_v45  ;;  %v366_v52 = vsel %vm4242_vm4, 0, %v365_v46 }
  0x9a   : > { %3343 = vmatprep.subr.bf16.mxu0 %v3647_v12  ;;  %v3653_v53 = vld [vmem:[#allocation6 + $0x138] sm:$0xff]   ;;  %367 = vst [vmem:[#allocation2 + $0x24] sm:$0x1] %v366_v52  ;;  %v3078_v56 = vpack.c.bf16 %v431_v49, %v431_v49  ;;  %v4284_v0 = vld [vmem:[#allocation6] sm:$0xff]   ;;  %v433_v4 = vmax.f32 %v425_v59, 0.0  ;;  %v434_v7 = vmax.f32 %v426_v60, 0.0 }
  0x9b   : > { %v4277_v54 = vld [vmem:[#allocation2] sm:$0xf]  ;;  %v3079_v58 = vpack.c.bf16 %v432_v50, %v432_v50  ;;  %v4286_v3 = vld [vmem:[#allocation6 + $0x140] sm:$0xff]   ;;  %v554_v6 = vld [vmem:[#allocation2 + $0x8] sm:$0xf]  ;;  %s3088_s30 = sshll.u32 %s3950_s21, 9 }
  0x9c   : > { %3248 = vmatpush3.bf16.msra.mxu1 %v3646_v11  ;;  %v730_v57 = vshrl.u32 %v4277_v54, 16  ;;  %v472_v61 = vshrl.u32 %v3078_v56, 16  ;;  %v475_v62 = vshll.u32 %v3078_v56, 16  ;;  %v733_v63 = vshll.u32 %v4277_v54, 16  ;;  %v557_v11 = vld [vmem:[#allocation2 + $0xc] sm:$0x1]  ;;  %s4684_s27 = scalar_lea.hbm %s4780_s4, %s3088_s30 }
  0x9d   : > { %3344 = vmatpush3.bf16.msra.mxu0 %v3647_v12  ;;  %3249 = vmatprep.subr.bf16.mxu1 %v3648_v13  ;;  %v480_v1 = vshrl.u32 %v3079_v58, 16  ;;  %v483_v2 = vshll.u32 %v3079_v58, 16  ;;  %v4293_v12 = vld [vmem:[#allocation2 + $0x4] sm:$0x1]  ;;  %v560_v15 = vld [vmem:[#allocation2 + $0x10] sm:$0xf]  ;;  %v3080_v16 = vpack.c.bf16 %v433_v4, %v433_v4  ;;  %v3081_v21 = vpack.c.bf16 %v434_v7, %v434_v7 }
  0x9e   : > { %3345 = vmatprep.subr.bf16.mxu0 %v3649_v14  ;;  %v474_v5 = vrot.slane %v472_v61, 7  ;;  %v735_v19 = vrot.slane %v733_v63, 5  ;;  %v563_v20 = vld [vmem:[#allocation2 + $0x14] sm:$0x1]  ;;  %v739_v40 = vshll.u32 %v4293_v12, 16  ;;  %v3719_v55 = vld [vmem:[#allocation6 + $0x228] sm:$0xff]  }
  0x9f   : > { %v488_v24 = vshrl.u32 %v3080_v16, 16  ;;  %v491_v25 = vshll.u32 %v3080_v16, 16  ;;  %v496_v32 = vshrl.u32 %v3081_v21, 16  ;;  %v499_v36 = vshll.u32 %v3081_v21, 16  ;;  %v336_v52 = vld [vmem:[#allocation2 + $0x28] sm:$0x1] }
  0xa0   : > { %3250 = vmatpush3.bf16.msra.mxu1 %v3648_v13  ;;  %v732_v13 = vrot.slane %v730_v57, 4  ;;  %v477_v17 = vor.u32 %v475_v62, %v474_v5  ;;  %v478_v18 = vrot.slane %v474_v5, 4  ;;  %v569_v31 = vld [vmem:[#allocation2 + $0x1c] sm:$0x1]  ;;  %v572_v37 = vld [vmem:[#allocation2 + $0x20] sm:$0xf] }
  0xa1   : > { %3346 = vmatpush3.bf16.msra.mxu0 %v3649_v14  ;;  %3251 = vmatprep.subr.bf16.mxu1 %v3650_v23  ;;  %v482_v14 = vrot.slane %v480_v1, 7  ;;  %v490_v35 = vrot.slane %v488_v24, 7  ;;  %v575_v38 = vld [vmem:[#allocation2 + $0x24] sm:$0x1]  ;;  %v498_v41 = vrot.slane %v496_v32, 7  ;;  %v741_v49 = vrot.slane %v739_v40, 5 }
  0xa2   : > { %3347 = vmatprep.subr.bf16.mxu0 %v3651_v30  ;;  %v555_v28 = vsel %vm4289_vm8, %v477_v17, %v554_v6  ;;  %v558_v29 = vsel %vm4237_vm3, %v478_v18, %v557_v11  ;;  %v736_v39 = vor.u32 %v735_v19, %v732_v13  ;;  %v337_v56 = vsel %vm4237_vm3, 0, %v336_v52  ;;  %s2715_s10 = scalar_lea.sflag [#allocation5], %s4217_s24  ;;  %s3836_s29 = scalar_lea.vmem %s4679_s28, 512 }
  0xa3   : > { %v485_v22 = vor.u32 %v483_v2, %v482_v14  ;;  %556 = vst [vmem:[#allocation2 + $0x8] sm:$0xf] %v555_v28  ;;  %559 = vst [vmem:[#allocation2 + $0xc] sm:$0x1] %v558_v29  ;;  %v493_v42 = vor.u32 %v491_v25, %v490_v35  ;;  %v494_v43 = vrot.slane %v490_v35, 4  ;;  %v501_v44 = vor.u32 %v499_v36, %v498_v41  ;;  %v4334_v2 = vld [vmem:[%s4223_s18 + $0x10] sm:$0xff]   ;;  %p3837_p13 = scmp.ne.s32.totalorder %s4679_s28, %s3836_s29 }
  0xa4   : > { %3252 = vmatpush3.bf16.msra.mxu1 %v3650_v23  ;;  %v486_v23 = vrot.slane %v482_v14, 4  ;;  %v502_v45 = vrot.slane %v498_v41, 4  ;;  %338 = vst [vmem:[#allocation2 + $0x28] sm:$0x1] %v337_v56  ;;  %v3099_v28 = vunpack.c.l.bf16 %v4334_v2  ;;  %s3967_s7 = smov [#allocation11]  }
  0xa5   : > { %3348 = vmatpush3.bf16.msra.mxu0 %v3651_v30  ;;  %3253 = vmatprep.subr.bf16.mxu1 %v3652_v48  ;;  %v566_v30 = vld [vmem:[#allocation2 + $0x18] sm:$0xf]  ;;  %v561_v33 = vsel %vm4289_vm8, %v485_v22, %v560_v15  ;;  %v570_v47 = vsel %vm4237_vm3, %v494_v43, %v569_v31  ;;  %v573_v50 = vsel %vm4289_vm8, %v501_v44, %v572_v37  ;;  %p3838_p6 = pnand %p3837_p13, %p4156_p10  ;;  %s3840_s16 = sshll.u32 %s3967_s7, 4  ;;  %s3841_s16 = int_to_ptr.vmem [resolvable:$false] %s3840_s16 }
  0xa6   : > { %3349 = vmatprep.subr.bf16.mxu0 %v3653_v53  ;;  %v564_v34 = vsel %vm4237_vm3, %v486_v23, %v563_v20  ;;  %562 = vst [vmem:[#allocation2 + $0x10] sm:$0xf] %v561_v33  ;;  %v567_v46 = vsel %vm4289_vm8, %v493_v42, %v566_v30  ;;  %571 = vst [vmem:[#allocation2 + $0x1c] sm:$0x1] %v570_v47  ;;  %v576_v51 = vsel %vm4237_vm3, %v502_v45, %v575_v38  ;;  %s3842_s14 = scalar_lea.vmem %s3841_s16, 1024  ;;  %p3843_p5 = scmp.lt.s32.totalorder %s4679_s28, %s3841_s16 }
  0xa7   : > { %565 = vst [vmem:[#allocation2 + $0x14] sm:$0x1] %v564_v34  ;;  %568 = vst [vmem:[#allocation2 + $0x18] sm:$0xf] %v567_v46  ;;  %p3839_p3 = pneg %p3838_p6  ;;  %p3844_p7 = scmp.lt.s32.totalorder %s3842_s14, %s3836_s29 }
  0xa8   : > { %3254 = vmatpush3.bf16.msra.mxu1 %v3652_v48  ;;  %v737_v48 = vrot.slane %v736_v39, 4  ;;  %574 = vst [vmem:[#allocation2 + $0x20] sm:$0xf] %v573_v50  ;;  %577 = vst [vmem:[#allocation2 + $0x24] sm:$0x1] %v576_v51 }
  0xa9   : > { %3350 = vmatpush3.bf16.msra.mxu0 %v3653_v53  ;;  %3263 = vmatprep.subr.bf16.mxu1 %v4284_v0  ;;  %v368_v53 = vld [vmem:[#allocation2 + $0x2c] sm:$0x1]  ;;  %p3845_p9 = por %p3844_p7, %p3843_p5 }
  0xaa   : > { %3359 = vmatprep.subr.bf16.mxu0 %v4286_v3  ;;  %v369_v57 = vsel %vm4242_vm4, 0, %v368_v53  ;;  %v4324_v58 = vld [vmem:[#allocation2 + $0x8] sm:$0xf]  ;;  %v4326_v59 = vld [vmem:[#allocation2 + $0xc] sm:$0x1]  ;;  %v742_v11 = vsel %vm4316_vm9, %v737_v48, %v741_v49 }
  0xab   : > { %v1507_v60 = vld [vmem:[#allocation2 + $0x8] sm:$0xf]  ;;  %370 = vst [vmem:[#allocation2 + $0x2c] sm:$0x1] %v369_v57  ;;  %v744_v61 = vshrl.u32 %v4324_v58, 16  ;;  %v747_v62 = vshll.u32 %v4324_v58, 16  ;;  %p3846_p0 = pnand %p3845_p9, %p3839_p3 }
  0xac   : > { %v753_v63 = vshll.u32 %v4326_v59, 16  ;;  %v4331_v1 = vld [vmem:[#allocation2 + $0xc] sm:$0x1]  ;;  %v1524_v6 = vshrl.u32 %v1507_v60, 16  ;;  %v1527_v7 = vshll.u32 %v1507_v60, 16 }
  0xad   : > { %v1509_v4 = vld [vmem:[#allocation2 + $0x10] sm:$0xf]  ;;  %v746_v13 = vrot.slane %v744_v61, 4  ;;  %v749_v14 = vrot.slane %v747_v62, 5  ;;  %v1533_v15 = vshll.u32 %v4331_v1, 16 }
  0xae   : > { %v4336_v5 = vld [vmem:[#allocation2 + $0x14] sm:$0x1]  ;;  %v1526_v16 = vrot.slane %v1524_v6, 4  ;;  %v1529_v17 = vrot.slane %v1527_v7, 5  ;;  %v1538_v18 = vshrl.u32 %v1509_v4, 16  ;;  %v1541_v19 = vshll.u32 %v1509_v4, 16 }
  0xaf   : > { %v4341_v20 = vld [vmem:[#allocation2 + $0x10] sm:$0xf]  ;;  %v750_v21 = vor.u32 %v749_v14, %v746_v13  ;;  %v755_v22 = vrot.slane %v753_v63, 5  ;;  %v1547_v23 = vshll.u32 %v4336_v5, 16  ;;  %v4344_v24 = vld [vmem:[#allocation2 + $0x18] sm:$0xf]  ;;  %v412_v4 = vmul.f32 %v3099_v28, %v4255_v26 }
  0xb0   : > { %v4346_v25 = vld [vmem:[#allocation2 + $0x14] sm:$0x1]  ;;  %v1530_v29 = vor.u32 %v1529_v17, %v1526_v16  ;;  %v1535_v30 = vrot.slane %v1533_v15, 5  ;;  %v1540_v31 = vrot.slane %v1538_v18, 4  ;;  %v1543_v32 = vrot.slane %v1541_v19, 5 }
  0xb1   : > { %v751_v33 = vrot.slane %v750_v21, 4  ;;  %v1549_v34 = vrot.slane %v1547_v23, 5  ;;  %v758_v35 = vshrl.u32 %v4341_v20, 16  ;;  %v761_v36 = vshll.u32 %v4341_v20, 16  ;;  %v4351_v39 = vld [vmem:[#allocation2 + $0x1c] sm:$0x1] }
  0xb2   : > { %v1531_v37 = vrot.slane %v1530_v29, 4  ;;  %v1544_v38 = vor.u32 %v1543_v32, %v1540_v31  ;;  %v767_v40 = vshll.u32 %v4346_v25, 16  ;;  %v772_v41 = vshrl.u32 %v4344_v24, 16  ;;  %v1511_v46 = vld [vmem:[#allocation2 + $0x18] sm:$0xf] }
  0xb3   : > { %v756_v42 = vsel %vm4316_vm9, %v751_v33, %v755_v22  ;;  %v760_v43 = vrot.slane %v758_v35, 4  ;;  %v763_v44 = vrot.slane %v761_v36, 5  ;;  %v775_v45 = vshll.u32 %v4344_v24, 16  ;;  %v4360_v51 = vld [vmem:[#allocation2 + $0x1c] sm:$0x1] }
  0xb4   : > { %v2938_v47 = vcombine.low %v742_v11, %v756_v42  ;;  %v1536_v48 = vsel %vm4316_vm9, %v1531_v37, %v1535_v30  ;;  %v1545_v49 = vrot.slane %v1544_v38, 4  ;;  %v769_v50 = vrot.slane %v767_v40, 5  ;;  %v1513_v60 = vld [vmem:[#allocation2 + $0x20] sm:$0xf]  ;;  %v4365_v62 = vld [vmem:[#allocation2 + $0x24] sm:$0x1] }
  0xb5   : > { %v764_v52 = vor.u32 %v763_v44, %v760_v43  ;;  %v774_v53 = vrot.slane %v772_v41, 4  ;;  %v777_v56 = vrot.slane %v775_v45, 5  ;;  %v781_v57 = vshll.u32 %v4351_v39, 16  ;;  %v371_v32 = vld [vmem:[#allocation2 + $0x34] sm:$0x1]  ;;  %v3656_v37 = vld [vmem:[#allocation6 + $0x8] sm:$0xff]  }
  0xb6   : > { %3255 = vmatprep.mubr.bf16.mxu1 %v2938_v47  ;;  %v1550_v61 = vsel %vm4316_vm9, %v1545_v49, %v1549_v34  ;;  %v1552_v63 = vshrl.u32 %v1511_v46, 16  ;;  %v3100_v6 = vunpack.c.h.bf16 %v4334_v2  ;;  %v1555_v16 = vshll.u32 %v1511_v46, 16  ;;  %v339_v2 = vld [vmem:[#allocation2 + $0x30] sm:$0x1]  ;;  %v4377_v40 = vld [vmem:[#allocation2 + $0x20] sm:$0xf] }
  0xb7   : > { %v2994_v7 = vcombine.low %v1536_v48, %v1550_v61  ;;  %v765_v11 = vrot.slane %v764_v52, 4  ;;  %v778_v13 = vor.u32 %v777_v56, %v774_v53  ;;  %v783_v14 = vrot.slane %v781_v57, 5  ;;  %v342_v41 = vld [vmem:[#allocation2 + $0x38] sm:$0x1]  ;;  %v374_v45 = vld [vmem:[#allocation2 + $0x3c] sm:$0x1] }
  0xb8   : > { %v1554_v15 = vrot.slane %v1552_v63, 4  ;;  %v1561_v17 = vshll.u32 %v4360_v51, 16  ;;  %v1566_v18 = vshrl.u32 %v1513_v60, 16  ;;  %v1569_v22 = vshll.u32 %v1513_v60, 16  ;;  %v345_v46 = vld [vmem:[#allocation2 + $0x40] sm:$0x1] }
  0xb9   : > { %3351 = vmatprep.mubr.bf16.mxu0 %v2994_v7  ;;  %v770_v19 = vsel %vm4316_vm9, %v765_v11, %v769_v50  ;;  %v779_v21 = vrot.slane %v778_v13, 4  ;;  %v1575_v23 = vshll.u32 %v4365_v62, 16  ;;  %v1557_v28 = vrot.slane %v1555_v16, 5  ;;  %v3658_v48 = vld [vmem:[#allocation6 + $0x10] sm:$0xff]   ;;  %v3127_v52 = vld [vmem:[%s4223_s18 + $0x18] sm:$0xff]  }
  0xba   : > { %v1568_v29 = vrot.slane %v1566_v18, 4  ;;  %v1571_v31 = vrot.slane %v1569_v22, 5  ;;  %v413_v33 = vmul.f32 %v3100_v6, %v4255_v26  ;;  %v1563_v36 = vrot.slane %v1561_v17, 5  ;;  %v377_v60 = vld [vmem:[#allocation2 + $0x44] sm:$0x1] }
  0xbb   : > { %v784_v30 = vsel %vm4316_vm9, %v779_v21, %v783_v14  ;;  %v1558_v35 = vor.u32 %v1557_v28, %v1554_v15  ;;  %v427_v38 = vadd.f32 %v4257_v27, %v412_v4  ;;  %v1577_v43 = vrot.slane %v1575_v23, 5  ;;  %v3657_v15 = vld [vmem:[#allocation6 + $0x148] sm:$0xff]   ;;  %v3660_v28 = vld [vmem:[#allocation6 + $0x18] sm:$0xff]   ;;  %v1128_v9 = vld [vmem:[#allocation2 + $0x20] sm:$0xe] }
  0xbc   : > { %v2939_v34 = vcombine.low %v770_v19, %v784_v30  ;;  %v1572_v42 = vor.u32 %v1571_v31, %v1568_v29  ;;  %v340_v44 = vsel %vm4237_vm3, 0, %v339_v2  ;;  %v372_v50 = vsel %vm4242_vm4, 0, %v371_v32  ;;  %v578_v2 = vld [vmem:[#allocation2 + $0x28] sm:$0xf]  ;;  %v3659_v31 = vld [vmem:[#allocation6 + $0x150] sm:$0xff]  }
  0xbd   : > { %v1559_v47 = vrot.slane %v1558_v35, 4  ;;  %v435_v49 = vmax.f32 %v427_v38, 0.0  ;;  %341 = vst [vmem:[#allocation2 + $0x30] sm:$0x1] %v340_v44  ;;  %v786_v56 = vshrl.u32 %v4377_v40, 16  ;;  %v428_v57 = vadd.f32 %v4257_v27, %v413_v33 }
  0xbe   : > { %3256 = vmatmul.mubr.bf16.vlgmr.msra.gmra.mrb[0].mxu1 %v2939_v34  ;;  %v1573_v53 = vrot.slane %v1572_v42, 4  ;;  %373 = vst [vmem:[#allocation2 + $0x34] sm:$0x1] %v372_v50  ;;  %v343_v4 = vsel %vm4237_vm3, 0, %v342_v41  ;;  %v375_v6 = vsel %vm4242_vm4, 0, %v374_v45  ;;  %v789_v7 = vshll.u32 %v4377_v40, 16 }
  0xbf   : > { %3264 = vmatpush3.bf16.msra.mxu1 %v4284_v0  ;;  %v1564_v61 = vsel %vm4316_vm9, %v1559_v47, %v1563_v36  ;;  %v3082_v63 = vpack.c.bf16 %v435_v49, %v435_v49  ;;  %v436_v11 = vmax.f32 %v428_v57, 0.0  ;;  %344 = vst [vmem:[#allocation2 + $0x38] sm:$0x1] %v343_v4  ;;  %376 = vst [vmem:[#allocation2 + $0x3c] sm:$0x1] %v375_v6  ;;  %v3103_v13 = vunpack.c.l.bf16 %v3127_v52  ;;  %v3662_v49 = vld [vmem:[#allocation6 + $0x20] sm:$0xff]  }
  0xc0   : > { %3265 = vmatprep.subr.bf16.mxu1 %v3656_v37  ;;  %v1578_v0 = vsel %vm4316_vm9, %v1573_v53, %v1577_v43  ;;  %v346_v18 = vsel %vm4237_vm3, 0, %v345_v46  ;;  %v1153_v19 = vrot.slane %v4293_v12, 5  ;;  %v378_v23 = vsel %vm4242_vm4, 0, %v377_v60  ;;  %v581_v32 = vld [vmem:[#allocation2 + $0x2c] sm:$0x1] }
  0xc1   : > { %v2995_v14 = vcombine.low %v1564_v61, %v1578_v0  ;;  %v504_v16 = vshrl.u32 %v3082_v63, 16  ;;  %v507_v17 = vshll.u32 %v3082_v63, 16  ;;  %v3083_v21 = vpack.c.bf16 %v436_v11, %v436_v11  ;;  %347 = vst [vmem:[#allocation2 + $0x40] sm:$0x1] %v346_v18  ;;  %379 = vst [vmem:[#allocation2 + $0x44] sm:$0x1] %v378_v23 }
  0xc2   : > { %v414_v22 = vmul.f32 %v3103_v13, %v4255_v26  ;;  %v3104_v30 = vunpack.c.h.bf16 %v3127_v52  ;;  %v788_v33 = vrot.slane %v786_v56, 4  ;;  %v4404_v41 = vld [vmem:[#allocation2 + $0x24] sm:$0x1]  ;;  %v791_v42 = vrot.slane %v789_v7, 5  ;;  %v3661_v6 = vld [vmem:[#allocation6 + $0x158] sm:$0xff]   ;;  %v3664_v11 = vld [vmem:[#allocation6 + $0x28] sm:$0xff]  }
  0xc3   : > { %3266 = vmatpush3.bf16.msra.mxu1 %v3656_v37  ;;  %3352 = vmatmul.mubr.bf16.vlgmr.msra.gmra.mrb[0].mxu0 %v2995_v14  ;;  %v506_v29 = vrot.slane %v504_v16, 7  ;;  %v512_v34 = vshrl.u32 %v3083_v21, 16  ;;  %v515_v35 = vshll.u32 %v3083_v21, 16  ;;  %v1157_v44 = vrot.slane %v4326_v59, 5  ;;  %v3663_v16 = vld [vmem:[#allocation6 + $0x160] sm:$0xff]  }
  0xc4   : > { %3267 = vmatprep.subr.bf16.mxu1 %v3658_v48  ;;  %3360 = vmatpush3.bf16.msra.mxu0 %v4286_v3  ;;  %v429_v36 = vadd.f32 %v4257_v27, %v414_v22  ;;  %v415_v43 = vmul.f32 %v3104_v30, %v4255_v26  ;;  %v1815_v45 = vrot.slane %v4331_v1, 5  ;;  %v1819_v47 = vrot.slane %v4336_v5, 5  ;;  %v584_v53 = vld [vmem:[#allocation2 + $0x30] sm:$0xf] }
  0xc5   : > { %3361 = vmatprep.subr.bf16.mxu0 %v3657_v15  ;;  %v509_v37 = vor.u32 %v507_v17, %v506_v29  ;;  %v510_v38 = vrot.slane %v506_v29, 4  ;;  %v514_v3 = vrot.slane %v512_v34, 7  ;;  %v587_v56 = vld [vmem:[#allocation2 + $0x34] sm:$0x1]  ;;  %v1161_v63 = vrot.slane %v4346_v25, 5  ;;  %v3666_v29 = vld [vmem:[#allocation6 + $0x30] sm:$0xff]  }
  0xc6   : > { %v437_v46 = vmax.f32 %v429_v36, 0.0  ;;  %v430_v26 = vadd.f32 %v4257_v27, %v415_v43  ;;  %v1165_v4 = vrot.slane %v4351_v39, 5  ;;  %v792_v0 = vor.u32 %v791_v42, %v788_v33  ;;  %v590_v22 = vld [vmem:[#allocation2 + $0x38] sm:$0xf]  ;;  %v593_v23 = vld [vmem:[#allocation2 + $0x3c] sm:$0x1] }
  0xc7   : > { %3268 = vmatpush3.bf16.msra.mxu1 %v3658_v48  ;;  %v579_v50 = vsel %vm4289_vm8, %v509_v37, %v578_v2  ;;  %v582_v52 = vsel %vm4237_vm3, %v510_v38, %v581_v32  ;;  %v795_v48 = vshll.u32 %v4404_v41, 16  ;;  %v517_v57 = vor.u32 %v515_v35, %v514_v3  ;;  %v3665_v34 = vld [vmem:[#allocation6 + $0x168] sm:$0xff]   ;;  %v3676_v25 = vld [vmem:[#allocation6 + $0x90] sm:$0xff]  }
  0xc8   : > { %3269 = vmatprep.subr.bf16.mxu1 %v3660_v28  ;;  %3362 = vmatpush3.bf16.msra.mxu0 %v3657_v15  ;;  %580 = vst [vmem:[#allocation2 + $0x28] sm:$0xf] %v579_v50  ;;  %583 = vst [vmem:[#allocation2 + $0x2c] sm:$0x1] %v582_v52  ;;  %v518_v60 = vrot.slane %v514_v3, 4  ;;  %v3084_v61 = vpack.c.bf16 %v437_v46, %v437_v46  ;;  %v438_v7 = vmax.f32 %v430_v26, 0.0 }
  0xc9   : > { %3363 = vmatprep.subr.bf16.mxu0 %v3659_v31  ;;  %v585_v27 = vsel %vm4289_vm8, %v517_v57, %v584_v53  ;;  %v4424_v18 = vrot.slane %v795_v48, 5  ;;  %v3668_v53 = vld [vmem:[#allocation6 + $0x38] sm:$0xff]  }
  0xca   : > { %v588_v13 = vsel %vm4237_vm3, %v518_v60, %v587_v56  ;;  %v520_v14 = vshrl.u32 %v3084_v61, 16  ;;  %v523_v15 = vshll.u32 %v3084_v61, 16  ;;  %586 = vst [vmem:[#allocation2 + $0x30] sm:$0xf] %v585_v27  ;;  %v4422_v17 = vpack.c.bf16 %v438_v7, %v438_v7 }
  0xcb   : > { %3270 = vmatpush3.bf16.msra.mxu1 %v3660_v28  ;;  %589 = vst [vmem:[#allocation2 + $0x34] sm:$0x1] %v588_v13  ;;  %v4426_v28 = vrot.slane %v792_v0, 4  ;;  %v3667_v13 = vld [vmem:[#allocation6 + $0x170] sm:$0xff]  }
  0xcc   : > { %3271 = vmatprep.subr.bf16.mxu1 %v3662_v49  ;;  %3364 = vmatpush3.bf16.msra.mxu0 %v3659_v31  ;;  %v522_v21 = vrot.slane %v520_v14, 7  ;;  %v528_v2 = vshrl.u32 %v4422_v17, 16  ;;  %v531_v33 = vshll.u32 %v4422_v17, 16 }
  0xcd   : > { %3365 = vmatprep.subr.bf16.mxu0 %v3661_v6 }
  0xce   : > { %v525_v30 = vor.u32 %v523_v15, %v522_v21  ;;  %v526_v32 = vrot.slane %v522_v21, 4 }
  0xcf   : > { %3272 = vmatpush3.bf16.msra.mxu1 %v3662_v49  ;;  %v4430_v35 = vld [vmem:[#allocation2 + $0x28] sm:$0xf]  ;;  %v4432_v31 = vld [vmem:[#allocation2 + $0x2c] sm:$0x1] }
  0xd0   : > { %3273 = vmatprep.subr.bf16.mxu1 %v3664_v11  ;;  %v1515_v36 = vld [vmem:[#allocation2 + $0x28] sm:$0xf]  ;;  %3366 = vmatpush3.bf16.msra.mxu0 %v3661_v6  ;;  %v800_v37 = vshrl.u32 %v4430_v35, 16  ;;  %v803_v38 = vshll.u32 %v4430_v35, 16  ;;  %v809_v42 = vshll.u32 %v4432_v31, 16  ;;  %v591_v50 = vsel %vm4289_vm8, %v525_v30, %v590_v22 }
  0xd1   : > { %v4437_v43 = vld [vmem:[#allocation2 + $0x2c] sm:$0x1]  ;;  %v1580_v3 = vshrl.u32 %v1515_v36, 16  ;;  %3367 = vmatprep.subr.bf16.mxu0 %v3663_v16  ;;  %v1583_v46 = vshll.u32 %v1515_v36, 16  ;;  %v594_v52 = vsel %vm4237_vm3, %v526_v32, %v593_v23  ;;  %v1517_v57 = vld [vmem:[#allocation2 + $0x30] sm:$0xf] }
  0xd2   : > { %v1589_v49 = vshll.u32 %v4437_v43, 16  ;;  %v802_v56 = vrot.slane %v800_v37, 4  ;;  %v805_v26 = vrot.slane %v803_v38, 5  ;;  %v811_v48 = vrot.slane %v809_v42, 5  ;;  %592 = vst [vmem:[#allocation2 + $0x38] sm:$0xf] %v591_v50 }
  0xd3   : > { %3274 = vmatpush3.bf16.msra.mxu1 %v3664_v11  ;;  %v1582_v60 = vrot.slane %v1580_v3, 4  ;;  %595 = vst [vmem:[#allocation2 + $0x3c] sm:$0x1] %v594_v52  ;;  %v4444_v61 = vld [vmem:[#allocation2 + $0x34] sm:$0x1]  ;;  %v1585_v6 = vrot.slane %v1583_v46, 5  ;;  %v798_v11 = vsel %vm4316_vm9, %v4426_v28, %v4424_v18 }
  0xd4   : > { %3275 = vmatprep.subr.bf16.mxu1 %v3666_v29  ;;  %v1591_v0 = vrot.slane %v1589_v49, 5  ;;  %v1594_v7 = vshrl.u32 %v1517_v57, 16  ;;  %v1597_v27 = vshll.u32 %v1517_v57, 16  ;;  %3368 = vmatpush3.bf16.msra.mxu0 %v3663_v16  ;;  %v806_v14 = vor.u32 %v805_v26, %v802_v56  ;;  %v4451_v17 = vld [vmem:[#allocation2 + $0x30] sm:$0xf] }
  0xd5   : > { %v1603_v15 = vshll.u32 %v4444_v61, 16  ;;  %v4453_v21 = vld [vmem:[#allocation2 + $0x34] sm:$0x1]  ;;  %v530_v22 = vrot.slane %v528_v2, 7  ;;  %v596_v23 = vld [vmem:[#allocation2 + $0x40] sm:$0xf]  ;;  %3369 = vmatprep.subr.bf16.mxu0 %v3665_v34  ;;  %v1586_v30 = vor.u32 %v1585_v6, %v1582_v60 }
  0xd6   : > { %v1596_v32 = vrot.slane %v1594_v7, 4  ;;  %v1599_v36 = vrot.slane %v1597_v27, 5  ;;  %v814_v16 = vshrl.u32 %v4451_v17, 16  ;;  %v4456_v37 = vld [vmem:[#allocation6 + $0x80] sm:$0xff]   ;;  %v807_v38 = vrot.slane %v806_v14, 4 }
  0xd7   : > { %v1605_v42 = vrot.slane %v1603_v15, 5  ;;  %v817_v18 = vshll.u32 %v4451_v17, 16  ;;  %v823_v28 = vshll.u32 %v4453_v21, 16  ;;  %3276 = vmatpush3.bf16.msra.mxu1 %v3666_v29  ;;  %v599_v3 = vld [vmem:[#allocation2 + $0x44] sm:$0x1]  ;;  %v1587_v46 = vrot.slane %v1586_v30, 4 }
  0xd8   : > { %v1600_v49 = vor.u32 %v1599_v36, %v1596_v32  ;;  %v816_v2 = vrot.slane %v814_v16, 4  ;;  %v533_v50 = vor.u32 %v531_v33, %v530_v22  ;;  %3277 = vmatprep.subr.bf16.mxu1 %v3668_v53  ;;  %3370 = vmatpush3.bf16.msra.mxu0 %v3665_v34  ;;  %v812_v52 = vsel %vm4316_vm9, %v807_v38, %v811_v48  ;;  %v3669_v34 = vld [vmem:[#allocation6 + $0x178] sm:$0xff]  }
  0xd9   : > { %v819_v56 = vrot.slane %v817_v18, 5  ;;  %v825_v26 = vrot.slane %v823_v28, 5  ;;  %v534_v57 = vrot.slane %v530_v22, 4  ;;  %v2940_v60 = vcombine.low %v798_v11, %v812_v52  ;;  %3371 = vmatprep.subr.bf16.mxu0 %v3667_v13  ;;  %v4464_v7 = vld [vmem:[#allocation2 + $0x38] sm:$0xf] }
  0xda   : > { %v1592_v6 = vsel %vm4316_vm9, %v1587_v46, %v1591_v0  ;;  %v1601_v29 = vrot.slane %v1600_v49, 4  ;;  %v4466_v27 = vld [vmem:[#allocation2 + $0x3c] sm:$0x1]  ;;  %v597_v33 = vsel %vm4289_vm8, %v533_v50, %v596_v23  ;;  %v828_v14 = vshrl.u32 %v4464_v7, 16  ;;  %v1519_v22 = vld [vmem:[#allocation2 + $0x38] sm:$0xf] }
  0xdb   : > { %v820_v48 = vor.u32 %v819_v56, %v816_v2  ;;  %v831_v15 = vshll.u32 %v4464_v7, 16  ;;  %v837_v11 = vshll.u32 %v4466_v27, 16  ;;  %598 = vst [vmem:[#allocation2 + $0x40] sm:$0xf] %v597_v33  ;;  %3278 = vmatpush3.bf16.msra.mxu1 %v3668_v53  ;;  %3259 = vmatprep.mubr.bf16.mxu1 %v2940_v60  ;;  %v600_v30 = vsel %vm4237_vm3, %v534_v57, %v599_v3  ;;  %v1789_v32 = vld [vmem:[#allocation2 + $0x8] sm:$0xe] }
  0xdc   : > { %v1606_v0 = vsel %vm4316_vm9, %v1601_v29, %v1605_v42  ;;  %v1608_v8 = vshrl.u32 %v1519_v22, 16  ;;  %v1611_v23 = vshll.u32 %v1519_v22, 16  ;;  %3287 = vmatprep.subr.bf16.mxu1 %v4456_v37  ;;  %v830_v38 = vrot.slane %v828_v14, 4  ;;  %601 = vst [vmem:[#allocation2 + $0x44] sm:$0x1] %v600_v30  ;;  %3372 = vmatpush3.bf16.msra.mxu0 %v3667_v13  ;;  %v4480_v53 = vld [vmem:[#allocation6 + $0x180] sm:$0xff]  }
  0xdd   : > { %v2996_v36 = vcombine.low %v1592_v6, %v1606_v0  ;;  %v821_v16 = vrot.slane %v820_v48, 4  ;;  %v833_v18 = vrot.slane %v831_v15, 5  ;;  %v4478_v28 = vld [vmem:[#allocation2 + $0x3c] sm:$0x1]  ;;  %3373 = vmatprep.subr.bf16.mxu0 %v3669_v34  ;;  %v1790_v49 = vld [vmem:[#allocation2 + $0x10] sm:$0xe] }
  0xde   : > { %v1610_v46 = vrot.slane %v1608_v8, 4  ;;  %v1613_v42 = vrot.slane %v1611_v23, 5  ;;  %v1823_v3 = vrot.slane %v4360_v51, 5  ;;  %v839_v50 = vrot.slane %v837_v11, 5  ;;  %v4483_v52 = vld [vmem:[#allocation2 + $0x18] sm:$0xe] }
  0xdf   : > { %3355 = vmatprep.mubr.bf16.mxu0 %v2996_v36  ;;  %v834_v2 = vor.u32 %v833_v18, %v830_v38  ;;  %v1827_v56 = vrot.slane %v4365_v62, 5  ;;  %v1617_v57 = vshll.u32 %v4478_v28, 16  ;;  %v4487_v60 = vld [vmem:[#allocation2 + $0x20] sm:$0xe]  ;;  %v826_v13 = vsel %vm4316_vm9, %v821_v16, %v825_v26  ;;  %v1793_v11 = vld [vmem:[#allocation2 + $0x28] sm:$0xe] }
  0xe0   : > { %v1614_v29 = vor.u32 %v1613_v42, %v1610_v46  ;;  %3374 = vmatpush3.bf16.msra.mxu0 %v3669_v34  ;;  %v3006_v33 = vrot.slane %v1789_v32, 9  ;;  %v3007_v14 = vrot.slane %v1790_v49, 9  ;;  %v3008_v15 = vrot.slane %v4483_v52, 9  ;;  %v1124_v26 = vld [vmem:[#allocation2] sm:$0xe] }
  0xe1   : > { %v835_v6 = vrot.slane %v834_v2, 4  ;;  %3383 = vmatprep.subr.bf16.mxu0 %v4480_v53  ;;  %v2950_v8 = vcombine.low %v4277_v54, %v4324_v58  ;;  %v1619_v34 = vrot.slane %v1617_v57, 5  ;;  %v3009_v16 = vrot.slane %v4487_v60, 9  ;;  %v1125_v38 = vld [vmem:[#allocation2 + $0x8] sm:$0xe] }
  0xe2   : > { %v1521_v48 = vld [vmem:[#allocation2 + $0x40] sm:$0xf]  ;;  %v1615_v18 = vrot.slane %v1614_v29, 4  ;;  %v2962_v54 = vrot.slane %v1124_v26, 9  ;;  %v2963_v58 = vrot.slane %v1125_v38, 9  ;;  %v1816_v52 = vsel %vm4501_vm12, %v3006_v33, %v1815_v45 }
  0xe3   : > { %v840_v22 = vsel %vm4316_vm9, %v835_v6, %v839_v50  ;;  %v1622_v0 = vshrl.u32 %v1521_v48, 16  ;;  %v1625_v30 = vshll.u32 %v1521_v48, 16  ;;  %v4497_v36 = vld [vmem:[#allocation2 + $0x44] sm:$0x1]  ;;  %v1794_v57 = vld [vmem:[#allocation2 + $0x30] sm:$0xe]  ;;  %v1820_v60 = vsel %vm4501_vm12, %v3007_v14, %v1819_v47 }
  0xe4   : > { %v2941_v23 = vcombine.low %v826_v13, %v840_v22  ;;  %v1631_v49 = vshll.u32 %v4497_v36, 16  ;;  %v3010_v13 = vrot.slane %v1793_v11, 9  ;;  %v2951_v6 = vcombine.low %v4341_v20, %v4344_v24  ;;  %v1126_v45 = vld [vmem:[#allocation2 + $0x10] sm:$0xe]  ;;  %v1127_v47 = vld [vmem:[#allocation2 + $0x18] sm:$0xe] }
  0xe5   : > { %v1624_v46 = vrot.slane %v1622_v0, 4  ;;  %v1627_v42 = vrot.slane %v1625_v30, 5  ;;  %v1154_v29 = vsel %vm4501_vm12, %v2962_v54, %v1153_v19  ;;  %v1158_v1 = vsel %vm4501_vm12, %v2963_v58, %v1157_v44  ;;  %v3674_v11 = vld [vmem:[#allocation6 + $0x88] sm:$0xff]   ;;  %v348_v38 = vld [vmem:[#allocation2 + $0x48] sm:$0x1]  ;;  %v3685_v54 = vld [vmem:[#allocation6 + $0xb0] sm:$0xff]  }
  0xe6   : > { %3260 = vmatmul.mubr.bf16.gmra.mrb[4].mxu1 %v2941_v23  ;;  %v1633_v50 = vrot.slane %v1631_v49, 5  ;;  %v1620_v5 = vsel %vm4316_vm9, %v1615_v18, %v1619_v34  ;;  %v2970_v48 = vcombine.low %v1154_v29, %v1158_v1  ;;  %v2964_v14 = vrot.slane %v1126_v45, 9  ;;  %v3678_v23 = vld [vmem:[#allocation6 + $0x98] sm:$0xff]   ;;  %v3681_v49 = vld [vmem:[#allocation6 + $0x1a0] sm:$0xff]   ;;  %v2172_v1 = vld [vmem:[#allocation2 + $0x18] sm:$0xf] }
  0xe7   : > { %v1628_v2 = vor.u32 %v1627_v42, %v1624_v46  ;;  %3279 = vmatprep.mubr.bf16.mxu1 %v2950_v8  ;;  %v1831_v20 = vrot.slane %v4437_v43, 5  ;;  %v3011_v12 = vrot.slane %v1794_v57, 9  ;;  %v1835_v24 = vrot.slane %v4444_v61, 5  ;;  %v3682_v46 = vld [vmem:[#allocation6 + $0xa8] sm:$0xff]   ;;  %v1129_v58 = vld [vmem:[#allocation2 + $0x28] sm:$0xe] }
  0xe8   : > { %v2965_v19 = vrot.slane %v1127_v47, 9  ;;  %v3014_v22 = vcombine.low %v1816_v52, %v1820_v60  ;;  %v4535_v44 = vsel %vm4501_vm12, %v2964_v14, %v1161_v63  ;;  %v2952_v30 = vcombine.low %v4377_v40, %v4430_v35  ;;  %v1795_v63 = vld [vmem:[#allocation2 + $0x38] sm:$0xe]  ;;  %v2170_v29 = vld [vmem:[#allocation2 + $0x10] sm:$0xf] }
  0xe9   : > { %v1629_v33 = vrot.slane %v1628_v2, 4  ;;  %v1824_v40 = vsel %vm4501_vm12, %v3008_v15, %v1823_v3  ;;  %v1828_v39 = vsel %vm4501_vm12, %v3009_v16, %v1827_v56  ;;  %v1832_v8 = vsel %vm4501_vm12, %v3010_v13, %v1831_v20  ;;  %v3675_v3 = vld [vmem:[#allocation6 + $0x188] sm:$0xff]   ;;  %v3677_v16 = vld [vmem:[#allocation6 + $0x190] sm:$0xff]   ;;  %v3690_v45 = vld [vmem:[#allocation6 + $0xc0] sm:$0xff]  }
  0xea   : > { %v4543_v43 = vsel %vm4501_vm12, %v2965_v19, %v1165_v4  ;;  %v1796_v4 = vld [vmem:[#allocation2 + $0x40] sm:$0xe]  ;;  %v3015_v35 = vcombine.low %v1824_v40, %v1828_v39  ;;  %v2953_v51 = vcombine.low %v4451_v17, %v4464_v7  ;;  %v3012_v62 = vrot.slane %v1795_v63, 9  ;;  %v3691_v42 = vld [vmem:[#allocation2 + $0x10] ss:$8 sps:$4 sm:$0xff]  }
  0xeb   : > { %v1634_v59 = vsel %vm4316_vm9, %v1629_v33, %v1633_v50  ;;  %v2971_v61 = vcombine.low %v4535_v44, %v4543_v43  ;;  %v1839_v15 = vrot.slane %v4478_v28, 5  ;;  %v3013_v56 = vrot.slane %v1796_v4, 9  ;;  %v3680_v28 = vld [vmem:[#allocation6 + $0xa0] sm:$0xff]   ;;  %v3683_v2 = vld [vmem:[#allocation6 + $0x1a8] sm:$0xff]   ;;  %v3688_v50 = vld [vmem:[#allocation6 + $0xb8] sm:$0xff]  }
  0xec   : > { %v2997_v0 = vcombine.low %v1620_v5, %v1634_v59  ;;  %v1843_v26 = vrot.slane %v4497_v36, 5  ;;  %v349_v36 = vsel %vm4237_vm3, 0, %v348_v38  ;;  %v2966_v52 = vrot.slane %v1128_v9, 9  ;;  %v1130_v5 = vld [vmem:[#allocation2 + $0x30] sm:$0xe]  ;;  %v3689_v59 = vld [vmem:[#allocation6 + $0x1b8] sm:$0xff]  }
  0xed   : > { %v1840_v17 = vsel %vm4501_vm12, %v3012_v62, %v1839_v15  ;;  %350 = vst [vmem:[#allocation2 + $0x48] sm:$0x1] %v349_v36  ;;  %v1169_v57 = vrot.slane %v4404_v41, 5  ;;  %v2967_v13 = vrot.slane %v1129_v58, 9  ;;  %v1173_v60 = vrot.slane %v4432_v31, 5  ;;  %v3695_v15 = vld [vmem:[#allocation6 + $0x1c8] sm:$0xff]  }
  0xee   : > { %3356 = vmatmul.mubr.bf16.gmra.mrb[4].mxu0 %v2997_v0  ;;  %3280 = vmatmul.mubr.bf16.vlgmr.msra.gmra.mrb[0].mxu1 %v2951_v6  ;;  %v1844_v7 = vsel %vm4501_vm12, %v3013_v56, %v1843_v26  ;;  %v3686_v6 = vld [vmem:[#allocation6 + $0x1b0] sm:$0xff]   ;;  %v1131_v33 = vld [vmem:[#allocation2 + $0x38] sm:$0xe]  ;;  %v2187_v41 = vshrl.u32 %v2170_v29, 16  ;;  %v2190_v14 = vshll.u32 %v2170_v29, 16  ;;  %v2204_v31 = vshll.u32 %v2172_v1, 16 }
  0xef   : > { %3375 = vmatprep.mubr.bf16.mxu0 %v3014_v22  ;;  %3288 = vmatpush3.bf16.msra.mxu1 %v4456_v37  ;;  %v1836_v37 = vsel %vm4501_vm12, %v3011_v12, %v1835_v24  ;;  %v3017_v18 = vcombine.low %v1840_v17, %v1844_v7  ;;  %v1174_v47 = vsel %vm4501_vm12, %v2967_v13, %v1173_v60  ;;  %v2968_v20 = vrot.slane %v1130_v5, 9  ;;  %v3694_v22 = vld [vmem:[#allocation6 + $0xc8] sm:$0xff]   ;;  %v380_v0 = vld [vmem:[#allocation2 + $0x4c] sm:$0x1]  ;;  %v3693_v10 = vld [vmem:[#allocation2 + $0x20] ss:$8 sps:$4 sm:$0xff]  }
  0xf0   : > { %3289 = vmatprep.subr.bf16.mxu1 %v3674_v11  ;;  %3283 = vmatprep.mubr.bf16.mxu1 %v2952_v30  ;;  %v3016_v34 = vcombine.low %v1832_v8, %v1836_v37  ;;  %v1177_v12 = vrot.slane %v4453_v21, 5  ;;  %v2969_v24 = vrot.slane %v1131_v33, 9  ;;  %v1181_v19 = vrot.slane %v4466_v27, 5  ;;  %v4581_v40 = vld [vmem:[#allocation2 + $0x1c] sm:$0x1]  ;;  %v3698_v56 = vld [vmem:[#allocation6 + $0xd8] sm:$0xff]  }
  0xf1   : > { %v381_v39 = vsel %vm4242_vm4, 0, %v380_v0  ;;  %v2189_v21 = vrot.slane %v2187_v41, 4  ;;  %v2192_v63 = vrot.slane %v2190_v14, 5  ;;  %v2206_v4 = vrot.slane %v2204_v31, 5  ;;  %v3704_v26 = vld [vmem:[#allocation2 + $0x30] ss:$8 sps:$4 sm:$0xff]  }
  0xf2   : > { %382 = vst [vmem:[#allocation2 + $0x4c] sm:$0x1] %v381_v39  ;;  %v1178_v8 = vsel %vm4501_vm12, %v2968_v20, %v1177_v12  ;;  %v1182_v37 = vsel %vm4501_vm12, %v2969_v24, %v1181_v19  ;;  %v2210_v43 = vshll.u32 %v4581_v40, 16  ;;  %v3697_v38 = vld [vmem:[#allocation6 + $0x1d0] sm:$0xff]   ;;  %v3701_v60 = vld [vmem:[#allocation6 + $0x1e0] sm:$0xff]   ;;  %v3703_v31 = vld [vmem:[#allocation6 + $0x1e8] sm:$0xff]  }
  0xf3   : > { %3290 = vmatpush3.bf16.msra.mxu1 %v3674_v11  ;;  %v2201_v11 = vshrl.u32 %v2172_v1, 16  ;;  %v4600_v41 = vld [vmem:[#allocation2 + $0x2c] sm:$0x1]  ;;  %v2182_v12 = vld [vmem:[#allocation2 + $0x40] sm:$0xf] }
  0xf4   : > { %3291 = vmatprep.subr.bf16.mxu1 %v3676_v25  ;;  %v2212_v7 = vrot.slane %v2210_v43, 5  ;;  %v3706_v36 = vld [vmem:[#allocation2 + $0x40] ss:$8 sps:$4 sm:$0xff]  }
  0xf5   : > { %v2203_v27 = vrot.slane %v2201_v11, 4  ;;  %v3708_v20 = vld [vmem:[#allocation6 + $0xf8] sm:$0xff]  }
  0xf6   : > { %3376 = vmatmul.mubr.bf16.vlgmr.msra.gmra.mrb[0].mxu0 %v3015_v35  ;;  %3284 = vmatmul.mubr.bf16.gmra.mrb[4].mxu1 %v2953_v51  ;;  %v3692_v35 = vld [vmem:[#allocation6 + $0x1c0] sm:$0xff]   ;;  %v3696_v51 = vld [vmem:[#allocation6 + $0xd0] sm:$0xff]   ;;  %v2184_v0 = vld [vmem:[#allocation2 + $0x48] sm:$0xf] }
  0xf7   : > { %3384 = vmatpush3.bf16.msra.mxu0 %v4480_v53  ;;  %3292 = vmatpush3.bf16.msra.mxu1 %v3676_v25  ;;  %v3679_v53 = vld [vmem:[#allocation6 + $0x198] sm:$0xff]   ;;  %v4579_v25 = vld [vmem:[#allocation2 + $0x14] sm:$0x1]  ;;  %v2207_v62 = vor.u32 %v2206_v4, %v2203_v27  ;;  %v4606_v27 = vld [vmem:[#allocation2 + $0x3c] sm:$0x1] }
  0xf8   : > { %3385 = vmatprep.subr.bf16.mxu0 %v3675_v3  ;;  %3293 = vmatprep.subr.bf16.mxu1 %v3678_v23  ;;  %v2196_v44 = vshll.u32 %v4579_v25, 16 }
  0xf9   : > { %3379 = vmatprep.mubr.bf16.mxu0 %v3016_v34  ;;  %3303 = vmatprep.mubr.bf16.mxu1 %v2970_v48  ;;  %v1170_v48 = vsel %vm4501_vm12, %v2966_v52, %v1169_v57  ;;  %v2208_v17 = vrot.slane %v2207_v62, 4  ;;  %v2180_v52 = vld [vmem:[#allocation2 + $0x38] sm:$0xf]  ;;  %v2266_v62 = vshll.u32 %v4606_v27, 16 }
  0xfa   : > { %v2972_v30 = vcombine.low %v1170_v48, %v1174_v47  ;;  %v2260_v5 = vshll.u32 %v2180_v52, 16  ;;  %v4598_v47 = vld [vmem:[#allocation2 + $0x24] sm:$0x1] }
  0xfb   : > { %3386 = vmatpush3.bf16.msra.mxu0 %v3675_v3  ;;  %3294 = vmatpush3.bf16.msra.mxu1 %v3678_v23  ;;  %v2193_v3 = vor.u32 %v2192_v63, %v2189_v21  ;;  %v3710_v23 = vld [vmem:[#allocation2 + $0x8] ss:$8 sps:$4 sm:$0xff]   ;;  %v2224_v39 = vshll.u32 %v4598_v47, 16  ;;  %v2238_v21 = vshll.u32 %v4600_v41, 16  ;;  %v4604_v63 = vld [vmem:[#allocation2 + $0x34] sm:$0x1] }
  0xfc   : > { %3387 = vmatprep.subr.bf16.mxu0 %v3677_v16  ;;  %3295 = vmatprep.subr.bf16.mxu1 %v3680_v28 }
  0xfd   : > { %v2194_v34 = vrot.slane %v2193_v3, 4 }
  0xfe   : > { %3380 = vmatmul.mubr.bf16.gmra.mrb[4].mxu0 %v3017_v18 }
  0xff   : > { %3388 = vmatpush3.bf16.msra.mxu0 %v3677_v16  ;;  %3296 = vmatpush3.bf16.msra.mxu1 %v3680_v28  ;;  %v2198_v16 = vrot.slane %v2196_v44, 5  ;;  %v3700_v28 = vld [vmem:[#allocation6 + $0xe0] sm:$0xff]  }
 0x100   : > { %3389 = vmatprep.subr.bf16.mxu0 %v3679_v53  ;;  %3297 = vmatprep.subr.bf16.mxu1 %v3682_v46  ;;  %v4608_v44 = vld [vmem:[#allocation6 + $0x200] sm:$0xff]  }
 0x101   : > { %3399 = vmatprep.mubr.bf16.mxu0 %v3691_v42  ;;  %v2199_v18 = vsel %vm4316_vm9, %v2194_v34, %v2198_v16  ;;  %v2176_v42 = vld [vmem:[#allocation2 + $0x28] sm:$0xf] }
 0x102   : > { %v2229_v57 = vshrl.u32 %v2176_v42, 16  ;;  %v2232_v13 = vshll.u32 %v2176_v42, 16  ;;  %v3709_v34 = vld [vmem:[#allocation6 + $0x1f8] sm:$0xff]  }
 0x103   : > { %3390 = vmatpush3.bf16.msra.mxu0 %v3679_v53  ;;  %3298 = vmatpush3.bf16.msra.mxu1 %v3682_v46  ;;  %v2213_v53 = vsel %vm4316_vm9, %v2208_v17, %v2212_v7  ;;  %v2174_v46 = vld [vmem:[#allocation2 + $0x20] sm:$0xf]  ;;  %v4612_v17 = vld [vmem:[#allocation6 + $0x208] sm:$0xff]   ;;  %v4614_v7 = vld [vmem:[#allocation2 + $0x44] sm:$0x1] }
 0x104   : > { %3391 = vmatprep.subr.bf16.mxu0 %v3681_v49  ;;  %3299 = vmatprep.subr.bf16.mxu1 %v3685_v54  ;;  %v3038_v9 = vcombine.low %v2199_v18, %v2213_v53  ;;  %v2215_v58 = vshrl.u32 %v2174_v46, 16  ;;  %v2231_v14 = vrot.slane %v2229_v57, 4  ;;  %v2234_v11 = vrot.slane %v2232_v13, 5  ;;  %v2456_v53 = vld [vmem:[#allocation2 + $0x30] sm:$0xe] }
 0x105   : > { %v3054_v57 = vrot.slane %v2456_v53, 9  ;;  %v2494_v13 = vrot.slane %v4604_v63, 5  ;;  %v2490_v53 = vrot.slane %v4600_v41, 5 }
 0x106   : > { %v2217_v33 = vrot.slane %v2215_v58, 4  ;;  %v2235_v4 = vor.u32 %v2234_v11, %v2231_v14  ;;  %v4617_v58 = vld [vmem:[#allocation2 + $0x4c] sm:$0x1]  ;;  %v3716_v14 = vld [vmem:[#allocation6 + $0x210] sm:$0xff]   ;;  %v2452_v11 = vld [vmem:[#allocation2 + $0x10] sm:$0xe] }
 0x107   : > { %3392 = vmatpush3.bf16.msra.mxu0 %v3681_v49  ;;  %3300 = vmatpush3.bf16.msra.mxu1 %v3685_v54  ;;  %v3699_v49 = vld [vmem:[#allocation6 + $0x1d8] sm:$0xff]   ;;  %v3702_v54 = vld [vmem:[#allocation6 + $0xe8] sm:$0xff]  }
 0x108   : > { %3393 = vmatprep.subr.bf16.mxu0 %v3683_v2  ;;  %3301 = vmatprep.subr.bf16.mxu1 %v3688_v50  ;;  %v2236_v16 = vrot.slane %v2235_v4, 4  ;;  %v2482_v4 = vrot.slane %v4581_v40, 5 }
 0x10b   : > { %3394 = vmatpush3.bf16.msra.mxu0 %v3683_v2  ;;  %3302 = vmatpush3.bf16.msra.mxu1 %v3688_v50  ;;  %v2218_v2 = vshll.u32 %v2174_v46, 16  ;;  %v2178_v50 = vld [vmem:[#allocation2 + $0x30] sm:$0xf]  ;;  %v2457_v46 = vld [vmem:[#allocation2 + $0x38] sm:$0xe] }
 0x10c   : > { %3395 = vmatprep.subr.bf16.mxu0 %v3686_v6  ;;  %3311 = vmatprep.subr.bf16.mxu1 %v3690_v45  ;;  %v2243_v29 = vshrl.u32 %v2178_v50, 16  ;;  %v2246_v1 = vshll.u32 %v2178_v50, 16  ;;  %v3714_v50 = vld [vmem:[#allocation2 + $0x28] ss:$8 sps:$4 sm:$0xff]  }
 0x10d   : > { %v2220_v48 = vrot.slane %v2218_v2, 5 }
 0x10e   : > { %3304 = vmatmul.mubr.bf16.vlgmr.msra.gmra.mrb[0].mxu1 %v2971_v61  ;;  %v2973_v61 = vcombine.low %v1178_v8, %v1182_v37  ;;  %v2245_v24 = vrot.slane %v2243_v29, 4  ;;  %v2248_v19 = vrot.slane %v2246_v1, 5  ;;  %v2274_v8 = vshll.u32 %v2182_v12, 16 }
 0x10f   : > { %3396 = vmatpush3.bf16.msra.mxu0 %v3686_v6  ;;  %3312 = vmatpush3.bf16.msra.mxu1 %v3690_v45  ;;  %v3705_v6 = vld [vmem:[#allocation6 + $0xf0] sm:$0xff]   ;;  %v2257_v45 = vshrl.u32 %v2180_v52, 16  ;;  %v2285_v37 = vshrl.u32 %v2184_v0, 16  ;;  %v2280_v52 = vshll.u32 %v4614_v7, 16 }
 0x110   : > { %3397 = vmatprep.subr.bf16.mxu0 %v3689_v59  ;;  %3313 = vmatprep.subr.bf16.mxu1 %v3694_v22  ;;  %v2249_v43 = vor.u32 %v2248_v19, %v2245_v24  ;;  %v2495_v19 = vsel %vm4501_vm12, %v3054_v57, %v2494_v13 }
 0x111   : > { %3307 = vmatprep.mubr.bf16.mxu1 %v2972_v30  ;;  %v2221_v30 = vor.u32 %v2220_v48, %v2217_v33  ;;  %v2282_v24 = vrot.slane %v2280_v52, 5 }
 0x112   : > { %v2250_v42 = vrot.slane %v2249_v43, 4 }
 0x113   : > { %3398 = vmatpush3.bf16.msra.mxu0 %v3689_v59  ;;  %3314 = vmatpush3.bf16.msra.mxu1 %v3694_v22  ;;  %v2259_v59 = vrot.slane %v2257_v45, 4  ;;  %v2262_v22 = vrot.slane %v2260_v5, 5  ;;  %v2294_v5 = vshll.u32 %v4617_v58, 16 }
 0x114   : > { %3407 = vmatprep.subr.bf16.mxu0 %v3692_v35  ;;  %3315 = vmatprep.subr.bf16.mxu1 %v3696_v51 }
 0x115   : > { %v2263_v3 = vor.u32 %v2262_v22, %v2259_v59 }
 0x116   : > { %3400 = vmatmul.mubr.bf16.vlgmr.msra.gmra.mrb[0].mxu0 %v3693_v10  ;;  %3308 = vmatmul.mubr.bf16.gmra.mrb[4].mxu1 %v2973_v61  ;;  %v2288_v10 = vshll.u32 %v2184_v0, 16  ;;  %v2252_v61 = vshll.u32 %v4604_v63, 16  ;;  %v2478_v63 = vrot.slane %v4579_v25, 5 }
 0x117   : > { %3408 = vmatpush3.bf16.msra.mxu0 %v3692_v35  ;;  %3316 = vmatpush3.bf16.msra.mxu1 %v3696_v51  ;;  %v2271_v35 = vshrl.u32 %v2182_v12, 16  ;;  %v3707_v51 = vld [vmem:[#allocation6 + $0x1f0] sm:$0xff]  }
 0x118   : > { %3409 = vmatprep.subr.bf16.mxu0 %v3695_v15  ;;  %3317 = vmatprep.subr.bf16.mxu1 %v3698_v56  ;;  %v2290_v18 = vrot.slane %v2288_v10, 5  ;;  %v3715_v12 = vld [vmem:[#allocation2 + $0x38] ss:$8 sps:$4 sm:$0xff]  }
 0x119   : > { %3403 = vmatprep.mubr.bf16.mxu0 %v3704_v26  ;;  %3327 = vmatprep.mubr.bf16.mxu1 %v3710_v23  ;;  %v2226_v26 = vrot.slane %v2224_v39, 5  ;;  %v2240_v23 = vrot.slane %v2238_v21, 5  ;;  %v2296_v39 = vrot.slane %v2294_v5, 5  ;;  %v3050_v21 = vrot.slane %v2452_v11, 9 }
 0x11b   : > { %3410 = vmatpush3.bf16.msra.mxu0 %v3695_v15  ;;  %3318 = vmatpush3.bf16.msra.mxu1 %v3698_v56  ;;  %v3711_v15 = vld [vmem:[#allocation2 + $0x18] ss:$8 sps:$4 sm:$0xff]   ;;  %v2222_v56 = vrot.slane %v2221_v30, 4  ;;  %v2241_v29 = vsel %vm4316_vm9, %v2236_v16, %v2240_v23  ;;  %v2479_v25 = vsel %vm4501_vm12, %v3050_v21, %v2478_v63 }
 0x11c   : > { %3411 = vmatprep.subr.bf16.mxu0 %v3697_v38  ;;  %3319 = vmatprep.subr.bf16.mxu1 %v3700_v28  ;;  %v2454_v16 = vld [vmem:[#allocation2 + $0x20] sm:$0xe] }
 0x11d   : > { %v2227_v2 = vsel %vm4316_vm9, %v2222_v56, %v2226_v26  ;;  %v2506_v56 = vrot.slane %v4617_v58, 5 }
 0x11e   : > { %3404 = vmatmul.mubr.bf16.gmra.mrb[4].mxu0 %v3706_v36  ;;  %v2287_v36 = vrot.slane %v2285_v37, 4 }
 0x11f   : > { %3412 = vmatpush3.bf16.msra.mxu0 %v3697_v38  ;;  %3320 = vmatpush3.bf16.msra.mxu1 %v3700_v28  ;;  %v2273_v38 = vrot.slane %v2271_v35, 4  ;;  %v2276_v28 = vrot.slane %v2274_v8, 5  ;;  %v3717_v35 = vld [vmem:[#allocation6 + $0x218] sm:$0xff]  }
 0x120   : > { %3413 = vmatprep.subr.bf16.mxu0 %v3699_v49  ;;  %3321 = vmatprep.subr.bf16.mxu1 %v3702_v54  ;;  %v2291_v45 = vor.u32 %v2290_v18, %v2287_v36  ;;  %v2486_v36 = vrot.slane %v4598_v47, 5 }
 0x121   : > { %3423 = vmatprep.mubr.bf16.mxu0 %v3038_v9  ;;  %v2268_v9 = vrot.slane %v2266_v62, 5  ;;  %v2277_v1 = vor.u32 %v2276_v28, %v2273_v38  ;;  %v2459_v62 = vld [vmem:[#allocation2 + $0x48] sm:$0xe] }
 0x122   : > { %v2292_v30 = vrot.slane %v2291_v45, 4  ;;  %v3057_v23 = vrot.slane %v2459_v62, 9 }
 0x123   : > { %3414 = vmatpush3.bf16.msra.mxu0 %v3699_v49  ;;  %3322 = vmatpush3.bf16.msra.mxu1 %v3702_v54  ;;  %v2254_v49 = vrot.slane %v2252_v61, 5  ;;  %v2264_v54 = vrot.slane %v2263_v3, 4  ;;  %v2278_v0 = vrot.slane %v2277_v1, 4  ;;  %v3720_v61 = vld [vmem:[#allocation6 + $0x230] sm:$0xff]  }
 0x124   : > { %3415 = vmatprep.subr.bf16.mxu0 %v3701_v60  ;;  %3323 = vmatprep.subr.bf16.mxu1 %v3705_v6  ;;  %v2297_v10 = vsel %vm4316_vm9, %v2292_v30, %v2296_v39  ;;  %v2458_v3 = vld [vmem:[#allocation2 + $0x40] sm:$0xe]  ;;  %v2507_v28 = vsel %vm4501_vm12, %v3057_v23, %v2506_v56 }
 0x125   : > { %v2255_v33 = vsel %vm4316_vm9, %v2250_v42, %v2254_v49  ;;  %v2269_v48 = vsel %vm4316_vm9, %v2264_v54, %v2268_v9  ;;  %v2283_v37 = vsel %vm4316_vm9, %v2278_v0, %v2282_v24  ;;  %v3056_v26 = vrot.slane %v2458_v3, 9 }
 0x126   : > { %v3040_v22 = vcombine.low %v2255_v33, %v2269_v48 }
 0x127   : > { %3416 = vmatpush3.bf16.msra.mxu0 %v3701_v60  ;;  %3324 = vmatpush3.bf16.msra.mxu1 %v3705_v6  ;;  %v3055_v60 = vrot.slane %v2457_v46, 9  ;;  %v2498_v6 = vrot.slane %v4606_v27, 5 }
 0x128   : > { %3417 = vmatprep.subr.bf16.mxu0 %v3703_v31  ;;  %3325 = vmatprep.subr.bf16.mxu1 %v3708_v20 }
 0x129   : > { %v2499_v59 = vsel %vm4501_vm12, %v3055_v60, %v2498_v6 }
 0x12a   : > { %v3060_v8 = vcombine.low %v2495_v19, %v2499_v59 }
 0x12b   : > { %3418 = vmatpush3.bf16.msra.mxu0 %v3703_v31  ;;  %3326 = vmatpush3.bf16.msra.mxu1 %v3708_v20  ;;  %v2453_v31 = vld [vmem:[#allocation2 + $0x18] sm:$0xe]  ;;  %v3039_v20 = vcombine.low %v2227_v2, %v2241_v29 }
 0x12c   : > { %3419 = vmatprep.subr.bf16.mxu0 %v3707_v51  ;;  %3455 = vmatprep.subr.bf16.mxu1 %v4608_v44  ;;  %v3051_v27 = vrot.slane %v2453_v31, 9 }
 0x12e   : > { %3328 = vmatmul.mubr.bf16.vlgmr.msra.gmra.mrb[0].mxu1 %v3711_v15  ;;  %v2483_v40 = vsel %vm4501_vm12, %v3051_v27, %v2482_v4  ;;  %v2502_v15 = vrot.slane %v4614_v7, 5  ;;  %v3052_v7 = vrot.slane %v2454_v16, 9 }
 0x12f   : > { %3420 = vmatpush3.bf16.msra.mxu0 %v3707_v51  ;;  %3463 = vmatpush3.bf16.msra.mxu1 %v4608_v44  ;;  %v3718_v51 = vld [vmem:[#allocation6 + $0x220] sm:$0xff]   ;;  %v3058_v43 = vcombine.low %v2479_v25, %v2483_v40 }
 0x130   : > { %3421 = vmatprep.subr.bf16.mxu0 %v3709_v34  ;;  %3456 = vmatprep.subr.bf16.mxu1 %v4612_v17  ;;  %v2503_v38 = vsel %vm4501_vm12, %v3056_v26, %v2502_v15  ;;  %v2487_v42 = vsel %vm4501_vm12, %v3052_v7, %v2486_v36 }
 0x131   : > { %3331 = vmatprep.mubr.bf16.mxu1 %v3714_v50  ;;  %v3061_v46 = vcombine.low %v2503_v38, %v2507_v28 }
 0x133   : > { %3422 = vmatpush3.bf16.msra.mxu0 %v3709_v34  ;;  %3464 = vmatpush3.bf16.msra.mxu1 %v4612_v17  ;;  %v3721_v34 = vld [vmem:[#allocation6 + $0x238] sm:$0xff]  }
 0x134   : > { %3431 = vmatprep.subr.bf16.mxu0 %v4608_v44  ;;  %3457 = vmatprep.subr.bf16.mxu1 %v3716_v14 }
 0x136   : > { %3424 = vmatmul.mubr.bf16.vlgmr.msra.gmra.mrb[0].mxu0 %v3039_v20  ;;  %3332 = vmatmul.mubr.bf16.gmra.mrb[4].mxu1 %v3715_v12 }
 0x137   : > { %3432 = vmatpush3.bf16.msra.mxu0 %v4608_v44  ;;  %3427 = vmatprep.mubr.bf16.mxu0 %v3040_v22  ;;  %v3041_v44 = vcombine.low %v2283_v37, %v2297_v10 }
 0x138   : > { %3433 = vmatprep.subr.bf16.mxu0 %v4612_v17  ;;  %3465 = vmatpush3.bf16.msra.mxu1 %v3716_v14 }
 0x139   : > { %3458 = vmatprep.subr.bf16.mxu1 %v3717_v35  ;;  %3451 = vmatprep.mubr.bf16.mxu1 %v3060_v8 }
 0x13b   : > { %3434 = vmatpush3.bf16.msra.mxu0 %v4612_v17  ;;  %v2455_v17 = vld [vmem:[#allocation2 + $0x28] sm:$0xe] }
 0x13c   : > { %3435 = vmatprep.subr.bf16.mxu0 %v3716_v14  ;;  %3466 = vmatpush3.bf16.msra.mxu1 %v3717_v35  ;;  %v3053_v18 = vrot.slane %v2455_v17, 9 }
 0x13d   : > { %3459 = vmatprep.subr.bf16.mxu1 %v3718_v51 }
 0x13e   : > { %3428 = vmatmul.mubr.bf16.gmra.mrb[4].mxu0 %v3041_v44  ;;  %v2491_v49 = vsel %vm4501_vm12, %v3053_v18, %v2490_v53 }
 0x13f   : > { %3436 = vmatpush3.bf16.msra.mxu0 %v3716_v14  ;;  %3447 = vmatprep.mubr.bf16.mxu0 %v3058_v43  ;;  %v3059_v54 = vcombine.low %v2487_v42, %v2491_v49 }
 0x140   : > { %3437 = vmatprep.subr.bf16.mxu0 %v3717_v35  ;;  %3467 = vmatpush3.bf16.msra.mxu1 %v3718_v51 }
 0x141   : > { %3460 = vmatprep.subr.bf16.mxu1 %v3719_v55 }
 0x143   : > { %3438 = vmatpush3.bf16.msra.mxu0 %v3717_v35 }
 0x144   : > { %3439 = vmatprep.subr.bf16.mxu0 %v3718_v51  ;;  %3468 = vmatpush3.bf16.msra.mxu1 %v3719_v55 }
 0x145   : > { %3461 = vmatprep.subr.bf16.mxu1 %v3720_v61 }
 0x147   : > { %3440 = vmatpush3.bf16.msra.mxu0 %v3718_v51 }
 0x148   : > { %3441 = vmatprep.subr.bf16.mxu0 %v3719_v55  ;;  %3469 = vmatpush3.bf16.msra.mxu1 %v3720_v61 }
 0x149   : > { %3462 = vmatprep.subr.bf16.mxu1 %v3721_v34 }
 0x14b   : > { %3442 = vmatpush3.bf16.msra.mxu0 %v3719_v55 }
 0x14c   : > { %3443 = vmatprep.subr.bf16.mxu0 %v3720_v61  ;;  %3470 = vmatpush3.bf16.msra.mxu1 %v3721_v34 }
 0x14f   : > { %3444 = vmatpush3.bf16.msra.mxu0 %v3720_v61  ;;  %3452 = vmatmul.mubr.bf16.vlgmr.msra.gmra.mrb[8].mxu1 %v3061_v46 }
 0x150   : > { %3445 = vmatprep.subr.bf16.mxu0 %v3721_v34 }
 0x153   : > { %3446 = vmatpush3.bf16.msra.mxu0 %v3721_v34 }
 0x156   : > { %3448 = vmatmul.mubr.bf16.vlgmr.msra.gmra.mrb[0].mxu0 %v3059_v54 }
 0x201   : > { %v3329_v9 = vpop.f32.mrb[0].mxu1 }
 0x202   : > { %v1468_v47 = vpop.f32.mrb[1].mxu1 }
 0x203   : > { %v3330_v58 = vpop.f32.mrb[2].mxu1 }
 0x204   : > { %v1471_v2 = vpop.f32.mrb[3].mxu1 }
 0x209   : > { %v3333_v41 = vpop.f32.mrb[4].mxu1 }
 0x20a   : > { %v1484_v50 = vpop.f32.mrb[5].mxu1 }
 0x20b   : > { %v3334_v52 = vpop.f32.mrb[6].mxu1 }
 0x20c   : > { %v1487_v57 = vpop.f32.mrb[7].mxu1 }
 0x211   : > { %v3429_v13 = vpop.f32.mrb[4].mxu0 }
 0x212   : > { %v3475_v60 = vadd.f32 %v3429_v13, %v3333_v41  ;;  %v2429_v6 = vpop.f32.mrb[5].mxu0 }
 0x213   : > { %v3477_v29 = vadd.f32 %v2429_v6, %v1484_v50  ;;  %v3430_v32 = vpop.f32.mrb[6].mxu0 }
 0x214   : > { %v3479_v1 = vadd.f32 %v3430_v32, %v3334_v52  ;;  %v2432_v45 = vpop.f32.mrb[7].mxu0 }
 0x215   : > { %v3481_v5 = vadd.f32 %v2432_v45, %v1487_v57 }
 0x222   : > { %v3453_v33 = vpop.f32.mrb[8].mxu1 }
 0x223   : > { %v4664_v48 = vadd.f32 %v3475_v60, %v3453_v33  ;;  %v2639_v14 = vpop.f32.mrb[9].mxu1 }
 0x224   : > { %v4666_v11 = vadd.f32 %v3477_v29, %v2639_v14  ;;  %v3454_v31 = vpop.f32.mrb[10].mxu1 }
 0x225   : > { %v4668_v20 = vadd.f32 %v3479_v1, %v3454_v31  ;;  %v2642_v12 = vpop.f32.mrb[11].mxu1 }
 0x226   : > { %v4670_v24 = vadd.f32 %v3481_v5, %v2642_v12 }
 0x227   : > { %v3123_v19 = vpack.c.bf16 %v4668_v20, %v4664_v48 }
 0x228   : > { %v3118_v59 = vpack.c.bf16 %v4670_v24, %v4666_v11 }
 0x229   : > { %v3449_v22 = vpop.f32.mrb[0].mxu0  ;;  %3130 = vst [vmem:[%s302_s26 + $0x18] sm:$0xff] %v3123_v19  }
 0x22a   : > { %v3471_v0 = vadd.f32 %v3449_v22, %v3329_v9  ;;  %v2623_v30 = vpop.f32.mrb[1].mxu0  ;;  %3129 = vst [vmem:[%s302_s26 + $0x10] sm:$0xff] %v3118_v59  }
 0x22b   : > { %v3472_v39 = vadd.f32 %v2623_v30, %v1468_v47  ;;  %v3450_v21 = vpop.f32.mrb[2].mxu0 }
 0x22c   : > { %v3473_v63 = vadd.f32 %v3450_v21, %v3330_v58  ;;  %v2626_v27 = vpop.f32.mrb[3].mxu0  ;;  %v2678_v40 = vmul.f32 %v3471_v0, %v3471_v0 }
 0x22d   : > { %v3474_v4 = vadd.f32 %v2626_v27, %v1471_v2  ;;  %v2676_v8 = vmul.f32 %v3472_v39, %v3472_v39 }
 0x22e   : > { %v3113_v35 = vpack.c.bf16 %v3473_v63, %v3471_v0 }
 0x22f   : > { %v2662_v37 = vadd.f32 %v3474_v4, %v3472_v39  ;;  %v2677_v10 = vmul.f32 %v3474_v4, %v3474_v4  ;;  %v3108_v25 = vpack.c.bf16 %v3474_v4, %v3472_v39 }
 0x230   : > { %3128 = vst [vmem:[%s302_s26 + $0x8] sm:$0xff] %v3113_v35  }
 0x231   : > { %v2663_v51 = vadd.f32 %v3471_v0, %v2662_v37  ;;  %v2684_v44 = vadd.f32 %v2677_v10, %v2676_v8  ;;  %3109 = vst [vmem:[%s302_s26] sm:$0xff] %v3108_v25  }
 0x232   : > { %3849 = shalt.err (!%p3846_p0)
}
 0x233   : > { %s3850_s17 = scalar_lea.hbm %s4684_s27, 512  ;;  %s3854_s9 = scalar_lea.hbm %s4780_s4, 1024 }
 0x234   : > { %p3851_p4 = scmp.ne.s32.totalorder %s4684_s27, %s3850_s17  ;;  %p3855_p12 = scmp.lt.u32.totalorder %s4684_s27, %s4780_s4 }
 0x235   : > { %p3856_p1 = scmp.lt.u32.totalorder %s3854_s9, %s3850_s17  ;;  %p3858_p13 = scmp.lt.u32.totalorder %s3850_s17, %s4684_s27 }
 0x236   : > { %p3852_p2 = pnand %p3851_p4, %p4156_p10 }
 0x237   : > { %p3857_p11 = por %p3856_p1, %p3855_p12 }
 0x238   : > { %p3853_p8 = pneg %p3852_p2 }
 0x239   : > { %p3859_p6 = por %p3858_p13, %p3857_p11 }
 0x23b   : > { %p3860_p3 = pnand %p3859_p6, %p3853_p8 }
 0x23d   : > { %3863 = shalt.err (!%p3860_p3)
}
 0x23e   : > { %s3968_s30 = smov 64   ;;  %s3969_s11 = smov 4   ;;  %v2679_v43 = vmul.f32 %v3473_v63, %v3473_v63  ;;  %v2685_v55 = vadd.f32 %v2684_v44, %v2678_v40  ;;  %v2664_v61 = vadd.f32 %v3473_v63, %v2663_v51  ;;  %v2680_v3 = vmul.f32 %v4666_v11, %v4666_v11 }
 0x23f   : > { %3549 = dma.vmem_to_hbm [thread:$0]  (%p4156_p10), %s4679_s28, 512, %s4684_s27, %s2715_s10, %s3968_s30, %s3968_s30, %s3969_s11   ;;  %v2681_v26 = vmul.f32 %v4670_v24, %v4670_v24  ;;  %v2682_v34 = vmul.f32 %v4664_v48, %v4664_v48  ;;  %v2683_v38 = vmul.f32 %v4668_v20, %v4668_v20 }
 0x240   : > { %v2665_v62 = vadd.f32 %v4666_v11, %v2664_v61  ;;  %v2686_v15 = vadd.f32 %v2685_v55, %v2679_v43  ;;  %s2919_s28 = sshll.u32 %s4217_s24, 1  ;;  %s3074_s13 = sshll.u32 %s3950_s21, 5 }
 0x241   : > { %s309_s27 = scalar_lea.vmem [#allocation12], %s2919_s28  ;;  %s4727_s16 = scalar_lea.hbm %s4781_s5, %s3074_s13 }
 0x242   : > { %v2666_v56 = vadd.f32 %v4670_v24, %v2665_v62  ;;  %v2687_v23 = vadd.f32 %v2686_v15, %v2680_v3  ;;  %s2752_s10 = sshll.u32 %s309_s27, 4  ;;  %s2720_s14 = scalar_lea.sflag [#allocation13], %s4217_s24  ;;  %s4729_s10 = int_to_ptr.vmem [resolvable:$true] %s2752_s10 }
 0x243   : > { %s3864_s17 = scalar_lea.vmem %s4729_s10, 32  ;;  %s3970_s21 = smov [#allocation12]  }
 0x244   : > { %v2667_v16 = vadd.f32 %v4664_v48, %v2666_v56  ;;  %v2688_v17 = vadd.f32 %v2687_v23, %v2681_v26  ;;  %p3865_p5 = scmp.ne.s32.totalorder %s4729_s10, %s3864_s17  ;;  %s3868_s12 = sshll.u32 %s3970_s21, 4  ;;  %s3869_s12 = int_to_ptr.vmem [resolvable:$false] %s3868_s12 }
 0x245   : > { %s3870_s25 = scalar_lea.vmem %s3869_s12, 64  ;;  %p3871_p0 = scmp.lt.s32.totalorder %s4729_s10, %s3869_s12 }
 0x246   : > { %v2668_v28 = vadd.f32 %v4668_v20, %v2667_v16  ;;  %v2689_v7 = vadd.f32 %v2688_v17, %v2682_v34  ;;  %p3866_p7 = pnand %p3865_p5, %p4156_p10  ;;  %p3872_p4 = scmp.lt.s32.totalorder %s3870_s25, %s3864_s17 }
 0x248   : > { %v2669_v36 = vrot.slane %v2668_v28, 4  ;;  %v2690_v18 = vadd.f32 %v2689_v7, %v2683_v38  ;;  %p3867_p9 = pneg %p3866_p7  ;;  %p3873_p2 = por %p3872_p4, %p3871_p0 }
 0x24a   : > { %v2670_v53 = vadd.f32 %v2669_v36, %v2668_v28  ;;  %v2691_v46 = vrot.slane %v2690_v18, 4  ;;  %p3874_p8 = pnand %p3873_p2, %p3867_p9 }
 0x24c   : > { %v2671_v42 = vrot.slane %v2670_v53, 2  ;;  %v2692_v49 = vadd.f32 %v2691_v46, %v2690_v18 }
 0x24e   : > { %v2672_v54 = vadd.f32 %v2671_v42, %v2670_v53  ;;  %v2693_v9 = vrot.slane %v2692_v49, 2 }
 0x250   : > { %v2673_v47 = vrot.slane %v2672_v54, 1  ;;  %v2694_v58 = vadd.f32 %v2693_v9, %v2692_v49 }
 0x252   : > { %v2674_v2 = vadd.f32 %v2673_v47, %v2672_v54  ;;  %v2695_v41 = vrot.slane %v2694_v58, 1 }
 0x254   : > { %2675 = vst [vmem:[%s309_s27] sm:$0x1] %v2674_v2  ;;  %v2696_v50 = vadd.f32 %v2695_v41, %v2694_v58 }
 0x256   : > { %2697 = vst [vmem:[%s309_s27 + $0x1] sm:$0x1] %v2696_v50 }
 0x257   : > { %3877 = shalt.err (!%p3874_p8)
}
 0x258   : > { %s3878_s24 = scalar_lea.hbm %s4727_s16, 32  ;;  %s3882_s26 = scalar_lea.hbm %s4781_s5, 64 }
 0x259   : > { %p3879_p12 = scmp.ne.s32.totalorder %s4727_s16, %s3878_s24  ;;  %p3883_p13 = scmp.lt.u32.totalorder %s4727_s16, %s4781_s5 }
 0x25a   : > { %p3884_p6 = scmp.lt.u32.totalorder %s3882_s26, %s3878_s24  ;;  %p3886_p5 = scmp.lt.u32.totalorder %s3878_s24, %s4727_s16 }
 0x25b   : > { %p3880_p1 = pnand %p3879_p12, %p4156_p10 }
 0x25c   : > { %p3885_p3 = por %p3884_p6, %p3883_p13 }
 0x25d   : > { %p3881_p11 = pneg %p3880_p1 }
 0x25e   : > { %p3887_p7 = por %p3886_p5, %p3885_p3 }
 0x260   : > { %p3888_p9 = pnand %p3887_p7, %p3881_p11 }
 0x262   : > { %3891 = shalt.err (!%p3888_p9)
}
 0x263   : > { %3550 = dma.vmem_to_hbm [thread:$0]  (%p4156_p10), %s4729_s10, 32, %s4727_s16, %s2720_s14  }
 0x264 PF: > { %s4813_s28 = sld [smem:[#allocation19_spill]]  ;;  %s4814_s13 = sld [smem:[#allocation20_spill]] }
 0x265   : > { %p4816_p4 = scmp.ge.s32.totalorder %s3958_s23, 2 }
 0x26a   : > { %s2764_s27 = sand.u32 1, %s4813_s28   ;;  %p4815_p0 = scmp.ne.s32.totalorder %s4814_s13, 0 }
 0x26b   : > { %s2765_s29 = scalar_lea.sflag [#allocation5], %s2764_s27 }
 0x26c   : > { %p3568_p2 = pnand %p4816_p4, %p4815_p0 }
 0x26e   : > { %3929 = dma.done.wait (!%p3568_p2), %s2765_s29, 512  }
 0x26f   : > { %3931 = vsyncadd (!%p3568_p2), %s2765_s29, 4294966784  ;;  %s2774_s7 = scalar_lea.sflag [#allocation13], %s2764_s27 }
 0x270   : > { %3933 = dma.done.wait (!%p3568_p2), %s2774_s7, 32  }
 0x271   : > { %3935 = vsyncadd (!%p3568_p2), %s2774_s7, 4294967264  ;;  %s27_s23 = sadd.s32 1, %s3958_s23   ;;  %s4817_s18 = smov %s3942_s19 }
 0x272   : > { %p24_p8 = scmp.ge.s32.totalorder %s27_s23, 4   ;;  %s4818_s19 = smov %s3946_s20 }
 0x273   : > { %s4819_s20 = smov %s4168_s6  ;;  %s4820_s21 = smov %s3954_s22 }
 0x274   : > { %s4821_s22 = smov %s4823_s15  ;;  %26 = sbr.rel (!%p24_p8) target bundleno = 10 (0xa), region = 132 }
 0x27b   :  { %2779 = vsyncpa [#allocation4], 1 }
 0x27c   :  { %2781 = vsyncpa [#allocation4 + $0x1], 1 }
 0x27d   :  { %2782 = vsyncpa [#allocation7], 1 }
 0x27e   :  { %2783 = vsyncpa [#allocation10], 1 }
 0x27f   :  { %2784 = vsyncpa [#allocation5], 1 }
 0x280   :  { %2786 = vsyncpa [#allocation5 + $0x1], 1 }
 0x281   :  { %2787 = vsyncpa [#allocation13], 1 }
 0x282   :  { %2789 = vsyncpa [#allocation13 + $0x1], 1 }

// kernel: down_forward.2
= control target key start
LH: loop header
LB: loop body
LE: loop exit
PB: predicated region body
PF: predicated region fallthrough
CT: control target
= control target key end

     0   :  { %11 = vsyncpa [#allocation4], 0  ;;  %s4586_s0 = inlined_call_operand.hbm [shape: bf16[2,8,8,128], index: 0, kind: input, shape index: {}]   ;;  %s4587_s1 = inlined_call_operand.hbm [shape: bf16[9,128,128], index: 1, kind: input, shape index: {}]   ;;  %s4588_s2 = inlined_call_operand.hbm [shape: f32[1,1,128], index: 2, kind: input, shape index: {}]   ;;  %s4589_s3 = inlined_call_operand.hbm [shape: f32[1,1,128], index: 3, kind: input, shape index: {}]   ;;  %s4590_s4 = inlined_call_operand.hbm [shape: bf16[2,8,8,128], index: 4, kind: output, shape index: {0}]   ;;  %s4591_s5 = inlined_call_operand.hbm [shape: f32[2,1,2,128], index: 5, kind: output, shape index: {1}]  }
   0x1   :  { %13 = vsyncpa [#allocation4 + $0x1], 0 }
   0x2   :  { %14 = vsyncpa [#allocation7], 0 }
   0x3   :  { %15 = vsyncpa [#allocation10], 0 }
   0x4   :  { %16 = vsyncpa [#allocation5], 0 }
   0x5   :  { %18 = vsyncpa [#allocation5 + $0x1], 0 }
   0x6   :  { %19 = vsyncpa [#allocation13], 0 }
   0x7   :  { %21 = vsyncpa [#allocation13 + $0x1], 0  ;;  %s3834_s18 = smov 0   ;;  %s3836_s19 = smov 0  }
   0x8   :  { %s3838_s20 = smov 0   ;;  %s3840_s21 = smov 0  }
   0x9   :  { %s3842_s22 = smov 0   ;;  %s3844_s23 = smov 0  }
   0xa LB: > { %4598 = sst [smem:[#allocation19_spill]] %s3771_s18  ;;  %s2781_s24 = sadd.s32 4294967295, %s3791_s23   ;;  %s3791_s23 = sphi %s3844_s23, %s27_s23   ;;  %s3787_s22 = sphi %s3842_s22, %s4631_s22   ;;  %s3783_s21 = sphi %s3840_s21, %s4630_s21   ;;  %s3779_s20 = sphi %s3838_s20, %s4629_s20   ;;  %s3775_s19 = sphi %s3836_s19, %s4628_s19   ;;  %s3771_s18 = sphi %s3834_s18, %s4627_s18  }
   0xb   : > { %s2782_s25 = sadd.s32 4294967294, %s3791_s23   ;;  %p59_p0 = scmp.ne.s32.totalorder %s3775_s19, %s3771_s18 }
   0xc   : > { %p3868_p1 = scmp.eq.s32.totalorder %s2781_s24, 0  ;;  %p3872_p2 = scmp.eq.s32.totalorder %s2781_s24, 1 }
   0xd   : > { %p154_p3 = scmp.eq.s32.totalorder %s2782_s25, 1  ;;  %p2783_p5 = scmp.ge.s32.totalorder %s3791_s23, 1 }
   0xe   : > { %s4599_s26 = scalar_select %p3868_p1, 1, 0 }
   0xf   : > { %s4600_s27 = scalar_select %p3872_p2, 1, 0 }
  0x10   : > { %p3878_p4 = por %p3868_p1, %p59_p0  ;;  %p3883_p6 = por %p154_p3, %p59_p0 }
  0x11   : > { %p189_p7 = scmp.lt.s32.totalorder %s3791_s23, 3  ;;  %s3793_s6 = smov [#allocation6]  }
  0x12   : > { %s4601_s28 = scalar_select %p3878_p4, 1, 0 }
  0x13   : > { %s4602_s29 = scalar_select %p3883_p6, 1, 0 }
  0x14   : > { %p3888_p8 = pnand %p2783_p5, %p189_p7  ;;  %s201_s7 = sshll.u32 %s3793_s6, 4  ;;  %s3892_s7 = int_to_ptr.vmem [resolvable:$true] %s201_s7 }
  0x15   : > { %4603 = sst [smem:[#allocation20_spill]] %s4602_s29  ;;  %s3794_s9 = smov [#allocation8]  }
  0x16   : > { %s4604_s30 = scalar_select %p3888_p8, 1, 0 }
  0x17   : > { %p3386_p9 = pneg %p3888_p8  ;;  %s215_s10 = sshll.u32 %s3794_s9, 4  ;;  %s3903_s10 = int_to_ptr.vmem [resolvable:$true] %s215_s10 }
  0x18   : > { %s3795_s11 = smov [#allocation9]   ;;  %s3555_s15 = scalar_lea.hbm %s4587_s1, 9216 }
  0x19   : > { %p3899_p11 = pnand %p3386_p9, %p3868_p1  ;;  %s3905_s12 = sshll.u32 %s3795_s11, 4  ;;  %s227_s12 = int_to_ptr.vmem [resolvable:$true] %s3905_s12 }
  0x1a   : > { %p3556_p12 = scmp.ne.s32.totalorder %s4587_s1, %s3555_s15  ;;  %p3562_p5 = scmp.lt.u32.totalorder %s3555_s15, %s4587_s1 }
  0x1b   : > { %p3915_p13 = pneg %p3899_p11 }
  0x1d   : > { %p3558_p0 = pnand %p3915_p13, %p3556_p12 }
  0x1f   : > { %p3559_p3 = pneg %p3558_p0 }
  0x21   : > { %p3564_p7 = pnand %p3562_p5, %p3559_p3 }
  0x23   : > { %3567 = shalt.err (!%p3564_p7)
}
  0x24   : > { %s3568_s9 = scalar_lea.vmem %s3892_s7, 9216  ;;  %p3576_p1 = scmp.lt.s32.totalorder %s3892_s7, %s3892_s7 }
  0x25   : > { %p3569_p9 = scmp.ne.s32.totalorder %s3892_s7, %s3568_s9  ;;  %p3577_p4 = scmp.lt.s32.totalorder %s3568_s9, %s3568_s9 }
  0x27   : > { %p3571_p10 = pnand %p3569_p9, %p3915_p13  ;;  %p3578_p12 = por %p3577_p4, %p3576_p1 }
  0x29   : > { %p3572_p6 = pneg %p3571_p10 }
  0x2b   : > { %p3579_p0 = pnand %p3578_p12, %p3572_p6 }
  0x2d   : > { %3582 = shalt.err (!%p3579_p0)
}
  0x2e   : > { %s3796_s11 = smov 64   ;;  %s3797_s13 = smov 4  }
  0x2f   : > { %3389 = dma.hbm_to_vmem [thread:$0]  (!%p3899_p11), %s4587_s1, 9216, %s3892_s7, [#allocation7], %s3796_s11, %s3796_s11, %s3797_s13  }
  0x30   : > { %s3583_s25 = scalar_lea.hbm %s4588_s2, 16 }
  0x31   : > { %p3584_p1 = scmp.ne.s32.totalorder %s4588_s2, %s3583_s25  ;;  %p3590_p10 = scmp.lt.u32.totalorder %s3583_s25, %s4588_s2 }
  0x33   : > { %p3586_p4 = pnand %p3584_p1, %p3915_p13 }
  0x35   : > { %p3587_p6 = pneg %p3586_p4 }
  0x37   : > { %p3592_p3 = pnand %p3590_p10, %p3587_p6 }
  0x39   : > { %3595 = shalt.err (!%p3592_p3)
}
  0x3a   : > { %s3596_s7 = scalar_lea.vmem %s3903_s10, 16  ;;  %s3603_s14 = scalar_lea.vmem %s3903_s10, 32 }
  0x3b   : > { %p3597_p5 = scmp.ne.s32.totalorder %s3903_s10, %s3596_s7  ;;  %p3604_p12 = scmp.lt.s32.totalorder %s3903_s10, %s3903_s10 }
  0x3c   : > { %p3605_p0 = scmp.lt.s32.totalorder %s3603_s14, %s3596_s7 }
  0x3d   : > { %p3599_p7 = pnand %p3597_p5, %p3915_p13 }
  0x3e   : > { %p3606_p1 = por %p3605_p0, %p3604_p12 }
  0x3f   : > { %p3600_p9 = pneg %p3599_p7 }
  0x41   : > { %p3607_p4 = pnand %p3606_p1, %p3600_p9 }
  0x43   : > { %3610 = shalt.err (!%p3607_p4)
}
  0x44   : > { %3392 = dma.hbm_to_vmem [thread:$0]  (!%p3899_p11), %s4588_s2, 16, %s3903_s10, [#allocation7]  }
  0x45   : > { %s3611_s17 = scalar_lea.hbm %s4589_s3, 16 }
  0x46   : > { %p3612_p6 = scmp.ne.s32.totalorder %s4589_s3, %s3611_s17  ;;  %p3618_p5 = scmp.lt.u32.totalorder %s3611_s17, %s4589_s3 }
  0x48   : > { %p3614_p10 = pnand %p3612_p6, %p3915_p13 }
  0x4a   : > { %p3615_p3 = pneg %p3614_p10 }
  0x4c   : > { %p3620_p7 = pnand %p3618_p5, %p3615_p3 }
  0x4e   : > { %3623 = shalt.err (!%p3620_p7)
}
  0x4f   : > { %s3624_s14 = scalar_lea.vmem %s227_s12, 16  ;;  %s3631_s10 = scalar_lea.vmem %s227_s12, 32 }
  0x50   : > { %p3625_p9 = scmp.ne.s32.totalorder %s227_s12, %s3624_s14  ;;  %p3632_p1 = scmp.lt.s32.totalorder %s227_s12, %s227_s12 }
  0x51   : > { %p3633_p4 = scmp.lt.s32.totalorder %s3631_s10, %s3624_s14 }
  0x52   : > { %p3627_p12 = pnand %p3625_p9, %p3915_p13 }
  0x53   : > { %p3634_p8 = por %p3633_p4, %p3632_p1 }
  0x54   : > { %p3628_p0 = pneg %p3627_p12 }
  0x56   : > { %p3635_p2 = pnand %p3634_p8, %p3628_p0 }
  0x58   : > { %3638 = shalt.err (!%p3635_p2)
}
  0x59   : > { %3395 = dma.hbm_to_vmem [thread:$0]  (!%p3899_p11), %s4589_s3, 16, %s227_s12, [#allocation10]  }
  0x5a   : > { %s46_s24 = sadd.s32 1, %s3779_s20  ;;  %s39_s15 = sadd.s32 1, %s3787_s22 }
  0x5b   : > { %p53_p2 = scmp.ne.s32.totalorder %s3779_s20, %s3775_s19  ;;  %p41_p8 = scmp.ge.s32.totalorder %s39_s15, 2 }
  0x5c   : > { %p54_p13 = scmp.eq.s32.totalorder %s3791_s23, 0  ;;  %p4607_p6 = scmp.ne.s32.totalorder %s4600_s27, 0 }
  0x5d   : > { %p3410_p3 = scmp.lt.s32.totalorder %s3791_s23, 2  ;;  %s4633_s15 = smov (%p41_p8, %s39_s15), 0 }
  0x5e   : > { %p3989_p10 = por %p4607_p6, %p53_p2  ;;  %p55_p5 = por %p54_p13, %p53_p2 }
  0x5f   : > { %s237_s16 = sand.u32 1, %s3779_s20   ;;  %s43_s17 = ssub.s32 %s3787_s22, %s4633_s15 }
  0x60   : > { %p44_p7 = scmp.eq.s32.totalorder %s43_s17, 0  ;;  %s2788_s12 = sshll.u32 %s237_s16, 5 }
  0x61   : > { %s2939_s25 = sshll.u32 %s3787_s22, 9  ;;  %s241_s14 = scalar_lea.vmem [#allocation3], %s2788_s12 }
  0x62   : > { %s4001_s6 = scalar_select %p44_p7, %s3779_s20, %s46_s24  }
  0x63   : > { %s4006_s27 = scalar_lea.hbm %s4586_s0, %s2939_s25  ;;  %s248_s10 = sshll.u32 %s241_s14, 4  ;;  %s4008_s10 = int_to_ptr.vmem [resolvable:$true] %s248_s10 }
  0x64   : > { %p4012_p11 = pnand %p3410_p3, %p55_p5  ;;  %s4016_s29 = scalar_lea.sflag [#allocation4], %s237_s16 }
  0x65   : > { %s3639_s24 = scalar_lea.hbm %s4006_s27, 512  ;;  %s3644_s25 = scalar_lea.hbm %s4586_s0, 1024 }
  0x66   : > { %p3640_p9 = scmp.ne.s32.totalorder %s4006_s27, %s3639_s24  ;;  %p3641_p12 = pneg %p4012_p11 }
  0x67   : > { %p3645_p4 = scmp.lt.u32.totalorder %s4006_s27, %s4586_s0  ;;  %p3646_p2 = scmp.lt.u32.totalorder %s3644_s25, %s3639_s24 }
  0x68   : > { %p3642_p0 = pnand %p3641_p12, %p3640_p9  ;;  %p3648_p13 = scmp.lt.u32.totalorder %s3639_s24, %s4006_s27 }
  0x69   : > { %p3647_p8 = por %p3646_p2, %p3645_p4 }
  0x6a   : > { %p3643_p1 = pneg %p3642_p0 }
  0x6b   : > { %p3649_p6 = por %p3648_p13, %p3647_p8 }
  0x6d   : > { %p3650_p3 = pnand %p3649_p6, %p3643_p1 }
  0x6f   : > { %3653 = shalt.err (!%p3650_p3)
}
  0x70   : > { %s3654_s16 = scalar_lea.vmem %s4008_s10, 512  ;;  %s3798_s14 = smov [#allocation3]  }
  0x71   : > { %p3655_p5 = scmp.ne.s32.totalorder %s4008_s10, %s3654_s16  ;;  %s3659_s17 = sshll.u32 %s3798_s14, 4  ;;  %s3660_s17 = int_to_ptr.vmem [resolvable:$false] %s3659_s17 }
  0x72   : > { %s3661_s12 = scalar_lea.vmem %s3660_s17, 1024  ;;  %p3662_p0 = scmp.lt.s32.totalorder %s4008_s10, %s3660_s17 }
  0x73   : > { %p3657_p7 = pnand %p3655_p5, %p3641_p12  ;;  %p3663_p4 = scmp.lt.s32.totalorder %s3661_s12, %s3654_s16 }
  0x75   : > { %p3658_p9 = pneg %p3657_p7  ;;  %p3664_p2 = por %p3663_p4, %p3662_p0 }
  0x77   : > { %p3665_p8 = pnand %p3664_p2, %p3658_p9 }
  0x79   : > { %3668 = shalt.err (!%p3665_p8)
}
  0x7a   : > { %3399 = dma.hbm_to_vmem [thread:$0]  (!%p4012_p11), %s4006_s27, 512, %s4008_s10, %s4016_s29, %s3796_s11, %s3796_s11, %s3797_s13  }
  0x7b   : > { %p4610_p12 = scmp.ne.s32.totalorder %s4604_s30, 0 }
  0x7c   : > { %s4050_s24 = sand.u32 (!%p4610_p12), 1, %s3775_s19   ;;  %p4611_p1 = scmp.ne.s32.totalorder (!%p4610_p12), %s4601_s28, 0 }
  0x7d   : > { %260 = sbr.rel (%p4610_p12) target bundleno = 600 (0x258), region = 36  ;;  %s2792_s25 = sshll.u32 (!%p4610_p12), %s4050_s24, 5 }
  0x7e   : > { %s263_s9 = scalar_lea.sflag (!%p4610_p12), [#allocation4], %s4050_s24  ;;  %s4056_s18 = scalar_lea.vmem (!%p4610_p12), [#allocation3], %s2792_s25 }
  0x84   : > { %3750 = dma.done.wait (%p4611_p1), %s263_s9, 512  }
  0x85   : > { %3752 = vsyncadd (%p4611_p1), %s263_s9, 4294966784  ;;  %p4612_p11 = scmp.ne.s32.totalorder %s4599_s26, 0 }
  0x87   : > { %3754 = dma.done.wait (%p4612_p11), [#allocation7], 9232  }
  0x88   : > { %3756 = vsyncadd (%p4612_p11), [#allocation7], 4294958064 }
  0x89   : > { %3758 = dma.done.wait (%p4612_p11), [#allocation10], 16  }
  0x8a   : > { %3760 = vsyncadd (%p4612_p11), [#allocation10], 4294967280  ;;  %v3799_v0 = vmov 0   ;;  %v3471_v1 = vld [vmem:[#allocation6 + $0x40] sm:$0xff]   ;;  %v3473_v3 = vld [vmem:[#allocation6 + $0x48] sm:$0xff]   ;;  %vm318_vm1 = vcmask 1040384  }
  0x8b   : > { %313 = vst [vmem:[#allocation2] sm:$0xf] %v3799_v0  ;;  %314 = vst [vmem:[#allocation2 + $0x4] sm:$0x1] %v3799_v0  ;;  %v3472_v2 = vld [vmem:[#allocation6 + $0x100] sm:$0xff]   ;;  %3072 = vmatprep.subr.bf16.mxu1 %v3471_v1  ;;  %v3474_v4 = vld [vmem:[#allocation6 + $0x108] sm:$0xff]  }
  0x8c   : > { %316 = vst [vmem:[#allocation2 + $0x48] sm:$0xf] %v3799_v0  ;;  %317 = vst [vmem:[#allocation2 + $0x4c] sm:$0x1] %v3799_v0  ;;  %3168 = vmatprep.subr.bf16.mxu0 %v3472_v2  ;;  %3073 = vmatpush3.bf16.msra.mxu1 %v3471_v1  ;;  %v3475_v5 = vld [vmem:[#allocation6 + $0x50] sm:$0xff]   ;;  %v3477_v7 = vld [vmem:[#allocation6 + $0x58] sm:$0xff]  }
  0x8d   : > { %3169 = vmatpush3.bf16.msra.mxu0 %v3472_v2  ;;  %3074 = vmatprep.subr.bf16.mxu1 %v3473_v3  ;;  %v3476_v6 = vld [vmem:[#allocation6 + $0x110] sm:$0xff]   ;;  %vm319_vm0 = vsmask.f32 256  ;;  %v3478_v8 = vld [vmem:[#allocation6 + $0x118] sm:$0xff]   ;;  %vm351_vm3 = vsmask.f32 7938 }
  0x8e   : > { %3170 = vmatprep.subr.bf16.mxu0 %v3474_v4  ;;  %vm4070_vm2 = vmand %vm318_vm1, %vm319_vm0  ;;  %v3479_v10 = vld [vmem:[#allocation6 + $0x60] sm:$0xff]   ;;  %v3481_v13 = vld [vmem:[#allocation6 + $0x68] sm:$0xff]   ;;  %vm474_vm5 = vcmask 1043456   ;;  %vm604_vm7 = vsmask.f32 3328  ;;  %vm1026_vm10 = vcmask 1042432  }
  0x8f   : > { %v3480_v11 = vld [vmem:[#allocation6 + $0x120] sm:$0xff]   ;;  %vm4075_vm4 = vmand %vm318_vm1, %vm351_vm3  ;;  %v324_v15 = vld [vmem:[#allocation2 + $0x8] sm:$0x1]  ;;  %vm605_vm8 = vsmask.f32 7440  ;;  %vm1027_vm11 = vcmask 1046532  }
  0x90   : > { %3075 = vmatpush3.bf16.msra.mxu1 %v3473_v3  ;;  %v3482_v17 = vld [vmem:[#allocation6 + $0x128] sm:$0xff]   ;;  %v325_v19 = vsel %vm4070_vm2, 0, %v324_v15  ;;  %v356_v21 = vld [vmem:[#allocation2 + $0xc] sm:$0x1]  ;;  %v3483_v22 = vld [vmem:[#allocation6 + $0x70] sm:$0xff]   ;;  %s302_s26 = scalar_lea.vmem [#allocation11], %s2792_s25 }
  0x91   : > { %3171 = vmatpush3.bf16.msra.mxu0 %v3474_v4  ;;  %3076 = vmatprep.subr.bf16.mxu1 %v3475_v5  ;;  %326 = vst [vmem:[#allocation2 + $0x8] sm:$0x1] %v325_v19  ;;  %v357_v23 = vsel %vm4075_vm4, 0, %v356_v21  ;;  %v385_v24 = vld [vmem:[%s4056_s18] sm:$0xf]  ;;  %v3484_v28 = vld [vmem:[#allocation6 + $0x130] sm:$0xff]   ;;  %vm4095_vm6 = vmand %vm474_vm5, %vm351_vm3 }
  0x92   : > { %3172 = vmatprep.subr.bf16.mxu0 %v3476_v6  ;;  %v321_v14 = vld [vmem:[#allocation2] sm:$0x1]  ;;  %v353_v16 = vld [vmem:[#allocation2 + $0x4] sm:$0x1]  ;;  %358 = vst [vmem:[#allocation2 + $0xc] sm:$0x1] %v357_v23  ;;  %vm4142_vm9 = vmor %vm604_vm7, %vm605_vm8 }
  0x93   : > { %v322_v18 = vsel %vm4070_vm2, 0, %v321_v14  ;;  %v354_v20 = vsel %vm4075_vm4, 0, %v353_v16  ;;  %v394_v25 = vshrl.u32 %v385_v24, 16  ;;  %v397_v26 = vshll.u32 %v385_v24, 16  ;;  %v327_v27 = vld [vmem:[#allocation2 + $0x10] sm:$0x1]  ;;  %vm4322_vm12 = vmor %vm1026_vm10, %vm1027_vm11 }
  0x94   : > { %3077 = vmatpush3.bf16.msra.mxu1 %v3475_v5  ;;  %323 = vst [vmem:[#allocation2] sm:$0x1] %v322_v18  ;;  %355 = vst [vmem:[#allocation2 + $0x4] sm:$0x1] %v354_v20  ;;  %v328_v29 = vsel %vm4070_vm2, 0, %v327_v27  ;;  %v3485_v38 = vld [vmem:[#allocation6 + $0x78] sm:$0xff]  }
  0x95   : > { %3173 = vmatpush3.bf16.msra.mxu0 %v3476_v6  ;;  %3078 = vmatprep.subr.bf16.mxu1 %v3477_v7  ;;  %v359_v30 = vld [vmem:[#allocation2 + $0x14] sm:$0x1]  ;;  %v396_v32 = vrot.slane %v394_v25, 7  ;;  %329 = vst [vmem:[#allocation2 + $0x10] sm:$0x1] %v328_v29  ;;  %v3486_v45 = vld [vmem:[#allocation6 + $0x138] sm:$0xff]  }
  0x96   : > { %3174 = vmatprep.subr.bf16.mxu0 %v3478_v8  ;;  %v386_v31 = vld [vmem:[%s4056_s18 + $0x4] sm:$0xf]  ;;  %v360_v33 = vsel %vm4075_vm4, 0, %v359_v30  ;;  %v330_v36 = vld [vmem:[#allocation2 + $0x18] sm:$0x1]  ;;  %s2613_s28 = sshll.u32 %s302_s26, 4  ;;  %s4489_s28 = int_to_ptr.vmem [resolvable:$true] %s2613_s28 }
  0x97   : > { %v402_v34 = vshrl.u32 %v386_v31, 16  ;;  %v405_v35 = vshll.u32 %v386_v31, 16  ;;  %361 = vst [vmem:[#allocation2 + $0x14] sm:$0x1] %v360_v33  ;;  %v362_v37 = vld [vmem:[#allocation2 + $0x1c] sm:$0x1]  ;;  %v399_v39 = vor.u32 %v397_v26, %v396_v32 }
  0x98   : > { %3079 = vmatpush3.bf16.msra.mxu1 %v3477_v7  ;;  %v400_v40 = vrot.slane %v396_v32, 4  ;;  %v331_v43 = vsel %vm4070_vm2, 0, %v330_v36  ;;  %v387_v44 = vld [vmem:[%s4056_s18 + $0x8] sm:$0xf]  ;;  %v363_v46 = vsel %vm4075_vm4, 0, %v362_v37  ;;  %v4115_v60 = vld [vmem:[#allocation6] sm:$0xff]  }
  0x99   : > { %3175 = vmatpush3.bf16.msra.mxu0 %v3478_v8  ;;  %3080 = vmatprep.subr.bf16.mxu1 %v3479_v10  ;;  %v404_v42 = vrot.slane %v402_v34, 7  ;;  %332 = vst [vmem:[#allocation2 + $0x18] sm:$0x1] %v331_v43  ;;  %v410_v47 = vshrl.u32 %v387_v44, 16  ;;  %v413_v48 = vshll.u32 %v387_v44, 16  ;;  %v4117_v62 = vld [vmem:[#allocation6 + $0x140] sm:$0xff]  }
  0x9a   : > { %3176 = vmatprep.subr.bf16.mxu0 %v3480_v11  ;;  %v333_v49 = vld [vmem:[#allocation2 + $0x20] sm:$0x1]  ;;  %v476_v50 = vld [vmem:[#allocation2 + $0x8] sm:$0xf]  ;;  %364 = vst [vmem:[#allocation2 + $0x1c] sm:$0x1] %v363_v46 }
  0x9b   : > { %v4104_v51 = vld [vmem:[#allocation2] sm:$0xf]  ;;  %v4106_v52 = vld [vmem:[#allocation2 + $0x4] sm:$0x1]  ;;  %v407_v53 = vor.u32 %v405_v35, %v404_v42  ;;  %v477_v54 = vsel %vm4095_vm6, %v399_v39, %v476_v50  ;;  %v479_v55 = vld [vmem:[#allocation2 + $0xc] sm:$0x1] }
  0x9c   : > { %3081 = vmatpush3.bf16.msra.mxu1 %v3479_v10  ;;  %v608_v56 = vshrl.u32 %v4104_v51, 16  ;;  %v611_v57 = vshll.u32 %v4104_v51, 16  ;;  %v617_v58 = vshll.u32 %v4106_v52, 16  ;;  %478 = vst [vmem:[#allocation2 + $0x8] sm:$0xf] %v477_v54  ;;  %v480_v59 = vsel %vm4070_vm2, %v400_v40, %v479_v55  ;;  %v3552_v25 = vld [vmem:[#allocation6 + $0x228] sm:$0xff]  }
  0x9d   : > { %3177 = vmatpush3.bf16.msra.mxu0 %v3480_v11  ;;  %3082 = vmatprep.subr.bf16.mxu1 %v3481_v13  ;;  %v408_v61 = vrot.slane %v404_v42, 4  ;;  %v412_v63 = vrot.slane %v410_v47, 7  ;;  %v365_v0 = vld [vmem:[#allocation2 + $0x24] sm:$0x1]  ;;  %481 = vst [vmem:[#allocation2 + $0xc] sm:$0x1] %v480_v59 }
  0x9e   : > { %3178 = vmatprep.subr.bf16.mxu0 %v3482_v17  ;;  %v610_v1 = vrot.slane %v608_v56, 4  ;;  %v613_v2 = vrot.slane %v611_v57, 5  ;;  %v4119_v3 = vrot.slane %v617_v58, 5  ;;  %v482_v4 = vld [vmem:[#allocation2 + $0x10] sm:$0xf]  ;;  %v334_v5 = vsel %vm4070_vm2, 0, %v333_v49 }
  0x9f   : > { %v483_v6 = vsel %vm4095_vm6, %v407_v53, %v482_v4  ;;  %v485_v7 = vld [vmem:[#allocation2 + $0x14] sm:$0x1]  ;;  %v415_v8 = vor.u32 %v413_v48, %v412_v63  ;;  %v416_v10 = vrot.slane %v412_v63, 4  ;;  %335 = vst [vmem:[#allocation2 + $0x20] sm:$0x1] %v334_v5  ;;  %v366_v11 = vsel %vm4075_vm4, 0, %v365_v0 }
  0xa0   : > { %3083 = vmatpush3.bf16.msra.mxu1 %v3481_v13  ;;  %v388_v13 = vld [vmem:[%s4056_s18 + $0xc] sm:$0xf]  ;;  %v614_v14 = vor.u32 %v613_v2, %v610_v1  ;;  %484 = vst [vmem:[#allocation2 + $0x10] sm:$0xf] %v483_v6  ;;  %v486_v15 = vsel %vm4070_vm2, %v408_v61, %v485_v7  ;;  %367 = vst [vmem:[#allocation2 + $0x24] sm:$0x1] %v366_v11 }
  0xa1   : > { %3179 = vmatpush3.bf16.msra.mxu0 %v3482_v17  ;;  %3084 = vmatprep.subr.bf16.mxu1 %v3483_v22  ;;  %v418_v16 = vshrl.u32 %v388_v13, 16  ;;  %v421_v17 = vshll.u32 %v388_v13, 16  ;;  %487 = vst [vmem:[#allocation2 + $0x14] sm:$0x1] %v486_v15  ;;  %v488_v18 = vld [vmem:[#allocation2 + $0x18] sm:$0xf] }
  0xa2   : > { %3180 = vmatprep.subr.bf16.mxu0 %v3484_v28  ;;  %v615_v19 = vrot.slane %v614_v14, 4  ;;  %v489_v20 = vsel %vm4095_vm6, %v415_v8, %v488_v18  ;;  %v491_v21 = vld [vmem:[#allocation2 + $0x1c] sm:$0x1]  ;;  %s2940_s30 = sshll.u32 %s3783_s21, 9  ;;  %s2593_s10 = scalar_lea.sflag [#allocation5], %s4050_s24 }
  0xa3   : > { %490 = vst [vmem:[#allocation2 + $0x18] sm:$0xf] %v489_v20  ;;  %v492_v23 = vsel %vm4070_vm2, %v416_v10, %v491_v21  ;;  %v4138_v24 = vld [vmem:[#allocation2 + $0x8] sm:$0xf]  ;;  %s4494_s27 = scalar_lea.hbm %s4590_s4, %s2940_s30  ;;  %s3669_s29 = scalar_lea.vmem %s4489_s28, 512 }
  0xa4   : > { %3085 = vmatpush3.bf16.msra.mxu1 %v3483_v22  ;;  %v4133_v22 = vrot.slane %v418_v16, 7  ;;  %v1385_v26 = vld [vmem:[#allocation2 + $0x8] sm:$0xf]  ;;  %493 = vst [vmem:[#allocation2 + $0x1c] sm:$0x1] %v492_v23  ;;  %v625_v29 = vshll.u32 %v4138_v24, 16  ;;  %v620_v36 = vsel %vm4142_vm9, %v615_v19, %v4119_v3  ;;  %p3670_p13 = scmp.ne.s32.totalorder %s4489_s28, %s3669_s29 }
  0xa5   : > { %3181 = vmatpush3.bf16.msra.mxu0 %v3484_v28  ;;  %3086 = vmatprep.subr.bf16.mxu1 %v3485_v38  ;;  %v4146_v27 = vld [vmem:[#allocation2 + $0xc] sm:$0x1]  ;;  %v622_v28 = vshrl.u32 %v4138_v24, 16  ;;  %v1402_v32 = vshrl.u32 %v1385_v26, 16  ;;  %v1405_v33 = vshll.u32 %v1385_v26, 16  ;;  %s3800_s7 = smov [#allocation11]  }
  0xa6   : > { %3182 = vmatprep.subr.bf16.mxu0 %v3486_v45  ;;  %v4150_v30 = vld [vmem:[#allocation2 + $0xc] sm:$0x1]  ;;  %v631_v31 = vshll.u32 %v4146_v27, 16  ;;  %v423_v34 = vor.u32 %v421_v17, %v4133_v22  ;;  %v494_v35 = vld [vmem:[#allocation2 + $0x20] sm:$0xf]  ;;  %v424_v46 = vrot.slane %v4133_v22, 4  ;;  %p3671_p6 = pnand %p3670_p13, %p3989_p10 }
  0xa7   : > { %v624_v37 = vrot.slane %v622_v28, 4  ;;  %v1387_v39 = vld [vmem:[#allocation2 + $0x10] sm:$0xf]  ;;  %v1411_v40 = vshll.u32 %v4150_v30, 16  ;;  %v1404_v43 = vrot.slane %v1402_v32, 4  ;;  %v1407_v44 = vrot.slane %v1405_v33, 5 }
  0xa8   : > { %3087 = vmatpush3.bf16.msra.mxu1 %v3485_v38  ;;  %v627_v38 = vrot.slane %v625_v29, 5  ;;  %v4158_v42 = vld [vmem:[#allocation2 + $0x14] sm:$0x1]  ;;  %v633_v48 = vrot.slane %v631_v31, 5  ;;  %v1419_v49 = vshll.u32 %v1387_v39, 16  ;;  %v495_v59 = vsel %vm4095_vm6, %v423_v34, %v494_v35  ;;  %p3672_p3 = pneg %p3671_p6  ;;  %s3673_s16 = sshll.u32 %s3800_s7, 4  ;;  %s3674_s16 = int_to_ptr.vmem [resolvable:$false] %s3673_s16 }
  0xa9   : > { %3183 = vmatpush3.bf16.msra.mxu0 %v3486_v45  ;;  %3096 = vmatprep.subr.bf16.mxu1 %v4115_v60  ;;  %v1416_v45 = vshrl.u32 %v1387_v39, 16  ;;  %v1425_v50 = vshll.u32 %v4158_v42, 16  ;;  %v4162_v53 = vld [vmem:[#allocation2 + $0x10] sm:$0xf]  ;;  %v1408_v54 = vor.u32 %v1407_v44, %v1404_v43  ;;  %v1413_v55 = vrot.slane %v1411_v40, 5  ;;  %s3675_s14 = scalar_lea.vmem %s3674_s16, 1024  ;;  %p3676_p5 = scmp.lt.s32.totalorder %s4489_s28, %s3674_s16 }
  0xaa   : > { %3192 = vmatprep.subr.bf16.mxu0 %v4117_v62  ;;  %v628_v47 = vor.u32 %v627_v38, %v624_v37  ;;  %v4164_v57 = vld [vmem:[#allocation2 + $0x18] sm:$0xf]  ;;  %v4166_v58 = vld [vmem:[#allocation2 + $0x14] sm:$0x1]  ;;  %v1421_v63 = vrot.slane %v1419_v49, 5  ;;  %v636_v2 = vshrl.u32 %v4162_v53, 16  ;;  %p3677_p7 = scmp.lt.s32.totalorder %s3675_s14, %s3669_s29 }
  0xab   : > { %v1418_v56 = vrot.slane %v1416_v45, 4  ;;  %v1427_v0 = vrot.slane %v1425_v50, 5  ;;  %v4170_v1 = vld [vmem:[#allocation2 + $0x1c] sm:$0x1]  ;;  %496 = vst [vmem:[#allocation2 + $0x20] sm:$0xf] %v495_v59 }
  0xac   : > { %v629_v61 = vrot.slane %v628_v47, 4  ;;  %v1409_v3 = vrot.slane %v1408_v54, 4  ;;  %v639_v4 = vshll.u32 %v4162_v53, 16  ;;  %v645_v5 = vshll.u32 %v4166_v58, 16  ;;  %v497_v7 = vld [vmem:[#allocation2 + $0x24] sm:$0x1]  ;;  %p3678_p9 = por %p3677_p7, %p3676_p5 }
  0xad   : > { %v650_v6 = vshrl.u32 %v4164_v57, 16  ;;  %v1422_v10 = vor.u32 %v1421_v63, %v1418_v56  ;;  %v638_v11 = vrot.slane %v636_v2, 4  ;;  %v653_v13 = vshll.u32 %v4164_v57, 16  ;;  %v1389_v14 = vld [vmem:[#allocation2 + $0x18] sm:$0xf] }
  0xae   : > { %v634_v8 = vsel %vm4142_vm9, %v629_v61, %v633_v48  ;;  %v4179_v15 = vld [vmem:[#allocation2 + $0x1c] sm:$0x1]  ;;  %v1414_v17 = vsel %vm4142_vm9, %v1409_v3, %v1413_v55  ;;  %v641_v18 = vrot.slane %v639_v4, 5  ;;  %v659_v22 = vshll.u32 %v4170_v1, 16  ;;  %v336_v56 = vld [vmem:[#allocation2 + $0x28] sm:$0x1]  ;;  %p3679_p0 = pnand %p3678_p9, %p3672_p3 }
  0xaf   : > { %v2800_v16 = vcombine.low %v620_v36, %v634_v8  ;;  %v1423_v19 = vrot.slane %v1422_v10, 4  ;;  %v652_v20 = vrot.slane %v650_v6, 4  ;;  %v655_v21 = vrot.slane %v653_v13, 5  ;;  %v3489_v55 = vld [vmem:[#allocation6 + $0x8] sm:$0xff]   ;;  %v389_v2 = vld [vmem:[%s4056_s18 + $0x10] sm:$0xf] }
  0xb0   : > { %v642_v23 = vor.u32 %v641_v18, %v638_v11  ;;  %v647_v26 = vrot.slane %v645_v5, 5  ;;  %v498_v28 = vsel %vm4070_vm2, %v424_v46, %v497_v7  ;;  %v661_v32 = vrot.slane %v659_v22, 5  ;;  %v3491_v13 = vld [vmem:[#allocation6 + $0x10] sm:$0xff]   ;;  %v2048_v9 = vld [vmem:[#allocation2 + $0x10] sm:$0xf] }
  0xb1   : > { %3088 = vmatprep.mubr.bf16.mxu1 %v2800_v16  ;;  %v1428_v29 = vsel %vm4142_vm9, %v1423_v19, %v1427_v0  ;;  %v656_v31 = vor.u32 %v655_v21, %v652_v20  ;;  %499 = vst [vmem:[#allocation2 + $0x24] sm:$0x1] %v498_v28  ;;  %v1430_v33 = vshrl.u32 %v1389_v14, 16  ;;  %v1433_v37 = vshll.u32 %v1389_v14, 16  ;;  %v368_v0 = vld [vmem:[#allocation2 + $0x2c] sm:$0x1] }
  0xb2   : > { %v2856_v34 = vcombine.low %v1414_v17, %v1428_v29  ;;  %v643_v35 = vrot.slane %v642_v23, 4  ;;  %v1391_v36 = vld [vmem:[#allocation2 + $0x20] sm:$0xf]  ;;  %v1439_v38 = vshll.u32 %v4179_v15, 16  ;;  %v337_v63 = vsel %vm4070_vm2, 0, %v336_v56  ;;  %v3490_v20 = vld [vmem:[#allocation6 + $0x148] sm:$0xff]  }
  0xb3   : > { %v657_v39 = vrot.slane %v656_v31, 4  ;;  %v1432_v40 = vrot.slane %v1430_v33, 4  ;;  %v1444_v43 = vshrl.u32 %v1391_v36, 16  ;;  %v1447_v44 = vshll.u32 %v1391_v36, 16  ;;  %338 = vst [vmem:[#allocation2 + $0x28] sm:$0x1] %v337_v63 }
  0xb4   : > { %3184 = vmatprep.mubr.bf16.mxu0 %v2856_v34  ;;  %v648_v45 = vsel %vm4142_vm9, %v643_v35, %v647_v26  ;;  %v1435_v46 = vrot.slane %v1433_v37, 5  ;;  %v1441_v59 = vrot.slane %v1439_v38, 5  ;;  %v369_v5 = vsel %vm4075_vm4, 0, %v368_v0  ;;  %v4202_v11 = vld [vmem:[#allocation2 + $0x20] sm:$0xf]  ;;  %v3493_v21 = vld [vmem:[#allocation6 + $0x18] sm:$0xff]  }
  0xb5   : > { %v662_v47 = vsel %vm4142_vm9, %v657_v39, %v661_v32  ;;  %v1446_v48 = vrot.slane %v1444_v43, 4  ;;  %v1449_v49 = vrot.slane %v1447_v44, 5  ;;  %v426_v6 = vshrl.u32 %v389_v2, 16  ;;  %370 = vst [vmem:[#allocation2 + $0x2c] sm:$0x1] %v369_v5 }
  0xb6   : > { %v2801_v50 = vcombine.low %v648_v45, %v662_v47  ;;  %v1436_v54 = vor.u32 %v1435_v46, %v1432_v40  ;;  %v429_v7 = vshll.u32 %v389_v2, 16  ;;  %v664_v16 = vshrl.u32 %v4202_v11, 16  ;;  %v339_v29 = vld [vmem:[#allocation2 + $0x30] sm:$0x1]  ;;  %v371_v34 = vld [vmem:[#allocation2 + $0x34] sm:$0x1] }
  0xb7   : > { %v1450_v61 = vor.u32 %v1449_v49, %v1446_v48  ;;  %v428_v14 = vrot.slane %v426_v6, 7  ;;  %v667_v17 = vshll.u32 %v4202_v11, 16  ;;  %v1693_v18 = vrot.slane %v4150_v30, 5  ;;  %v390_v35 = vld [vmem:[%s4056_s18 + $0x14] sm:$0xf]  ;;  %v3495_v46 = vld [vmem:[#allocation6 + $0x20] sm:$0xff]  }
  0xb8   : > { %3089 = vmatmul.mubr.bf16.vlgmr.msra.gmra.mrb[0].mxu1 %v2801_v50  ;;  %v4196_v3 = vld [vmem:[#allocation2 + $0x24] sm:$0x1]  ;;  %v1437_v4 = vrot.slane %v1436_v54, 4  ;;  %v4211_v28 = vrot.slane %v664_v16, 4  ;;  %v340_v33 = vsel %vm4070_vm2, 0, %v339_v29  ;;  %v372_v37 = vsel %vm4075_vm4, 0, %v371_v34 }
  0xb9   : > { %3097 = vmatpush3.bf16.msra.mxu1 %v4115_v60  ;;  %v1451_v8 = vrot.slane %v1450_v61, 4  ;;  %v1453_v10 = vshll.u32 %v4196_v3, 16  ;;  %v431_v22 = vor.u32 %v429_v7, %v428_v14  ;;  %v432_v23 = vrot.slane %v428_v14, 4  ;;  %v4209_v26 = vld [vmem:[#allocation2 + $0x24] sm:$0x1]  ;;  %v3497_v14 = vld [vmem:[#allocation6 + $0x28] sm:$0xff]  }
  0xba   : > { %3098 = vmatprep.subr.bf16.mxu1 %v3489_v55  ;;  %v1442_v19 = vsel %vm4142_vm9, %v1437_v4, %v1441_v59  ;;  %v669_v32 = vrot.slane %v667_v17, 5  ;;  %341 = vst [vmem:[#allocation2 + $0x30] sm:$0x1] %v340_v33  ;;  %v434_v38 = vshrl.u32 %v390_v35, 16  ;;  %v1697_v39 = vrot.slane %v4158_v42, 5  ;;  %v3492_v45 = vld [vmem:[#allocation6 + $0x150] sm:$0xff]  }
  0xbb   : > { %v1455_v60 = vrot.slane %v1453_v10, 5  ;;  %v500_v40 = vld [vmem:[#allocation2 + $0x28] sm:$0xf]  ;;  %373 = vst [vmem:[#allocation2 + $0x34] sm:$0x1] %v372_v37  ;;  %v437_v43 = vshll.u32 %v390_v35, 16  ;;  %v2813_v42 = vcombine.low %v4162_v53, %v4164_v57 }
  0xbc   : > { %v342_v44 = vld [vmem:[#allocation2 + $0x38] sm:$0x1]  ;;  %v501_v47 = vsel %vm4095_vm6, %v431_v22, %v500_v40  ;;  %v503_v48 = vld [vmem:[#allocation2 + $0x2c] sm:$0x1]  ;;  %v673_v49 = vshll.u32 %v4209_v26, 16  ;;  %v436_v50 = vrot.slane %v434_v38, 7  ;;  %v670_v63 = vor.u32 %v669_v32, %v4211_v28 }
  0xbd   : > { %v1456_v31 = vsel %vm4142_vm9, %v1451_v8, %v1455_v60  ;;  %3099 = vmatpush3.bf16.msra.mxu1 %v3489_v55  ;;  %v343_v54 = vsel %vm4070_vm2, 0, %v342_v44  ;;  %502 = vst [vmem:[#allocation2 + $0x28] sm:$0xf] %v501_v47  ;;  %v504_v55 = vsel %vm4070_vm2, %v432_v23, %v503_v48  ;;  %v374_v56 = vld [vmem:[#allocation2 + $0x3c] sm:$0x1]  ;;  %v4246_v33 = vld [vmem:[#allocation6 + $0x160] sm:$0xff]  }
  0xbe   : > { %v2857_v36 = vcombine.low %v1442_v19, %v1456_v31  ;;  %3100 = vmatprep.subr.bf16.mxu1 %v3491_v13  ;;  %344 = vst [vmem:[#allocation2 + $0x38] sm:$0x1] %v343_v54  ;;  %v391_v59 = vld [vmem:[%s4056_s18 + $0x18] sm:$0xf]  ;;  %v345_v61 = vld [vmem:[#allocation2 + $0x40] sm:$0x1]  ;;  %v439_v0 = vor.u32 %v437_v43, %v436_v50 }
  0xbf   : > { %505 = vst [vmem:[#allocation2 + $0x2c] sm:$0x1] %v504_v55  ;;  %v440_v2 = vrot.slane %v436_v50, 4  ;;  %v377_v4 = vld [vmem:[#allocation2 + $0x44] sm:$0x1]  ;;  %v442_v6 = vshrl.u32 %v391_v59, 16 }
  0xc0   : > { %3185 = vmatmul.mubr.bf16.vlgmr.msra.gmra.mrb[0].mxu0 %v2857_v36  ;;  %v392_v5 = vld [vmem:[%s4056_s18 + $0x1c] sm:$0xf]  ;;  %v445_v7 = vshll.u32 %v391_v59, 16  ;;  %v346_v8 = vsel %vm4070_vm2, 0, %v345_v61  ;;  %v378_v10 = vsel %vm4075_vm4, 0, %v377_v4  ;;  %v4238_v22 = vrot.slane %v673_v49, 5 }
  0xc1   : > { %3193 = vmatpush3.bf16.msra.mxu0 %v4117_v62  ;;  %3101 = vmatpush3.bf16.msra.mxu1 %v3491_v13  ;;  %v375_v62 = vsel %vm4075_vm4, 0, %v374_v56  ;;  %v3494_v13 = vld [vmem:[#allocation6 + $0x158] sm:$0xff]   ;;  %347 = vst [vmem:[#allocation2 + $0x40] sm:$0x1] %v346_v8  ;;  %379 = vst [vmem:[#allocation2 + $0x44] sm:$0x1] %v378_v10 }
  0xc2   : > { %3194 = vmatprep.subr.bf16.mxu0 %v3490_v20  ;;  %3102 = vmatprep.subr.bf16.mxu1 %v3493_v21  ;;  %376 = vst [vmem:[#allocation2 + $0x3c] sm:$0x1] %v375_v62  ;;  %v450_v16 = vshrl.u32 %v392_v5, 16  ;;  %v506_v17 = vld [vmem:[#allocation2 + $0x30] sm:$0xf]  ;;  %v444_v19 = vrot.slane %v442_v6, 7 }
  0xc3   : > { %v453_v60 = vshll.u32 %v392_v5, 16  ;;  %v507_v23 = vsel %vm4095_vm6, %v439_v0, %v506_v17  ;;  %v509_v28 = vld [vmem:[#allocation2 + $0x34] sm:$0x1]  ;;  %v4242_v31 = vrot.slane %v670_v63, 4  ;;  %v4250_v35 = vld [vmem:[#allocation6 + $0x30] sm:$0xff]   ;;  %v1701_v0 = vrot.slane %v4179_v15, 5 }
  0xc4   : > { %v452_v29 = vrot.slane %v450_v16, 7  ;;  %508 = vst [vmem:[#allocation2 + $0x30] sm:$0xf] %v507_v23  ;;  %v510_v32 = vsel %vm4070_vm2, %v440_v2, %v509_v28  ;;  %v4248_v34 = vld [vmem:[#allocation2 + $0x28] sm:$0xf]  ;;  %v1705_v2 = vrot.slane %v4196_v3, 5 }
  0xc5   : > { %3195 = vmatpush3.bf16.msra.mxu0 %v3490_v20  ;;  %3103 = vmatpush3.bf16.msra.mxu1 %v3493_v21  ;;  %v447_v20 = vor.u32 %v445_v7, %v444_v19  ;;  %v448_v21 = vrot.slane %v444_v19, 4  ;;  %511 = vst [vmem:[#allocation2 + $0x34] sm:$0x1] %v510_v32  ;;  %v1393_v36 = vld [vmem:[#allocation2 + $0x28] sm:$0xf]  ;;  %v678_v40 = vshrl.u32 %v4248_v34, 16  ;;  %v676_v19 = vsel %vm4142_vm9, %v4242_v31, %v4238_v22 }
  0xc6   : > { %3196 = vmatprep.subr.bf16.mxu0 %v3492_v45  ;;  %3104 = vmatprep.subr.bf16.mxu1 %v3495_v46  ;;  %v512_v37 = vld [vmem:[#allocation2 + $0x38] sm:$0xf]  ;;  %v4252_v38 = vld [vmem:[#allocation2 + $0x2c] sm:$0x1]  ;;  %v681_v43 = vshll.u32 %v4248_v34, 16  ;;  %v455_v48 = vor.u32 %v453_v60, %v452_v29  ;;  %v1458_v50 = vshrl.u32 %v1393_v36, 16 }
  0xc7   : > { %v4256_v44 = vld [vmem:[#allocation2 + $0x2c] sm:$0x1]  ;;  %v513_v47 = vsel %vm4095_vm6, %v447_v20, %v512_v37  ;;  %v687_v49 = vshll.u32 %v4252_v38, 16  ;;  %v1461_v54 = vshll.u32 %v1393_v36, 16  ;;  %v680_v55 = vrot.slane %v678_v40, 4  ;;  %v3498_v6 = vld [vmem:[#allocation6 + $0x168] sm:$0xff]  }
  0xc8   : > { %514 = vst [vmem:[#allocation2 + $0x38] sm:$0xf] %v513_v47  ;;  %v683_v56 = vrot.slane %v681_v43, 5  ;;  %v456_v61 = vrot.slane %v452_v29, 4  ;;  %v518_v63 = vld [vmem:[#allocation2 + $0x40] sm:$0xf] }
  0xc9   : > { %3197 = vmatpush3.bf16.msra.mxu0 %v3492_v45  ;;  %3105 = vmatpush3.bf16.msra.mxu1 %v3495_v46  ;;  %v1467_v45 = vshll.u32 %v4256_v44, 16  ;;  %v515_v46 = vld [vmem:[#allocation2 + $0x3c] sm:$0x1]  ;;  %v1460_v62 = vrot.slane %v1458_v50, 4  ;;  %v1463_v4 = vrot.slane %v1461_v54, 5  ;;  %v689_v8 = vrot.slane %v687_v49, 5 }
  0xca   : > { %3198 = vmatprep.subr.bf16.mxu0 %v3494_v13  ;;  %3106 = vmatprep.subr.bf16.mxu1 %v3497_v14  ;;  %v516_v59 = vsel %vm4070_vm2, %v448_v21, %v515_v46  ;;  %v521_v5 = vld [vmem:[#allocation2 + $0x44] sm:$0x1]  ;;  %v684_v7 = vor.u32 %v683_v56, %v680_v55  ;;  %v519_v10 = vsel %vm4095_vm6, %v455_v48, %v518_v63  ;;  %v4270_v17 = vld [vmem:[#allocation2 + $0x8] sm:$0xe]  ;;  %v3507_v57 = vld [vmem:[#allocation6 + $0x88] sm:$0xff]  }
  0xcb   : > { %517 = vst [vmem:[#allocation2 + $0x3c] sm:$0x1] %v516_v59  ;;  %v522_v16 = vsel %vm4070_vm2, %v456_v61, %v521_v5  ;;  %v4278_v60 = vrot.slane %v1467_v45, 5  ;;  %v4280_v41 = vld [vmem:[#allocation2 + $0x30] sm:$0xf]  ;;  %v3501_v23 = vld [vmem:[#allocation6 + $0x38] sm:$0xff]  }
  0xcc   : > { %520 = vst [vmem:[#allocation2 + $0x40] sm:$0xf] %v519_v10  ;;  %523 = vst [vmem:[#allocation2 + $0x44] sm:$0x1] %v522_v16  ;;  %v685_v28 = vrot.slane %v684_v7, 4  ;;  %v692_v21 = vshrl.u32 %v4280_v41, 16 }
  0xcd   : > { %3199 = vmatpush3.bf16.msra.mxu0 %v3494_v13  ;;  %3107 = vmatpush3.bf16.msra.mxu1 %v3497_v14  ;;  %v1395_v13 = vld [vmem:[#allocation2 + $0x30] sm:$0xf]  ;;  %v1464_v14 = vor.u32 %v1463_v4, %v1460_v62  ;;  %v4282_v29 = vld [vmem:[#allocation2 + $0x34] sm:$0x1]  ;;  %v3500_v36 = vld [vmem:[#allocation6 + $0x170] sm:$0xff]   ;;  %v695_v40 = vshll.u32 %v4280_v41, 16 }
  0xce   : > { %3200 = vmatprep.subr.bf16.mxu0 %v4246_v33  ;;  %3108 = vmatprep.subr.bf16.mxu1 %v4250_v35  ;;  %v1472_v32 = vshrl.u32 %v1395_v13, 16  ;;  %v1475_v20 = vshll.u32 %v1395_v13, 16  ;;  %v1481_v31 = vshll.u32 %v4282_v29, 16  ;;  %v4286_v37 = vld [vmem:[#allocation2 + $0x34] sm:$0x1]  ;;  %v2868_v43 = vrot.slane %v4270_v17, 9 }
  0xcf   : > { %v1465_v22 = vrot.slane %v1464_v14, 4  ;;  %v690_v47 = vsel %vm4142_vm9, %v685_v28, %v689_v8  ;;  %v4293_v50 = vld [vmem:[#allocation2 + $0x38] sm:$0xf]  ;;  %v694_v54 = vrot.slane %v692_v21, 4  ;;  %v4296_v45 = vld [vmem:[#allocation6 + $0x80] sm:$0xff]   ;;  %v701_v62 = vshll.u32 %v4286_v37, 16 }
  0xd0   : > { %v1474_v48 = vrot.slane %v1472_v32, 4  ;;  %v1477_v49 = vrot.slane %v1475_v20, 5  ;;  %v2802_v46 = vcombine.low %v676_v19, %v690_v47  ;;  %v1483_v56 = vrot.slane %v1481_v31, 5  ;;  %v1397_v59 = vld [vmem:[#allocation2 + $0x38] sm:$0xf]  ;;  %v3502_v13 = vld [vmem:[#allocation6 + $0x178] sm:$0xff]  }
  0xd1   : > { %3201 = vmatpush3.bf16.msra.mxu0 %v4246_v33  ;;  %3109 = vmatpush3.bf16.msra.mxu1 %v4250_v35  ;;  %v1470_v55 = vsel %vm4142_vm9, %v1465_v22, %v4278_v60  ;;  %v697_v33 = vrot.slane %v695_v40, 5  ;;  %v706_v4 = vshrl.u32 %v4293_v50, 16  ;;  %v709_v35 = vshll.u32 %v4293_v50, 16  ;;  %v1668_v5 = vld [vmem:[#allocation2 + $0x10] sm:$0xe] }
  0xd2   : > { %3202 = vmatprep.subr.bf16.mxu0 %v3498_v6  ;;  %3110 = vmatprep.subr.bf16.mxu1 %v3501_v23  ;;  %v1478_v61 = vor.u32 %v1477_v49, %v1474_v48  ;;  %v4301_v63 = vld [vmem:[#allocation2 + $0x3c] sm:$0x1]  ;;  %v1486_v16 = vshrl.u32 %v1397_v59, 16  ;;  %v1489_v19 = vshll.u32 %v1397_v59, 16  ;;  %v703_v60 = vrot.slane %v701_v62, 5 }
  0xd3   : > { %3092 = vmatprep.mubr.bf16.mxu1 %v2802_v46  ;;  %v698_v7 = vor.u32 %v697_v33, %v694_v54  ;;  %v715_v8 = vshll.u32 %v4301_v63, 16  ;;  %v4307_v10 = vld [vmem:[#allocation2 + $0x3c] sm:$0x1]  ;;  %v708_v28 = vrot.slane %v706_v4, 4  ;;  %v711_v32 = vrot.slane %v709_v35, 5 }
  0xd4   : > { %v1479_v14 = vrot.slane %v1478_v61, 4  ;;  %v1399_v20 = vld [vmem:[#allocation2 + $0x40] sm:$0xf]  ;;  %v4309_v31 = vld [vmem:[#allocation2 + $0x44] sm:$0x1]  ;;  %v1488_v40 = vrot.slane %v1486_v16, 4 }
  0xd5   : > { %3203 = vmatpush3.bf16.msra.mxu0 %v3498_v6  ;;  %3111 = vmatpush3.bf16.msra.mxu1 %v3501_v23  ;;  %v699_v21 = vrot.slane %v698_v7, 4  ;;  %v717_v22 = vrot.slane %v715_v8, 5  ;;  %v1491_v47 = vrot.slane %v1489_v19, 5  ;;  %v712_v49 = vor.u32 %v711_v32, %v708_v28  ;;  %v1669_v46 = vld [vmem:[#allocation2 + $0x18] sm:$0xe]  ;;  %v4318_v16 = vld [vmem:[#allocation6 + $0x180] sm:$0xff]  }
  0xd6   : > { %3204 = vmatprep.subr.bf16.mxu0 %v3500_v36  ;;  %3120 = vmatprep.subr.bf16.mxu1 %v4296_v45  ;;  %v1484_v48 = vsel %vm4142_vm9, %v1479_v14, %v1483_v56  ;;  %v1495_v6 = vshll.u32 %v4307_v10, 16  ;;  %v1500_v54 = vshrl.u32 %v1399_v20, 16  ;;  %v1670_v33 = vld [vmem:[#allocation2 + $0x20] sm:$0xe]  ;;  %v1503_v61 = vshll.u32 %v1399_v20, 16 }
  0xd7   : > { %v2858_v59 = vcombine.low %v1470_v55, %v1484_v48  ;;  %v1492_v23 = vor.u32 %v1491_v47, %v1488_v40  ;;  %v2869_v62 = vrot.slane %v1668_v5, 9  ;;  %v704_v4 = vsel %vm4142_vm9, %v699_v21, %v703_v60  ;;  %v4422_v12 = vld [vmem:[#allocation2 + $0x2c] sm:$0x1] }
  0xd8   : > { %v713_v35 = vrot.slane %v712_v49, 4  ;;  %v1502_v7 = vrot.slane %v1500_v54, 4  ;;  %v1509_v8 = vshll.u32 %v4309_v31, 16  ;;  %v1497_v19 = vrot.slane %v1495_v6, 5  ;;  %v1673_v54 = vld [vmem:[#allocation2 + $0x38] sm:$0xe] }
  0xd9   : > { %3205 = vmatpush3.bf16.msra.mxu0 %v3500_v36  ;;  %3188 = vmatprep.mubr.bf16.mxu0 %v2858_v59  ;;  %v1493_v56 = vrot.slane %v1492_v23, 4  ;;  %v1505_v14 = vrot.slane %v1503_v61, 5  ;;  %v2870_v5 = vrot.slane %v1669_v46, 9  ;;  %v2812_v36 = vcombine.low %v4104_v51, %v4138_v24  ;;  %v1002_v59 = vld [vmem:[#allocation2] sm:$0xe] }
  0xda   : > { %3206 = vmatprep.subr.bf16.mxu0 %v3502_v13  ;;  %v718_v60 = vsel %vm4142_vm9, %v713_v35, %v717_v22  ;;  %v1511_v28 = vrot.slane %v1509_v8, 5  ;;  %v2871_v32 = vrot.slane %v1670_v33, 9  ;;  %v1694_v40 = vsel %vm4322_vm12, %v2868_v43, %v1693_v18  ;;  %v1671_v43 = vld [vmem:[#allocation2 + $0x28] sm:$0xe]  ;;  %v3508_v35 = vld [vmem:[#allocation6 + $0x188] sm:$0xff]  }
  0xdb   : > { %v2803_v20 = vcombine.low %v704_v4, %v718_v60  ;;  %v1506_v21 = vor.u32 %v1505_v14, %v1502_v7  ;;  %v1698_v22 = vsel %vm4322_vm12, %v2869_v62, %v1697_v39  ;;  %v1498_v51 = vsel %vm4142_vm9, %v1493_v56, %v1497_v19  ;;  %v1672_v39 = vld [vmem:[#allocation2 + $0x30] sm:$0xe] }
  0xdc   : > { %v2876_v17 = vcombine.low %v1694_v40, %v1698_v22  ;;  %v2872_v47 = vrot.slane %v1671_v43, 9  ;;  %v1713_v48 = vrot.slane %v4282_v29, 5  ;;  %v1031_v49 = vrot.slane %v4106_v52, 5  ;;  %v1674_v29 = vld [vmem:[#allocation2 + $0x40] sm:$0xe]  ;;  %v3515_v22 = vld [vmem:[#allocation6 + $0xa8] sm:$0xff]  }
  0xdd   : > { %3207 = vmatpush3.bf16.msra.mxu0 %v3502_v13  ;;  %3093 = vmatmul.mubr.bf16.gmra.mrb[4].mxu1 %v2803_v20  ;;  %v1507_v24 = vrot.slane %v1506_v21, 4  ;;  %v1709_v13 = vrot.slane %v4256_v44, 5  ;;  %v2814_v44 = vcombine.low %v4202_v11, %v4248_v34  ;;  %v2873_v6 = vrot.slane %v1672_v39, 9  ;;  %v3509_v11 = vld [vmem:[#allocation6 + $0x90] sm:$0xff]   ;;  %v1004_v56 = vld [vmem:[#allocation2 + $0x10] sm:$0xe] }
  0xde   : > { %3216 = vmatprep.subr.bf16.mxu0 %v4318_v16  ;;  %3112 = vmatprep.mubr.bf16.mxu1 %v2812_v36  ;;  %v1035_v46 = vrot.slane %v4146_v27, 5  ;;  %v1039_v33 = vrot.slane %v4166_v58, 5  ;;  %v1702_v53 = vsel %vm4322_vm12, %v2870_v5, %v1701_v0  ;;  %v1706_v52 = vsel %vm4322_vm12, %v2871_v32, %v1705_v2  ;;  %v1003_v2 = vld [vmem:[#allocation2 + $0x8] sm:$0xe]  ;;  %v3513_v21 = vld [vmem:[#allocation6 + $0xa0] sm:$0xff]  }
  0xdf   : > { %v1512_v30 = vsel %vm4142_vm9, %v1507_v24, %v1511_v28  ;;  %v1710_v27 = vsel %vm4322_vm12, %v2872_v47, %v1709_v13  ;;  %v1714_v58 = vsel %vm4322_vm12, %v2873_v6, %v1713_v48  ;;  %v2874_v34 = vrot.slane %v1673_v54, 9  ;;  %v3512_v32 = vld [vmem:[#allocation6 + $0x198] sm:$0xff]   ;;  %v3524_v40 = vld [vmem:[#allocation2 + $0x10] ss:$8 sps:$4 sm:$0xff]   ;;  %v1006_v24 = vld [vmem:[#allocation2 + $0x20] sm:$0xe] }
  0xe0   : > { %v2859_v18 = vcombine.low %v1498_v51, %v1512_v30  ;;  %v1717_v15 = vrot.slane %v4307_v10, 5  ;;  %v2877_v3 = vcombine.low %v1702_v53, %v1706_v52  ;;  %v1721_v0 = vrot.slane %v4309_v31, 5  ;;  %v1005_v31 = vld [vmem:[#allocation2 + $0x18] sm:$0xe]  ;;  %v3514_v51 = vld [vmem:[#allocation6 + $0x1a0] sm:$0xff]   ;;  %v3518_v13 = vld [vmem:[#allocation6 + $0xb0] sm:$0xff]  }
  0xe1   : > { %v2824_v23 = vrot.slane %v1002_v59, 9  ;;  %v2875_v61 = vrot.slane %v1674_v29, 9  ;;  %v2825_v62 = vrot.slane %v1003_v2, 9  ;;  %v1043_v4 = vrot.slane %v4170_v1, 5  ;;  %v3511_v1 = vld [vmem:[#allocation6 + $0x98] sm:$0xff]   ;;  %v3519_v47 = vld [vmem:[#allocation6 + $0x1b0] sm:$0xff]  }
  0xe2   : > { %3189 = vmatmul.mubr.bf16.gmra.mrb[4].mxu0 %v2859_v18  ;;  %v2878_v7 = vcombine.low %v1710_v27, %v1714_v58  ;;  %v2815_v10 = vcombine.low %v4280_v41, %v4293_v50  ;;  %v2826_v14 = vrot.slane %v1004_v56, 9  ;;  %v2827_v5 = vrot.slane %v1005_v31, 9  ;;  %v3510_v50 = vld [vmem:[#allocation6 + $0x190] sm:$0xff]   ;;  %v1007_v30 = vld [vmem:[#allocation2 + $0x28] sm:$0xe]  ;;  %v3528_v31 = vld [vmem:[#allocation6 + $0x1c8] sm:$0xff]  }
  0xe3   : > { %3208 = vmatprep.mubr.bf16.mxu0 %v2876_v17  ;;  %v1032_v8 = vsel %vm4322_vm12, %v2824_v23, %v1031_v49  ;;  %v1718_v60 = vsel %vm4322_vm12, %v2874_v34, %v1717_v15  ;;  %v1722_v41 = vsel %vm4322_vm12, %v2875_v61, %v1721_v0  ;;  %v3516_v17 = vld [vmem:[#allocation6 + $0x1a8] sm:$0xff]   ;;  %v1047_v18 = vrot.slane %v4209_v26, 5  ;;  %v348_v39 = vld [vmem:[#allocation2 + $0x48] sm:$0x1]  ;;  %v1008_v6 = vld [vmem:[#allocation2 + $0x30] sm:$0xe] }
  0xe4   : > { %v4383_v28 = vsel %vm4322_vm12, %v2826_v14, %v1039_v33  ;;  %v4387_v36 = vsel %vm4322_vm12, %v2827_v5, %v1043_v4  ;;  %v2879_v20 = vcombine.low %v1718_v60, %v1722_v41  ;;  %v2828_v43 = vrot.slane %v1006_v24, 9  ;;  %v1009_v54 = vld [vmem:[#allocation2 + $0x38] sm:$0xe]  ;;  %v3522_v52 = vld [vmem:[#allocation6 + $0x1b8] sm:$0xff]   ;;  %v4401_v59 = vld [vmem:[#allocation2 + $0x14] sm:$0x1] }
  0xe5   : > { %3113 = vmatmul.mubr.bf16.vlgmr.msra.gmra.mrb[0].mxu1 %v2813_v42  ;;  %v1051_v42 = vrot.slane %v4252_v38, 5  ;;  %v2829_v48 = vrot.slane %v1007_v30, 9  ;;  %v349_v49 = vsel %vm4070_vm2, 0, %v348_v39  ;;  %v1059_v33 = vrot.slane %v4301_v63, 5  ;;  %v2050_v53 = vld [vmem:[#allocation2 + $0x18] sm:$0xf] }
  0xe6   : > { %3121 = vmatpush3.bf16.msra.mxu1 %v4296_v45  ;;  %3116 = vmatprep.mubr.bf16.mxu1 %v2814_v44  ;;  %v1036_v45 = vsel %vm4322_vm12, %v2825_v62, %v1035_v46  ;;  %v3521_v44 = vld [vmem:[#allocation6 + $0xb8] sm:$0xff]   ;;  %350 = vst [vmem:[#allocation2 + $0x48] sm:$0x1] %v349_v49  ;;  %v1048_v26 = vsel %vm4322_vm12, %v2828_v43, %v1047_v18  ;;  %v1055_v46 = vrot.slane %v4286_v37, 5  ;;  %v2830_v29 = vrot.slane %v1008_v6, 9  ;;  %v3527_v61 = vld [vmem:[#allocation6 + $0xc8] sm:$0xff]  }
  0xe7   : > { %3122 = vmatprep.subr.bf16.mxu1 %v3507_v57  ;;  %v2832_v19 = vcombine.low %v1032_v8, %v1036_v45  ;;  %v1052_v38 = vsel %vm4322_vm12, %v2829_v48, %v1051_v42  ;;  %v2068_v27 = vshll.u32 %v2048_v9, 16  ;;  %v2079_v58 = vshrl.u32 %v2050_v53, 16  ;;  %v4403_v2 = vld [vmem:[#allocation2 + $0x1c] sm:$0x1]  ;;  %v3525_v62 = vld [vmem:[#allocation6 + $0x1c0] sm:$0xff]   ;;  %v3532_v49 = vld [vmem:[#allocation6 + $0x1d8] sm:$0xff]  }
  0xe8   : > { %v2831_v34 = vrot.slane %v1009_v54, 9  ;;  %v2082_v15 = vshll.u32 %v2050_v53, 16  ;;  %v2834_v63 = vcombine.low %v1048_v26, %v1052_v38  ;;  %v1056_v4 = vsel %vm4322_vm12, %v2830_v29, %v1055_v46  ;;  %v3526_v56 = vld [vmem:[#allocation2 + $0x20] ss:$8 sps:$4 sm:$0xff]   ;;  %v3537_v14 = vld [vmem:[#allocation2 + $0x30] ss:$8 sps:$4 sm:$0xff]  }
  0xe9   : > { %v2070_v0 = vrot.slane %v2068_v27, 5  ;;  %v2081_v37 = vrot.slane %v2079_v58, 4  ;;  %v2074_v8 = vshll.u32 %v4401_v59, 16  ;;  %v2088_v45 = vshll.u32 %v4403_v2, 16  ;;  %v2058_v18 = vld [vmem:[#allocation2 + $0x38] sm:$0xf] }
  0xea   : > { %3209 = vmatmul.mubr.bf16.vlgmr.msra.gmra.mrb[0].mxu0 %v2877_v3  ;;  %3123 = vmatpush3.bf16.msra.mxu1 %v3507_v57  ;;  %v3523_v57 = vld [vmem:[#allocation6 + $0xc0] sm:$0xff]   ;;  %v2084_v23 = vrot.slane %v2082_v15, 5  ;;  %v380_v43 = vld [vmem:[#allocation2 + $0x4c] sm:$0x1]  ;;  %v3535_v6 = vld [vmem:[#allocation6 + $0xe8] sm:$0xff]   ;;  %v2135_v54 = vshrl.u32 %v2058_v18, 16 }
  0xeb   : > { %3217 = vmatpush3.bf16.msra.mxu0 %v4318_v16  ;;  %3124 = vmatprep.subr.bf16.mxu1 %v3509_v11  ;;  %v2833_v16 = vcombine.low %v4383_v28, %v4387_v36  ;;  %v2076_v60 = vrot.slane %v2074_v8, 5  ;;  %v3543_v28 = vld [vmem:[#allocation2 + $0x8] ss:$8 sps:$4 sm:$0xff]   ;;  %v2052_v36 = vld [vmem:[#allocation2 + $0x20] sm:$0xf]  ;;  %v381_v48 = vsel %vm4075_vm4, 0, %v380_v43 }
  0xec   : > { %3218 = vmatprep.subr.bf16.mxu0 %v3508_v35  ;;  %3212 = vmatprep.mubr.bf16.mxu0 %v2878_v7  ;;  %v2093_v24 = vshrl.u32 %v2052_v36, 16  ;;  %v3533_v42 = vld [vmem:[#allocation6 + $0xe0] sm:$0xff]   ;;  %382 = vst [vmem:[#allocation2 + $0x4c] sm:$0x1] %v381_v48  ;;  %v2138_v26 = vshll.u32 %v2058_v18, 16  ;;  %v2137_v58 = vrot.slane %v2135_v54, 4 }
  0xed   : > { %3117 = vmatmul.mubr.bf16.gmra.mrb[4].mxu1 %v2815_v10  ;;  %v2085_v10 = vor.u32 %v2084_v23, %v2081_v37  ;;  %v3534_v38 = vld [vmem:[#allocation6 + $0x1e0] sm:$0xff]   ;;  %v4426_v27 = vld [vmem:[#allocation2 + $0x3c] sm:$0x1]  ;;  %v2060_v15 = vld [vmem:[#allocation2 + $0x40] sm:$0xf] }
  0xee   : > { %3125 = vmatpush3.bf16.msra.mxu1 %v3509_v11  ;;  %3136 = vmatprep.mubr.bf16.mxu1 %v2832_v19  ;;  %v2065_v11 = vshrl.u32 %v2048_v9, 16  ;;  %v3529_v19 = vld [vmem:[#allocation6 + $0xd0] sm:$0xff]   ;;  %v2095_v46 = vrot.slane %v2093_v24, 4  ;;  %v3536_v37 = vld [vmem:[#allocation6 + $0x1e8] sm:$0xff]   ;;  %v2149_v8 = vshrl.u32 %v2060_v15, 16 }
  0xef   : > { %3219 = vmatpush3.bf16.msra.mxu0 %v3508_v35  ;;  %3126 = vmatprep.subr.bf16.mxu1 %v3511_v1  ;;  %v1060_v35 = vsel %vm4322_vm12, %v2831_v34, %v1059_v33  ;;  %v2086_v41 = vrot.slane %v2085_v10, 4  ;;  %v2140_v34 = vrot.slane %v2138_v26, 5  ;;  %v3544_v18 = vld [vmem:[#allocation2 + $0x18] ss:$8 sps:$4 sm:$0xff]   ;;  %v3547_v48 = vld [vmem:[#allocation2 + $0x28] ss:$8 sps:$4 sm:$0xff]  }
  0xf0   : > { %3220 = vmatprep.subr.bf16.mxu0 %v3510_v50  ;;  %v2067_v3 = vrot.slane %v2065_v11, 4  ;;  %v2835_v5 = vcombine.low %v1056_v4, %v1060_v35  ;;  %v4424_v11 = vld [vmem:[#allocation2 + $0x34] sm:$0x1]  ;;  %v3546_v26 = vld [vmem:[#allocation6 + $0x208] sm:$0xff]  }
  0xf1   : > { %v2130_v35 = vshll.u32 %v4424_v11, 16  ;;  %v2141_v10 = vor.u32 %v2140_v34, %v2137_v58  ;;  %v2330_v34 = vld [vmem:[#allocation2 + $0x10] sm:$0xe] }
  0xf2   : > { %3127 = vmatpush3.bf16.msra.mxu1 %v3511_v1  ;;  %3213 = vmatmul.mubr.bf16.gmra.mrb[4].mxu0 %v2879_v20  ;;  %v2071_v7 = vor.u32 %v2070_v0, %v2067_v3  ;;  %v3530_v20 = vld [vmem:[#allocation6 + $0x1d0] sm:$0xff]   ;;  %v2062_v0 = vld [vmem:[#allocation2 + $0x48] sm:$0xf] }
  0xf3   : > { %3221 = vmatpush3.bf16.msra.mxu0 %v3510_v50  ;;  %3128 = vmatprep.subr.bf16.mxu1 %v3513_v21  ;;  %v2090_v50 = vrot.slane %v2088_v45, 5  ;;  %v3538_v3 = vld [vmem:[#allocation6 + $0xf0] sm:$0xff]   ;;  %v2152_v45 = vshll.u32 %v2060_v15, 16  ;;  %v4434_v24 = vld [vmem:[#allocation2 + $0x4c] sm:$0x1] }
  0xf4   : > { %3222 = vmatprep.subr.bf16.mxu0 %v3512_v32  ;;  %3232 = vmatprep.mubr.bf16.mxu0 %v3524_v40  ;;  %v2072_v1 = vrot.slane %v2071_v7, 4  ;;  %v3539_v40 = vld [vmem:[#allocation2 + $0x40] ss:$8 sps:$4 sm:$0xff]   ;;  %v2144_v7 = vshll.u32 %v4426_v27, 16  ;;  %v2172_v54 = vshll.u32 %v4434_v24, 16 }
  0xf5   : > { %v2331_v15 = vld [vmem:[#allocation2 + $0x18] sm:$0xe] }
  0xf6   : > { %3129 = vmatpush3.bf16.msra.mxu1 %v3513_v21  ;;  %v2056_v21 = vld [vmem:[#allocation2 + $0x30] sm:$0xf] }
  0xf7   : > { %3223 = vmatpush3.bf16.msra.mxu0 %v3512_v32  ;;  %3130 = vmatprep.subr.bf16.mxu1 %v3515_v22  ;;  %v2054_v32 = vld [vmem:[#allocation2 + $0x28] sm:$0xf]  ;;  %v2121_v39 = vshrl.u32 %v2056_v21, 16 }
  0xf8   : > { %3224 = vmatprep.subr.bf16.mxu0 %v3514_v51  ;;  %v2107_v30 = vshrl.u32 %v2054_v32, 16 }
  0xfa   : > { %3131 = vmatpush3.bf16.msra.mxu1 %v3515_v22  ;;  %v2077_v22 = vsel %vm4142_vm9, %v2072_v1, %v2076_v60  ;;  %v2109_v9 = vrot.slane %v2107_v30, 4  ;;  %v2334_v30 = vld [vmem:[#allocation2 + $0x30] sm:$0xe] }
  0xfb   : > { %3225 = vmatpush3.bf16.msra.mxu0 %v3514_v51  ;;  %3132 = vmatprep.subr.bf16.mxu1 %v3518_v13  ;;  %v2091_v51 = vsel %vm4142_vm9, %v2086_v41, %v2090_v50 }
  0xfc   : > { %3226 = vmatprep.subr.bf16.mxu0 %v3516_v17 }
  0xfe   : > { %3133 = vmatpush3.bf16.msra.mxu1 %v3518_v13  ;;  %v2096_v13 = vshll.u32 %v2052_v36, 16  ;;  %v2146_v36 = vrot.slane %v2144_v7, 5 }
  0xff   : > { %3227 = vmatpush3.bf16.msra.mxu0 %v3516_v17  ;;  %3134 = vmatprep.subr.bf16.mxu1 %v3521_v44  ;;  %v2110_v17 = vshll.u32 %v2054_v32, 16  ;;  %v2142_v32 = vrot.slane %v2141_v10, 4  ;;  %v3550_v10 = vld [vmem:[#allocation6 + $0x218] sm:$0xff]  }
 0x100   : > { %3228 = vmatprep.subr.bf16.mxu0 %v3519_v47  ;;  %v2098_v33 = vrot.slane %v2096_v13, 5  ;;  %v3542_v13 = vld [vmem:[#allocation6 + $0x1f8] sm:$0xff]  }
 0x101   : > { %v2112_v53 = vrot.slane %v2110_v17, 5  ;;  %v2335_v17 = vld [vmem:[#allocation2 + $0x38] sm:$0xe] }
 0x102   : > { %3135 = vmatpush3.bf16.msra.mxu1 %v3521_v44  ;;  %v2900_v44 = vcombine.low %v2077_v22, %v2091_v51  ;;  %v3545_v51 = vld [vmem:[#allocation6 + $0x200] sm:$0xff]  }
 0x103   : > { %3229 = vmatpush3.bf16.msra.mxu0 %v3519_v47  ;;  %3144 = vmatprep.subr.bf16.mxu1 %v3523_v57  ;;  %v2124_v47 = vshll.u32 %v2056_v21, 16  ;;  %v2154_v21 = vrot.slane %v2152_v45, 5 }
 0x104   : > { %3230 = vmatprep.subr.bf16.mxu0 %v3522_v52 }
 0x105   : > { %3137 = vmatmul.mubr.bf16.vlgmr.msra.gmra.mrb[0].mxu1 %v2833_v16  ;;  %v3531_v16 = vld [vmem:[#allocation6 + $0xd8] sm:$0xff]   ;;  %v2126_v29 = vrot.slane %v2124_v47, 5 }
 0x106   : > { %3145 = vmatpush3.bf16.msra.mxu1 %v3523_v57  ;;  %3140 = vmatprep.mubr.bf16.mxu1 %v2834_v63  ;;  %v2123_v57 = vrot.slane %v2121_v39, 4  ;;  %v2099_v63 = vor.u32 %v2098_v33, %v2095_v46  ;;  %v2372_v46 = vrot.slane %v4424_v11, 5  ;;  %v2917_v33 = vrot.slane %v2335_v17, 9 }
 0x107   : > { %3231 = vmatpush3.bf16.msra.mxu0 %v3522_v52  ;;  %3146 = vmatprep.subr.bf16.mxu1 %v3527_v61  ;;  %v4420_v52 = vld [vmem:[#allocation2 + $0x24] sm:$0x1] }
 0x108   : > { %3240 = vmatprep.subr.bf16.mxu0 %v3525_v62  ;;  %v2102_v23 = vshll.u32 %v4420_v52, 16  ;;  %v2127_v4 = vor.u32 %v2126_v29, %v2123_v57 }
 0x10a   : > { %3233 = vmatmul.mubr.bf16.vlgmr.msra.gmra.mrb[0].mxu0 %v3526_v56  ;;  %3147 = vmatpush3.bf16.msra.mxu1 %v3527_v61  ;;  %v2113_v61 = vor.u32 %v2112_v53, %v2109_v9  ;;  %v2163_v56 = vshrl.u32 %v2062_v0, 16  ;;  %v2104_v1 = vrot.slane %v2102_v23, 5  ;;  %v2128_v50 = vrot.slane %v2127_v4, 4 }
 0x10b   : > { %3241 = vmatpush3.bf16.msra.mxu0 %v3525_v62  ;;  %3148 = vmatprep.subr.bf16.mxu1 %v3529_v19  ;;  %v2116_v62 = vshll.u32 %v4422_v12, 16  ;;  %v2376_v9 = vrot.slane %v4426_v27, 5  ;;  %v2912_v23 = vrot.slane %v2330_v34, 9  ;;  %v2360_v4 = vrot.slane %v4403_v2, 5 }
 0x10c   : > { %3242 = vmatprep.subr.bf16.mxu0 %v3528_v31  ;;  %3236 = vmatprep.mubr.bf16.mxu0 %v3537_v14  ;;  %v3540_v14 = vld [vmem:[#allocation6 + $0x1f0] sm:$0xff]   ;;  %v2114_v60 = vrot.slane %v2113_v61, 4  ;;  %v2356_v61 = vrot.slane %v4401_v59, 5 }
 0x10d   : > { %3141 = vmatmul.mubr.bf16.gmra.mrb[4].mxu1 %v2835_v5  ;;  %v2100_v5 = vrot.slane %v2099_v63, 4  ;;  %v2118_v41 = vrot.slane %v2116_v62, 5  ;;  %v2377_v27 = vsel %vm4322_vm12, %v2917_v33, %v2376_v9  ;;  %v3548_v63 = vld [vmem:[#allocation2 + $0x38] ss:$8 sps:$4 sm:$0xff]   ;;  %v2913_v62 = vrot.slane %v2331_v15, 9 }
 0x10e   : > { %3149 = vmatpush3.bf16.msra.mxu1 %v3529_v19  ;;  %3160 = vmatprep.mubr.bf16.mxu1 %v3543_v28  ;;  %v3541_v19 = vld [vmem:[#allocation6 + $0xf8] sm:$0xff]   ;;  %v2132_v28 = vrot.slane %v2130_v35, 5  ;;  %v2357_v59 = vsel %vm4322_vm12, %v2912_v23, %v2356_v61 }
 0x10f   : > { %3243 = vmatpush3.bf16.msra.mxu0 %v3528_v31  ;;  %3150 = vmatprep.subr.bf16.mxu1 %v3531_v16  ;;  %v2166_v31 = vshll.u32 %v2062_v0, 16  ;;  %v2105_v43 = vsel %vm4142_vm9, %v2100_v5, %v2104_v1  ;;  %v2174_v0 = vrot.slane %v2172_v54, 5  ;;  %v2361_v2 = vsel %vm4322_vm12, %v2913_v62, %v2360_v4  ;;  %v2337_v5 = vld [vmem:[#allocation2 + $0x48] sm:$0xe] }
 0x110   : > { %3244 = vmatprep.subr.bf16.mxu0 %v3530_v20  ;;  %v2133_v39 = vsel %vm4142_vm9, %v2128_v50, %v2132_v28  ;;  %v2919_v50 = vrot.slane %v2337_v5, 9  ;;  %v3554_v28 = vld [vmem:[#allocation6 + $0x238] sm:$0xff]  }
 0x111   : > { %v2168_v22 = vrot.slane %v2166_v31, 5  ;;  %v2920_v31 = vcombine.low %v2357_v59, %v2361_v2 }
 0x112   : > { %3151 = vmatpush3.bf16.msra.mxu1 %v3531_v16  ;;  %3237 = vmatmul.mubr.bf16.gmra.mrb[4].mxu0 %v3539_v40  ;;  %v2151_v16 = vrot.slane %v2149_v8, 4  ;;  %v2165_v40 = vrot.slane %v2163_v56, 4  ;;  %v3551_v56 = vld [vmem:[#allocation6 + $0x220] sm:$0xff]  }
 0x113   : > { %3245 = vmatpush3.bf16.msra.mxu0 %v3530_v20  ;;  %3152 = vmatprep.subr.bf16.mxu1 %v3533_v42  ;;  %v4432_v20 = vld [vmem:[#allocation2 + $0x44] sm:$0x1] }
 0x114   : > { %3246 = vmatprep.subr.bf16.mxu0 %v3532_v49  ;;  %3256 = vmatprep.mubr.bf16.mxu0 %v2900_v44  ;;  %v2158_v47 = vshll.u32 %v4432_v20, 16  ;;  %v2155_v44 = vor.u32 %v2154_v21, %v2151_v16  ;;  %v2380_v1 = vrot.slane %v4432_v20, 5  ;;  %v2333_v16 = vld [vmem:[#allocation2 + $0x28] sm:$0xe] }
 0x116   : > { %3153 = vmatpush3.bf16.msra.mxu1 %v3533_v42  ;;  %v2119_v42 = vsel %vm4142_vm9, %v2114_v60, %v2118_v41  ;;  %v2156_v29 = vrot.slane %v2155_v44, 4  ;;  %v2160_v58 = vrot.slane %v2158_v47, 5  ;;  %v2384_v60 = vrot.slane %v4434_v24, 5 }
 0x117   : > { %3247 = vmatpush3.bf16.msra.mxu0 %v3532_v49  ;;  %3154 = vmatprep.subr.bf16.mxu1 %v3535_v6  ;;  %v2147_v49 = vsel %vm4142_vm9, %v2142_v32, %v2146_v36  ;;  %v2901_v53 = vcombine.low %v2105_v43, %v2119_v42  ;;  %v2332_v36 = vld [vmem:[#allocation2 + $0x20] sm:$0xe] }
 0x118   : > { %3248 = vmatprep.subr.bf16.mxu0 %v3534_v38  ;;  %v2902_v57 = vcombine.low %v2133_v39, %v2147_v49  ;;  %v2161_v7 = vsel %vm4142_vm9, %v2156_v29, %v2160_v58  ;;  %v2385_v21 = vsel %vm4322_vm12, %v2919_v50, %v2384_v60  ;;  %v2914_v20 = vrot.slane %v2332_v36, 9 }
 0x11a   : > { %3155 = vmatpush3.bf16.msra.mxu1 %v3535_v6  ;;  %v2169_v6 = vor.u32 %v2168_v22, %v2165_v40  ;;  %v2364_v40 = vrot.slane %v4420_v52, 5  ;;  %v2915_v22 = vrot.slane %v2333_v16, 9 }
 0x11b   : > { %3249 = vmatpush3.bf16.msra.mxu0 %v3534_v38  ;;  %3156 = vmatprep.subr.bf16.mxu1 %v3538_v3  ;;  %v2916_v38 = vrot.slane %v2334_v30, 9 }
 0x11c   : > { %3250 = vmatprep.subr.bf16.mxu0 %v3536_v37 }
 0x11d   : > { %v2373_v11 = vsel %vm4322_vm12, %v2916_v38, %v2372_v46 }
 0x11e   : > { %3157 = vmatpush3.bf16.msra.mxu1 %v3538_v3  ;;  %v2170_v3 = vrot.slane %v2169_v6, 4  ;;  %v2922_v35 = vcombine.low %v2373_v11, %v2377_v27 }
 0x11f   : > { %3251 = vmatpush3.bf16.msra.mxu0 %v3536_v37  ;;  %3158 = vmatprep.subr.bf16.mxu1 %v3541_v19  ;;  %v3549_v37 = vld [vmem:[#allocation6 + $0x210] sm:$0xff]  }
 0x120   : > { %3252 = vmatprep.subr.bf16.mxu0 %v3540_v14  ;;  %v2175_v8 = vsel %vm4142_vm9, %v2170_v3, %v2174_v0 }
 0x121   : > { %v2903_v45 = vcombine.low %v2161_v7, %v2175_v8 }
 0x122   : > { %3159 = vmatpush3.bf16.msra.mxu1 %v3541_v19  ;;  %v3553_v19 = vld [vmem:[#allocation6 + $0x230] sm:$0xff]  }
 0x123   : > { %3253 = vmatpush3.bf16.msra.mxu0 %v3540_v14  ;;  %3288 = vmatprep.subr.bf16.mxu1 %v3545_v51  ;;  %v2336_v14 = vld [vmem:[#allocation2 + $0x40] sm:$0xe] }
 0x124   : > { %3254 = vmatprep.subr.bf16.mxu0 %v3542_v13  ;;  %v2918_v41 = vrot.slane %v2336_v14, 9 }
 0x125   : > { %3161 = vmatmul.mubr.bf16.vlgmr.msra.gmra.mrb[0].mxu1 %v3544_v18 }
 0x126   : > { %3296 = vmatpush3.bf16.msra.mxu1 %v3545_v51  ;;  %3164 = vmatprep.mubr.bf16.mxu1 %v3547_v48  ;;  %v2381_v32 = vsel %vm4322_vm12, %v2918_v41, %v2380_v1 }
 0x127   : > { %3255 = vmatpush3.bf16.msra.mxu0 %v3542_v13  ;;  %3289 = vmatprep.subr.bf16.mxu1 %v3546_v26  ;;  %v2923_v24 = vcombine.low %v2381_v32, %v2385_v21  ;;  %v2365_v13 = vsel %vm4322_vm12, %v2914_v20, %v2364_v40 }
 0x128   : > { %3264 = vmatprep.subr.bf16.mxu0 %v3545_v51 }
 0x12a   : > { %3257 = vmatmul.mubr.bf16.vlgmr.msra.gmra.mrb[0].mxu0 %v2901_v53  ;;  %3297 = vmatpush3.bf16.msra.mxu1 %v3546_v26 }
 0x12b   : > { %3265 = vmatpush3.bf16.msra.mxu0 %v3545_v51  ;;  %3260 = vmatprep.mubr.bf16.mxu0 %v2902_v57  ;;  %v2368_v51 = vrot.slane %v4422_v12, 5 }
 0x12c   : > { %3266 = vmatprep.subr.bf16.mxu0 %v3546_v26  ;;  %3290 = vmatprep.subr.bf16.mxu1 %v3549_v37 }
 0x12d   : > { %3165 = vmatmul.mubr.bf16.gmra.mrb[4].mxu1 %v3548_v63  ;;  %v2369_v30 = vsel %vm4322_vm12, %v2915_v22, %v2368_v51 }
 0x12e   : > { %3298 = vmatpush3.bf16.msra.mxu1 %v3549_v37  ;;  %3284 = vmatprep.mubr.bf16.mxu1 %v2922_v35  ;;  %v2921_v17 = vcombine.low %v2365_v13, %v2369_v30 }
 0x12f   : > { %3267 = vmatpush3.bf16.msra.mxu0 %v3546_v26  ;;  %3291 = vmatprep.subr.bf16.mxu1 %v3550_v10 }
 0x130   : > { %3268 = vmatprep.subr.bf16.mxu0 %v3549_v37 }
 0x132   : > { %3261 = vmatmul.mubr.bf16.gmra.mrb[4].mxu0 %v2903_v45  ;;  %3299 = vmatpush3.bf16.msra.mxu1 %v3550_v10 }
 0x133   : > { %3269 = vmatpush3.bf16.msra.mxu0 %v3549_v37  ;;  %3292 = vmatprep.subr.bf16.mxu1 %v3551_v56 }
 0x134   : > { %3270 = vmatprep.subr.bf16.mxu0 %v3550_v10  ;;  %3280 = vmatprep.mubr.bf16.mxu0 %v2920_v31 }
 0x136   : > { %3300 = vmatpush3.bf16.msra.mxu1 %v3551_v56 }
 0x137   : > { %3271 = vmatpush3.bf16.msra.mxu0 %v3550_v10  ;;  %3293 = vmatprep.subr.bf16.mxu1 %v3552_v25 }
 0x138   : > { %3272 = vmatprep.subr.bf16.mxu0 %v3551_v56 }
 0x13a   : > { %3301 = vmatpush3.bf16.msra.mxu1 %v3552_v25 }
 0x13b   : > { %3273 = vmatpush3.bf16.msra.mxu0 %v3551_v56  ;;  %3294 = vmatprep.subr.bf16.mxu1 %v3553_v19 }
 0x13c   : > { %3274 = vmatprep.subr.bf16.mxu0 %v3552_v25 }
 0x13e   : > { %3302 = vmatpush3.bf16.msra.mxu1 %v3553_v19 }
 0x13f   : > { %3275 = vmatpush3.bf16.msra.mxu0 %v3552_v25  ;;  %3295 = vmatprep.subr.bf16.mxu1 %v3554_v28 }
 0x140   : > { %3276 = vmatprep.subr.bf16.mxu0 %v3553_v19 }
 0x142   : > { %3303 = vmatpush3.bf16.msra.mxu1 %v3554_v28 }
 0x143   : > { %3277 = vmatpush3.bf16.msra.mxu0 %v3553_v19 }
 0x144   : > { %3278 = vmatprep.subr.bf16.mxu0 %v3554_v28 }
 0x145   : > { %3285 = vmatmul.mubr.bf16.vlgmr.msra.gmra.mrb[8].mxu1 %v2923_v24 }
 0x147   : > { %3279 = vmatpush3.bf16.msra.mxu0 %v3554_v28 }
 0x14a   : > { %3281 = vmatmul.mubr.bf16.vlgmr.msra.gmra.mrb[0].mxu0 %v2921_v17 }
 0x1f8   : > { %v3162_v18 = vpop.f32.mrb[0].mxu1 }
 0x1f9   : > { %v1346_v52 = vpop.f32.mrb[1].mxu1 }
 0x1fa   : > { %v3163_v43 = vpop.f32.mrb[2].mxu1 }
 0x1fb   : > { %v1349_v42 = vpop.f32.mrb[3].mxu1 }
 0x200   : > { %v3166_v12 = vpop.f32.mrb[4].mxu1 }
 0x201   : > { %v1362_v39 = vpop.f32.mrb[5].mxu1 }
 0x202   : > { %v3167_v47 = vpop.f32.mrb[6].mxu1 }
 0x203   : > { %v1365_v48 = vpop.f32.mrb[7].mxu1 }
 0x205   : > { %v3262_v49 = vpop.f32.mrb[4].mxu0 }
 0x206   : > { %v3308_v44 = vadd.f32 %v3262_v49, %v3166_v12  ;;  %v2307_v6 = vpop.f32.mrb[5].mxu0 }
 0x207   : > { %v3310_v54 = vadd.f32 %v2307_v6, %v1362_v39  ;;  %v3263_v26 = vpop.f32.mrb[6].mxu0 }
 0x208   : > { %v3312_v55 = vadd.f32 %v3263_v26, %v3167_v47  ;;  %v2310_v38 = vpop.f32.mrb[7].mxu0 }
 0x209   : > { %v3314_v46 = vadd.f32 %v2310_v38, %v1365_v48 }
 0x218   : > { %v3286_v33 = vpop.f32.mrb[8].mxu1 }
 0x219   : > { %v4474_v9 = vadd.f32 %v3308_v44, %v3286_v33  ;;  %v2517_v53 = vpop.f32.mrb[9].mxu1 }
 0x21a   : > { %v4476_v57 = vadd.f32 %v3310_v54, %v2517_v53  ;;  %v3287_v29 = vpop.f32.mrb[10].mxu1 }
 0x21b   : > { %v4478_v58 = vadd.f32 %v3312_v55, %v3287_v29  ;;  %v2520_v34 = vpop.f32.mrb[11].mxu1 }
 0x21c   : > { %v4480_v15 = vadd.f32 %v3314_v46, %v2520_v34 }
 0x21d   : > { %v3282_v3 = vpop.f32.mrb[0].mxu0  ;;  %v2959_v0 = vpack.c.bf16 %v4478_v58, %v4474_v9 }
 0x21e   : > { %v3304_v11 = vadd.f32 %v3282_v3, %v3162_v18  ;;  %v2501_v27 = vpop.f32.mrb[1].mxu0  ;;  %v2954_v37 = vpack.c.bf16 %v4480_v15, %v4476_v57 }
 0x21f   : > { %v3305_v63 = vadd.f32 %v2501_v27, %v1346_v52  ;;  %v3283_v23 = vpop.f32.mrb[2].mxu0  ;;  %2963 = vst [vmem:[%s302_s26 + $0x18] sm:$0xff] %v2959_v0  }
 0x220   : > { %v3306_v61 = vadd.f32 %v3283_v23, %v3163_v43  ;;  %v2504_v62 = vpop.f32.mrb[3].mxu0  ;;  %2962 = vst [vmem:[%s302_s26 + $0x10] sm:$0xff] %v2954_v37   ;;  %v2556_v2 = vmul.f32 %v3304_v11, %v3304_v11 }
 0x221   : > { %v3307_v4 = vadd.f32 %v2504_v62, %v1349_v42  ;;  %v2554_v7 = vmul.f32 %v3305_v63, %v3305_v63 }
 0x222   : > { %v2949_v35 = vpack.c.bf16 %v3306_v61, %v3304_v11 }
 0x223   : > { %v2540_v8 = vadd.f32 %v3307_v4, %v3305_v63  ;;  %v2555_v10 = vmul.f32 %v3307_v4, %v3307_v4  ;;  %v2944_v59 = vpack.c.bf16 %v3307_v4, %v3305_v63 }
 0x224   : > { %2961 = vst [vmem:[%s302_s26 + $0x8] sm:$0xff] %v2949_v35  }
 0x225   : > { %v2541_v45 = vadd.f32 %v3304_v11, %v2540_v8  ;;  %v2562_v56 = vadd.f32 %v2555_v10, %v2554_v7  ;;  %2945 = vst [vmem:[%s302_s26] sm:$0xff] %v2944_v59  }
 0x226   : > { %3682 = shalt.err (!%p3679_p0)
}
 0x227   : > { %s3683_s17 = scalar_lea.hbm %s4494_s27, 512  ;;  %s3687_s9 = scalar_lea.hbm %s4590_s4, 1024 }
 0x228   : > { %p3684_p4 = scmp.ne.s32.totalorder %s4494_s27, %s3683_s17  ;;  %p3688_p12 = scmp.lt.u32.totalorder %s4494_s27, %s4590_s4 }
 0x229   : > { %p3689_p1 = scmp.lt.u32.totalorder %s3687_s9, %s3683_s17  ;;  %p3691_p13 = scmp.lt.u32.totalorder %s3683_s17, %s4494_s27 }
 0x22a   : > { %p3685_p2 = pnand %p3684_p4, %p3989_p10 }
 0x22b   : > { %p3690_p11 = por %p3689_p1, %p3688_p12 }
 0x22c   : > { %p3686_p8 = pneg %p3685_p2 }
 0x22d   : > { %p3692_p6 = por %p3691_p13, %p3690_p11 }
 0x22f   : > { %p3693_p3 = pnand %p3692_p6, %p3686_p8 }
 0x231   : > { %3696 = shalt.err (!%p3693_p3)
}
 0x232   : > { %s3801_s30 = smov 64   ;;  %s3802_s11 = smov 4   ;;  %v2557_v31 = vmul.f32 %v3306_v61, %v3306_v61  ;;  %v2563_v25 = vadd.f32 %v2562_v56, %v2556_v2  ;;  %v2542_v19 = vadd.f32 %v3306_v61, %v2541_v45  ;;  %v2558_v14 = vmul.f32 %v4476_v57, %v4476_v57 }
 0x233   : > { %3382 = dma.vmem_to_hbm [thread:$0]  (%p3989_p10), %s4489_s28, 512, %s4494_s27, %s2593_s10, %s3801_s30, %s3801_s30, %s3802_s11   ;;  %v2559_v41 = vmul.f32 %v4480_v15, %v4480_v15  ;;  %v2560_v28 = vmul.f32 %v4474_v9, %v4474_v9  ;;  %v2561_v32 = vmul.f32 %v4478_v58, %v4478_v58 }
 0x234   : > { %v2543_v5 = vadd.f32 %v4476_v57, %v2542_v19  ;;  %v2564_v1 = vadd.f32 %v2563_v25, %v2557_v31  ;;  %s2797_s28 = sshll.u32 %s4050_s24, 1  ;;  %s2936_s13 = sshll.u32 %s3783_s21, 5 }
 0x235   : > { %s309_s27 = scalar_lea.vmem [#allocation12], %s2797_s28  ;;  %s4537_s16 = scalar_lea.hbm %s4591_s5, %s2936_s13 }
 0x236   : > { %v2544_v60 = vadd.f32 %v4480_v15, %v2543_v5  ;;  %v2565_v50 = vadd.f32 %v2564_v1, %v2558_v14  ;;  %s2630_s10 = sshll.u32 %s309_s27, 4  ;;  %s2598_s14 = scalar_lea.sflag [#allocation13], %s4050_s24  ;;  %s4539_s10 = int_to_ptr.vmem [resolvable:$true] %s2630_s10 }
 0x237   : > { %s3697_s17 = scalar_lea.vmem %s4539_s10, 32  ;;  %s3803_s21 = smov [#allocation12]  }
 0x238   : > { %v2545_v36 = vadd.f32 %v4474_v9, %v2544_v60  ;;  %v2566_v16 = vadd.f32 %v2565_v50, %v2559_v41  ;;  %p3698_p5 = scmp.ne.s32.totalorder %s4539_s10, %s3697_s17  ;;  %s3701_s12 = sshll.u32 %s3803_s21, 4  ;;  %s3702_s12 = int_to_ptr.vmem [resolvable:$false] %s3701_s12 }
 0x239   : > { %s3703_s25 = scalar_lea.vmem %s3702_s12, 64  ;;  %p3704_p0 = scmp.lt.s32.totalorder %s4539_s10, %s3702_s12 }
 0x23a   : > { %v2546_v21 = vadd.f32 %v4478_v58, %v2545_v36  ;;  %v2567_v20 = vadd.f32 %v2566_v16, %v2560_v28  ;;  %p3699_p7 = pnand %p3698_p5, %p3989_p10  ;;  %p3705_p4 = scmp.lt.s32.totalorder %s3703_s25, %s3697_s17 }
 0x23c   : > { %v2547_v40 = vrot.slane %v2546_v21, 4  ;;  %v2568_v22 = vadd.f32 %v2567_v20, %v2561_v32  ;;  %p3700_p9 = pneg %p3699_p7  ;;  %p3706_p2 = por %p3705_p4, %p3704_p0 }
 0x23e   : > { %v2548_v51 = vadd.f32 %v2547_v40, %v2546_v21  ;;  %v2569_v24 = vrot.slane %v2568_v22, 4  ;;  %p3707_p8 = pnand %p3706_p2, %p3700_p9 }
 0x240   : > { %v2549_v13 = vrot.slane %v2548_v51, 2  ;;  %v2570_v30 = vadd.f32 %v2569_v24, %v2568_v22 }
 0x242   : > { %v2550_v17 = vadd.f32 %v2549_v13, %v2548_v51  ;;  %v2571_v18 = vrot.slane %v2570_v30, 2 }
 0x244   : > { %v2551_v52 = vrot.slane %v2550_v17, 1  ;;  %v2572_v43 = vadd.f32 %v2571_v18, %v2570_v30 }
 0x246   : > { %v2552_v42 = vadd.f32 %v2551_v52, %v2550_v17  ;;  %v2573_v12 = vrot.slane %v2572_v43, 1 }
 0x248   : > { %2553 = vst [vmem:[%s309_s27] sm:$0x1] %v2552_v42  ;;  %v2574_v39 = vadd.f32 %v2573_v12, %v2572_v43 }
 0x24a   : > { %2575 = vst [vmem:[%s309_s27 + $0x1] sm:$0x1] %v2574_v39 }
 0x24b   : > { %3710 = shalt.err (!%p3707_p8)
}
 0x24c   : > { %s3711_s24 = scalar_lea.hbm %s4537_s16, 32  ;;  %s3715_s26 = scalar_lea.hbm %s4591_s5, 64 }
 0x24d   : > { %p3712_p12 = scmp.ne.s32.totalorder %s4537_s16, %s3711_s24  ;;  %p3716_p13 = scmp.lt.u32.totalorder %s4537_s16, %s4591_s5 }
 0x24e   : > { %p3717_p6 = scmp.lt.u32.totalorder %s3715_s26, %s3711_s24  ;;  %p3719_p5 = scmp.lt.u32.totalorder %s3711_s24, %s4537_s16 }
 0x24f   : > { %p3713_p1 = pnand %p3712_p12, %p3989_p10 }
 0x250   : > { %p3718_p3 = por %p3717_p6, %p3716_p13 }
 0x251   : > { %p3714_p11 = pneg %p3713_p1 }
 0x252   : > { %p3720_p7 = por %p3719_p5, %p3718_p3 }
 0x254   : > { %p3721_p9 = pnand %p3720_p7, %p3714_p11 }
 0x256   : > { %3724 = shalt.err (!%p3721_p9)
}
 0x257   : > { %3383 = dma.vmem_to_hbm [thread:$0]  (%p3989_p10), %s4539_s10, 32, %s4537_s16, %s2598_s14  }
 0x258 PF: > { %s4623_s28 = sld [smem:[#allocation19_spill]]  ;;  %s4624_s13 = sld [smem:[#allocation20_spill]] }
 0x259   : > { %p4626_p4 = scmp.ge.s32.totalorder %s3791_s23, 2 }
 0x25e   : > { %s2642_s27 = sand.u32 1, %s4623_s28   ;;  %p4625_p0 = scmp.ne.s32.totalorder %s4624_s13, 0 }
 0x25f   : > { %s2643_s29 = scalar_lea.sflag [#allocation5], %s2642_s27 }
 0x260   : > { %p3401_p2 = pnand %p4626_p4, %p4625_p0 }
 0x262   : > { %3762 = dma.done.wait (!%p3401_p2), %s2643_s29, 512  }
 0x263   : > { %3764 = vsyncadd (!%p3401_p2), %s2643_s29, 4294966784  ;;  %s2652_s7 = scalar_lea.sflag [#allocation13], %s2642_s27 }
 0x264   : > { %3766 = dma.done.wait (!%p3401_p2), %s2652_s7, 32  }
 0x265   : > { %3768 = vsyncadd (!%p3401_p2), %s2652_s7, 4294967264  ;;  %s27_s23 = sadd.s32 1, %s3791_s23   ;;  %s4627_s18 = smov %s3775_s19 }
 0x266   : > { %p24_p8 = scmp.ge.s32.totalorder %s27_s23, 4   ;;  %s4628_s19 = smov %s3779_s20 }
 0x267   : > { %s4629_s20 = smov %s4001_s6  ;;  %s4630_s21 = smov %s3787_s22 }
 0x268   : > { %s4631_s22 = smov %s4633_s15  ;;  %26 = sbr.rel (!%p24_p8) target bundleno = 10 (0xa), region = 132 }
 0x26f   :  { %2657 = vsyncpa [#allocation4], 1 }
 0x270   :  { %2659 = vsyncpa [#allocation4 + $0x1], 1 }
 0x271   :  { %2660 = vsyncpa [#allocation7], 1 }
 0x272   :  { %2661 = vsyncpa [#allocation10], 1 }
 0x273   :  { %2662 = vsyncpa [#allocation5], 1 }
 0x274   :  { %2664 = vsyncpa [#allocation5 + $0x1], 1 }
 0x275   :  { %2665 = vsyncpa [#allocation13], 1 }
 0x276   :  { %2667 = vsyncpa [#allocation13 + $0x1], 1 }

</bundles_post_ra>
